<compile_context>
chip_gen: v5e
topology: v5e:2x2
jax: 0.10.0
libtpu: 0.0.40
codegen_flags: <defaults>
</compile_context>

<pallas_src>
import functools
import math

import jax
import jax.numpy as jnp
from jax.experimental import pallas as pl

# ----------------------------- small config ---------------------------------
BATCH = 2
IN_CH = 4
IMG = 16
PATCH = 4
HIDDEN = 32
NUM_HEADS = 4
HEAD_DIM = HIDDEN // NUM_HEADS
MLP_DIM = 64
NUM_LAYERS = 2
LN_EPS = 1e-6
OMICS_DIMS = {"rna": 12, "cnv": 10, "meth": 14}  # 3 omics modalities -> 3 text tokens
OMICS_NAMES = list(OMICS_DIMS.keys())            # canonical modality / token order
N_TEXT = len(OMICS_DIMS)
N_PATCHES = (IMG // PATCH) ** 2
PAD_LANES = 128                                  # lane-dense width of both outputs
HT = NUM_HEADS * N_TEXT                          # per-batch (head, key) column block
assert BATCH * HT <= PAD_LANES


# ----------------------------- in-kernel helpers ------------------------------
def _gelu_tanh(x):
    # TODO(synk): torch F.gelu is exact-erf GELU; the tanh form is used in-kernel
    # (guaranteed Mosaic lowering, EUP tanh).  Max abs deviation ~3e-4, well inside
    # the test tolerance.
    c = math.sqrt(2.0 / math.pi)
    return 0.5 * x * (1.0 + jnp.tanh(c * (x + 0.044715 * x * x * x)))


def _layernorm(x, gamma, beta):
    mu = jnp.mean(x, axis=-1, keepdims=True)
    xc = x - mu
    var = jnp.mean(xc * xc, axis=-1, keepdims=True)
    return xc * jax.lax.rsqrt(var + LN_EPS) * gamma + beta


# ----------------------------- fused Pallas kernel ----------------------------
def _fused_forward_kernel(patches_ref, patch_w_ref, patch_b_ref, pos_ref,
                          xtext_ref, wtext_ref, btext_ref,
                          epad_ref, mask2_ref, gsum_ref, bmask_ref, ipad_ref,
                          ln_ref, wq_ref, bq_ref, wkv_ref, bkv_ref,
                          wo_ref, bo_ref, wfc1_ref, bfc1_ref, wfc2_ref, bfc2_ref,
                          lnf_ref,
                          encoded_ref, probs_ref,
                          *, num_layers):
    f32 = jnp.float32
    scale = 1.0 / math.sqrt(HEAD_DIM)

    # Constant layout matrices, loaded once (hoisted out of the layer loop).
    e_pad = epad_ref[...]        # (128, B*T)  row (b,h,t) selects text token (b,t)
    mask2 = mask2_ref[...]       # (128, 2H)   head block-diagonal mask for K|V
    gsum = gsum_ref[...]         # (128, 128)  same-(batch,head)-group summation
    bmask = bmask_ref[...]       # (B*nP, 128) keep own-batch columns only

    # -------- Embeddings ------------------------------------------------------
    # Conv2d-as-matmul patch embedding + learned position embeddings.
    x = jnp.dot(patches_ref[...], patch_w_ref[...], preferred_element_type=f32)
    x = x + patch_b_ref[...] + pos_ref[...]                         # (B*nP, H)

    # Omics projections: ONE stacked block-structured matmul for all modalities
    # and all batch elements (inputs scattered to disjoint column ranges,
    # weights stacked along K by the wrapper).
    texts = jnp.dot(xtext_ref[...], wtext_ref[...],
                    preferred_element_type=f32) + btext_ref[...]    # (B*T, H)

    # -------- Encoder: cross-attention + MLP, all VMEM-resident ----------------
    for l in range(num_layers):
        lnp = ln_ref[l]                                             # (6, H)

        h_res = x
        xn = _layernorm(x, lnp[0:1], lnp[1:2])                      # (B*nP, H)
        q = jnp.dot(xn, wq_ref[l], preferred_element_type=f32) + bq_ref[l]

        # Stacked text LayerNorm + fused K/V projection (one matmul for all B*T
        # tokens), then expand into the (128, H) head-block-diagonal layout with
        # one tiny constant matmul + mask — no per-head or per-batch slicing.
        tn = _layernorm(texts, lnp[2:3], lnp[3:4])                  # (B*T, H)
        kv = jnp.dot(tn, wkv_ref[l], preferred_element_type=f32) + bkv_ref[l]   # (B*T, 2H)
        kvb = jnp.dot(e_pad, kv, preferred_element_type=f32) * mask2            # (128, 2H)
        k_blk = kvb[:, :HIDDEN]                                     # (128, H)
        v_blk = kvb[:, HIDDEN:]                                     # (128, H)

        # One score matmul for ALL (batch, head, key): lane-dense (B*nP, 128).
        s = jax.lax.dot_general(q, k_blk, (((1,), (1,)), ((), ())),
                                preferred_element_type=f32) * scale
        # Per-row max is a valid stabilizer for every 3-wide softmax group
        # (scores here are O(1), so no cross-head underflow risk).
        m = jnp.max(s, axis=-1, keepdims=True)
        e = jnp.exp(s - m)
        denom = jnp.dot(e, gsum, preferred_element_type=f32)        # group sums, MXU
        p = e * pl.reciprocal(denom, approx=True) * bmask           # (B*nP, 128)

        # Lane-dense, unmasked probability store (pad / cross-batch cols are 0).
        probs_ref[l] = p

        # One context matmul; result is already head-concatenated along H.
        ctx = jnp.dot(p, v_blk, preferred_element_type=f32)         # (B*nP, H)
        x = jnp.dot(ctx, wo_ref[l], preferred_element_type=f32) + bo_ref[l] + h_res

        h_res = x
        xn = _layernorm(x, lnp[4:5], lnp[5:6])
        y = jnp.dot(xn, wfc1_ref[l], preferred_element_type=f32) + bfc1_ref[l]
        y = _gelu_tanh(y)
        x = jnp.dot(y, wfc2_ref[l], preferred_element_type=f32) + bfc2_ref[l] + h_res

    # Final LayerNorm; pad to 128 lanes via a constant identity-pad matmul so the
    # output store is a single unmasked full-width store.
    lnf = lnf_ref[...]                                              # (2, H)
    enc = _layernorm(x, lnf[0:1], lnf[1:2])                         # (B*nP, H)
    encoded_ref[...] = jnp.dot(enc, ipad_ref[...], preferred_element_type=f32)


# ----------------------------- wrapper (layout plumbing) ----------------------
def extract_patches(wsi):
    """NCHW image -> (B, nPatches, C*ph*pw), same ordering as Conv2d(k=stride=patch)."""
    B, C, H, W = wsi.shape
    p = PATCH
    x = wsi.reshape(B, C, H // p, p, W // p, p)
    x = x.transpose(0, 2, 4, 1, 3, 5)  # (B, H/p, W/p, C, p, p)
    return x.reshape(B, (H // p) * (W // p), C * p * p)


def _attention_constants(B):
    """Constant layout matrices for the block-diagonal-by-head attention."""
    c = jnp.arange(PAD_LANES)
    b_c = c // HT
    h_c = (c % HT) // N_TEXT
    t_c = c % N_TEXT
    valid = c < B * HT

    # E_pad: row c selects text-token row b_c*T + t_c of the stacked kv matrix.
    src = b_c * N_TEXT + t_c
    e_pad = ((jnp.arange(B * N_TEXT)[None, :] == src[:, None])
             & valid[:, None]).astype(jnp.float32)                  # (128, B*T)

    # Head block-diagonal mask, duplicated for the fused K|V columns.
    d = jnp.arange(HIDDEN)
    headmask = ((d[None, :] // HEAD_DIM) == h_c[:, None]) & valid[:, None]
    mask2 = jnp.concatenate([headmask, headmask], axis=1).astype(jnp.float32)  # (128, 2H)

    # Group-sum matrix: 1 where two columns are in the same 3-wide key group.
    gsum = ((c[None, :] // N_TEXT) == (c[:, None] // N_TEXT)).astype(jnp.float32)

    # Batch mask: row (b, i) keeps only its own batch's column block.
    r = jnp.arange(B * N_PATCHES)
    bmask = ((b_c[None, :] == (r // N_PATCHES)[:, None])
             & valid[None, :]).astype(jnp.float32)                  # (B*nP, 128)

    # Identity-pad: (H, 128) = [I_H | 0] for the lane-dense encoded store.
    ipad = (jnp.arange(HIDDEN)[:, None] == c[None, :]).astype(jnp.float32)
    return e_pad, mask2, gsum, bmask, ipad


def _pack_inputs(params, wsi, omics_inputs_dict):
    """Pure layout plumbing: flatten patches, block-structure omics inputs so all
    modality projections become a single matmul, build the constant attention
    layout matrices, and stack per-layer params."""
    B = wsi.shape[0]
    names = OMICS_NAMES
    dims = [omics_inputs_dict[n].shape[1] for n in names]
    offs = [0]
    for dmn in dims:
        offs.append(offs[-1] + dmn)
    d_total = offs[-1]
    T = len(names)

    patches = extract_patches(wsi).reshape(B * N_PATCHES, -1)
    pos = jnp.tile(params["pos_emb"].reshape(N_PATCHES, HIDDEN), (B, 1))

    # Stacked (B*T, d_total) omics matrix: row b*T + i holds modality i of batch b
    # in its own column range; the stacked weight makes it one matmul.
    xtext = jnp.zeros((B * T, d_total), jnp.float32)
    for i, n in enumerate(names):
        xtext = xtext.at[i::T, offs[i]:offs[i + 1]].set(omics_inputs_dict[n])
    wtext = jnp.concatenate([params["omics"][n][0] for n in names], axis=0)   # (d_total, H)
    btext = jnp.tile(jnp.stack([params["omics"][n][1] for n in names], axis=0), (B, 1))  # (B*T, H)

    e_pad, mask2, gsum, bmask, ipad = _attention_constants(B)

    def stack(fn):
        return jnp.stack([fn(layer) for layer in params["layers"]], axis=0)

    ln_stack = stack(lambda l: jnp.stack([l["ln_attn"][0], l["ln_attn"][1],
                                          l["ln_text"][0], l["ln_text"][1],
                                          l["ln_ffn"][0], l["ln_ffn"][1]], axis=0))
    wq = stack(lambda l: l["q"][0])
    bq = stack(lambda l: l["q"][1].reshape(1, HIDDEN))
    wkv = stack(lambda l: jnp.concatenate([l["k"][0], l["v"][0]], axis=1))
    bkv = stack(lambda l: jnp.concatenate([l["k"][1], l["v"][1]]).reshape(1, 2 * HIDDEN))
    wo = stack(lambda l: l["o"][0])
    bo = stack(lambda l: l["o"][1].reshape(1, HIDDEN))
    wfc1 = stack(lambda l: l["fc1"][0])
    bfc1 = stack(lambda l: l["fc1"][1].reshape(1, MLP_DIM))
    wfc2 = stack(lambda l: l["fc2"][0])
    bfc2 = stack(lambda l: l["fc2"][1].reshape(1, HIDDEN))
    lnf = jnp.stack([params["ln_final"][0], params["ln_final"][1]], axis=0)   # (2, H)

    return (patches, params["patch_w"], params["patch_b"].reshape(1, HIDDEN), pos,
            xtext, wtext, btext,
            e_pad, mask2, gsum, bmask, ipad,
            ln_stack, wq, bq, wkv, bkv, wo, bo, wfc1, bfc1, wfc2, bfc2, lnf)


def transformer_forward(params, wsi, omics_inputs_dict):
    B = wsi.shape[0]
    args = _pack_inputs(params, wsi, omics_inputs_dict)

    kernel = functools.partial(_fused_forward_kernel, num_layers=NUM_LAYERS)
    encoded_padded, probs_padded = pl.pallas_call(
        kernel,
        out_shape=(
            jax.ShapeDtypeStruct((B * N_PATCHES, PAD_LANES), jnp.float32),
            jax.ShapeDtypeStruct((NUM_LAYERS, B * N_PATCHES, PAD_LANES), jnp.float32),
        ),
    )(*args)

    # Unpack the lane-dense slabs (wrapper-side layout plumbing).
    encoded = encoded_padded[:, :HIDDEN].reshape(B, N_PATCHES, HIDDEN)

    packed = probs_padded[:, :, :B * HT].reshape(
        NUM_LAYERS, B, N_PATCHES, B, NUM_HEADS, N_TEXT)
    diag = jnp.moveaxis(jnp.diagonal(packed, axis1=1, axis2=3), -1, 1)  # (L, B, nP, h, T)
    probs = diag.transpose(0, 1, 3, 2, 4)                               # (L, B, h, nP, T)
    attn_weights = [probs[l] for l in range(NUM_LAYERS)]
    return encoded, attn_weights


# ----------------------------- params ----------------------------------------
def init_params(key):
    keys = jax.random.split(key, 128)
    it = iter(keys)

    def dense(din, dout):
        w = 0.02 * jax.random.normal(next(it), (din, dout), jnp.float32)
        b = 0.01 * jax.random.normal(next(it), (dout,), jnp.float32)
        return (w, b)

    # Conv2d weight in PyTorch layout (O, C, kH, kW) -> flattened matmul weight.
    conv_w = 0.02 * jax.random.normal(next(it), (HIDDEN, IN_CH, PATCH, PATCH), jnp.float32)
    conv_b = 0.01 * jax.random.normal(next(it), (HIDDEN,), jnp.float32)

    params = {
        "patch_w": conv_w.reshape(HIDDEN, IN_CH * PATCH * PATCH).T,  # (C*ph*pw, HIDDEN)
        "patch_b": conv_b,
        "pos_emb": 0.02 * jax.random.normal(next(it), (1, N_PATCHES, HIDDEN), jnp.float32),
        "omics": {name: dense(dim, HIDDEN) for name, dim in OMICS_DIMS.items()},
        "layers": [],
        "ln_final": (jnp.ones((HIDDEN,), jnp.float32), jnp.zeros((HIDDEN,), jnp.float32)),
    }
    for _ in range(NUM_LAYERS):
        params["layers"].append({
            "ln_attn": (jnp.ones((HIDDEN,), jnp.float32), jnp.zeros((HIDDEN,), jnp.float32)),
            "ln_text": (jnp.ones((HIDDEN,), jnp.float32), jnp.zeros((HIDDEN,), jnp.float32)),
            "q": dense(HIDDEN, HIDDEN),
            "k": dense(HIDDEN, HIDDEN),
            "v": dense(HIDDEN, HIDDEN),
            "o": dense(HIDDEN, HIDDEN),
            "ln_ffn": (jnp.ones((HIDDEN,), jnp.float32), jnp.zeros((HIDDEN,), jnp.float32)),
            "fc1": dense(HIDDEN, MLP_DIM),
            "fc2": dense(MLP_DIM, HIDDEN),
        })
    return params


# ----------------------------- pure-JAX reference -----------------------------
def reference_forward(params, wsi, omics_inputs_dict):
    hp = jax.lax.Precision.HIGHEST

    def lin(x, wb):
        w, b = wb
        return jnp.dot(x, w, precision=hp) + b

    def ln(x, gb):
        g, b = gb
        mu = jnp.mean(x, -1, keepdims=True)
        var = jnp.mean((x - mu) ** 2, -1, keepdims=True)
        return (x - mu) / jnp.sqrt(var + LN_EPS) * g + b

    B, C, H, W = wsi.shape
    nP = (H // PATCH) * (W // PATCH)
    patches = extract_patches(wsi)
    x = jnp.dot(patches, params["patch_w"], precision=hp) + params["patch_b"]
    x = x + params["pos_emb"]
    text = jnp.concatenate(
        [lin(omics_inputs_dict[n], params["omics"][n])[:, None, :] for n in OMICS_NAMES],
        axis=1)
    T = text.shape[1]

    attn_weights = []
    scale = 1.0 / math.sqrt(HEAD_DIM)
    for layer in params["layers"]:
        h = x
        xn = ln(x, layer["ln_attn"])
        tn = ln(text, layer["ln_text"])

        def heads(z, wb, L):
            return lin(z, wb).reshape(B, L, NUM_HEADS, HEAD_DIM).transpose(0, 2, 1, 3)

        q = heads(xn, layer["q"], nP)
        k = heads(tn, layer["k"], T)
        v = heads(tn, layer["v"], T)
        s = jnp.einsum("bhqd,bhkd->bhqk", q, k, precision=hp) * scale
        p = jax.nn.softmax(s, axis=-1)
        attn_weights.append(p)
        ctx = jnp.einsum("bhqk,bhkd->bhqd", p, v, precision=hp)
        ctx = ctx.transpose(0, 2, 1, 3).reshape(B, nP, HIDDEN)
        x = lin(ctx, layer["o"]) + h

        h = x
        y = lin(ln(x, layer["ln_ffn"]), layer["fc1"])
        y = jax.nn.gelu(y, approximate=False)
        x = lin(y, layer["fc2"]) + h

    encoded = ln(x, params["ln_final"])
    return encoded, attn_weights


# ----------------------------- main -------------------------------------------
if __name__ == "__main__":
    root = jax.random.PRNGKey(0)
    k_param, k_wsi, k_om = jax.random.split(root, 3)

    params = init_params(k_param)
    wsi = jax.random.normal(k_wsi, (BATCH, IN_CH, IMG, IMG), jnp.float32)
    om_keys = jax.random.split(k_om, len(OMICS_DIMS))
    omics = {name: jax.random.normal(kk, (BATCH, dim), jnp.float32)
             for kk, (name, dim) in zip(om_keys, OMICS_DIMS.items())}

    fwd = jax.jit(transformer_forward)
    encoded, attn_weights = fwd(params, wsi, omics)
    encoded = jax.block_until_ready(encoded)
    attn_weights = [jax.block_until_ready(a) for a in attn_weights]

    # correctness check against a pure-JAX reference
    ref_enc, ref_attn = reference_forward(params, wsi, omics)
    assert encoded.shape == (BATCH, N_PATCHES, HIDDEN)
    assert len(attn_weights) == NUM_LAYERS
    assert bool(jnp.all(jnp.isfinite(encoded)))
    assert bool(jnp.allclose(encoded, ref_enc, rtol=2e-2, atol=2e-2))
    for a, r in zip(attn_weights, ref_attn):
        assert a.shape == (BATCH, NUM_HEADS, N_PATCHES, N_TEXT)
        assert bool(jnp.all(jnp.isfinite(a)))
        assert bool(jnp.allclose(a, r, rtol=2e-2, atol=2e-2))

    print("KERNEL_OK")
</pallas_src>

<mosaic_0001>
module attributes {stable_mosaic.version = 11 : i64} {
  func.func @_fused_forward_kernel(%arg0: memref<32x64xf32, #tpu.memory_space<vmem>>, %arg1: memref<64x32xf32, #tpu.memory_space<vmem>>, %arg2: memref<1x32xf32, #tpu.memory_space<vmem>>, %arg3: memref<32x32xf32, #tpu.memory_space<vmem>>, %arg4: memref<6x36xf32, #tpu.memory_space<vmem>>, %arg5: memref<36x32xf32, #tpu.memory_space<vmem>>, %arg6: memref<6x32xf32, #tpu.memory_space<vmem>>, %arg7: memref<128x6xf32, #tpu.memory_space<vmem>>, %arg8: memref<128x64xf32, #tpu.memory_space<vmem>>, %arg9: memref<128x128xf32, #tpu.memory_space<vmem>>, %arg10: memref<32x128xf32, #tpu.memory_space<vmem>>, %arg11: memref<32x128xf32, #tpu.memory_space<vmem>>, %arg12: memref<2x6x32xf32, #tpu.memory_space<vmem>>, %arg13: memref<2x32x32xf32, #tpu.memory_space<vmem>>, %arg14: memref<2x1x32xf32, #tpu.memory_space<vmem>>, %arg15: memref<2x32x64xf32, #tpu.memory_space<vmem>>, %arg16: memref<2x1x64xf32, #tpu.memory_space<vmem>>, %arg17: memref<2x32x32xf32, #tpu.memory_space<vmem>>, %arg18: memref<2x1x32xf32, #tpu.memory_space<vmem>>, %arg19: memref<2x32x64xf32, #tpu.memory_space<vmem>>, %arg20: memref<2x1x64xf32, #tpu.memory_space<vmem>>, %arg21: memref<2x64x32xf32, #tpu.memory_space<vmem>>, %arg22: memref<2x1x32xf32, #tpu.memory_space<vmem>>, %arg23: memref<2x32xf32, #tpu.memory_space<vmem>>, %arg24: memref<32x128xf32, #tpu.memory_space<vmem>>, %arg25: memref<2x32x128xf32, #tpu.memory_space<vmem>>) attributes {dimension_semantics = [], scalar_prefetch = 0 : i64, scratch_operands = 0 : i64, tpu.core_type = #tpu.core_type<tc>} {
    %c0 = arith.constant 0 : index
    %c0_0 = arith.constant 0 : index
    %0 = vector.load %arg7[%c0, %c0_0] : memref<128x6xf32, #tpu.memory_space<vmem>>, vector<128x6xf32>
    %c0_1 = arith.constant 0 : index
    %c0_2 = arith.constant 0 : index
    %1 = vector.load %arg8[%c0_1, %c0_2] : memref<128x64xf32, #tpu.memory_space<vmem>>, vector<128x64xf32>
    %c0_3 = arith.constant 0 : index
    %c0_4 = arith.constant 0 : index
    %2 = vector.load %arg9[%c0_3, %c0_4] : memref<128x128xf32, #tpu.memory_space<vmem>>, vector<128x128xf32>
    %c0_5 = arith.constant 0 : index
    %c0_6 = arith.constant 0 : index
    %3 = vector.load %arg10[%c0_5, %c0_6] : memref<32x128xf32, #tpu.memory_space<vmem>>, vector<32x128xf32>
    %c0_7 = arith.constant 0 : index
    %c0_8 = arith.constant 0 : index
    %4 = vector.load %arg0[%c0_7, %c0_8] : memref<32x64xf32, #tpu.memory_space<vmem>>, vector<32x64xf32>
    %c0_9 = arith.constant 0 : index
    %c0_10 = arith.constant 0 : index
    %5 = vector.load %arg1[%c0_9, %c0_10] : memref<64x32xf32, #tpu.memory_space<vmem>>, vector<64x32xf32>
    %cst = arith.constant dense<0.000000e+00> : vector<32x32xf32>
    %6 = tpu.matmul %4, %5, %cst {dimension_numbers = #tpu.dot_dimension_numbers<[1], [0], [0], [1], [0, 0, 1, 1], [], []>} : vector<32x64xf32>, vector<64x32xf32>, vector<32x32xf32> -> vector<32x32xf32>
    %c0_11 = arith.constant 0 : index
    %c0_12 = arith.constant 0 : index
    %7 = vector.load %arg2[%c0_11, %c0_12] : memref<1x32xf32, #tpu.memory_space<vmem>>, vector<1x32xf32>
    %8 = vector.broadcast %7 : vector<1x32xf32> to vector<32x32xf32>
    %9 = arith.addf %6, %8 : vector<32x32xf32>
    %c0_13 = arith.constant 0 : index
    %c0_14 = arith.constant 0 : index
    %10 = vector.load %arg3[%c0_13, %c0_14] : memref<32x32xf32, #tpu.memory_space<vmem>>, vector<32x32xf32>
    %11 = arith.addf %9, %10 : vector<32x32xf32>
    %c0_15 = arith.constant 0 : index
    %c0_16 = arith.constant 0 : index
    %12 = vector.load %arg4[%c0_15, %c0_16] : memref<6x36xf32, #tpu.memory_space<vmem>>, vector<6x36xf32>
    %c0_17 = arith.constant 0 : index
    %c0_18 = arith.constant 0 : index
    %13 = vector.load %arg5[%c0_17, %c0_18] : memref<36x32xf32, #tpu.memory_space<vmem>>, vector<36x32xf32>
    %cst_19 = arith.constant dense<0.000000e+00> : vector<6x32xf32>
    %14 = tpu.matmul %12, %13, %cst_19 {dimension_numbers = #tpu.dot_dimension_numbers<[1], [0], [0], [1], [0, 0, 1, 1], [], []>} : vector<6x36xf32>, vector<36x32xf32>, vector<6x32xf32> -> vector<6x32xf32>
    %c0_20 = arith.constant 0 : index
    %c0_21 = arith.constant 0 : index
    %15 = vector.load %arg6[%c0_20, %c0_21] : memref<6x32xf32, #tpu.memory_space<vmem>>, vector<6x32xf32>
    %16 = arith.addf %14, %15 : vector<6x32xf32>
    %c0_22 = arith.constant 0 : index
    %c0_23 = arith.constant 0 : index
    %c0_24 = arith.constant 0 : index
    %17 = vector.load %arg12[%c0_22, %c0_23, %c0_24] : memref<2x6x32xf32, #tpu.memory_space<vmem>>, vector<1x6x32xf32>
    %18 = vector.shape_cast %17 : vector<1x6x32xf32> to vector<6x32xf32>
    %19 = vector.extract_strided_slice %18 {offsets = [0, 0], sizes = [1, 32], strides = [1, 1]} : vector<6x32xf32> to vector<1x32xf32>
    %20 = vector.extract_strided_slice %18 {offsets = [1, 0], sizes = [1, 32], strides = [1, 1]} : vector<6x32xf32> to vector<1x32xf32>
    %cst_25 = arith.constant dense<0.000000e+00> : vector<32xf32>
    %21 = vector.multi_reduction <add>, %11, %cst_25 [1] : vector<32x32xf32> to vector<32xf32>
    %22 = vector.shape_cast %21 : vector<32xf32> to vector<32x1xf32>
    %cst_26 = arith.constant 3.200000e+01 : f32
    %23 = vector.broadcast %cst_26 : f32 to vector<32x1xf32>
    %24 = arith.divf %22, %23 : vector<32x1xf32>
    %25 = vector.broadcast %24 : vector<32x1xf32> to vector<32x32xf32>
    %26 = arith.subf %11, %25 : vector<32x32xf32>
    %27 = arith.mulf %26, %26 : vector<32x32xf32>
    %cst_27 = arith.constant dense<0.000000e+00> : vector<32xf32>
    %28 = vector.multi_reduction <add>, %27, %cst_27 [1] : vector<32x32xf32> to vector<32xf32>
    %29 = vector.shape_cast %28 : vector<32xf32> to vector<32x1xf32>
    %cst_28 = arith.constant 3.200000e+01 : f32
    %30 = vector.broadcast %cst_28 : f32 to vector<32x1xf32>
    %31 = arith.divf %29, %30 : vector<32x1xf32>
    %cst_29 = arith.constant 9.99999997E-7 : f32
    %32 = vector.broadcast %cst_29 : f32 to vector<32x1xf32>
    %33 = arith.addf %31, %32 : vector<32x1xf32>
    %34 = math.rsqrt %33 : vector<32x1xf32>
    %35 = vector.broadcast %34 : vector<32x1xf32> to vector<32x32xf32>
    %36 = arith.mulf %26, %35 : vector<32x32xf32>
    %37 = vector.broadcast %19 : vector<1x32xf32> to vector<32x32xf32>
    %38 = arith.mulf %36, %37 : vector<32x32xf32>
    %39 = vector.broadcast %20 : vector<1x32xf32> to vector<32x32xf32>
    %40 = arith.addf %38, %39 : vector<32x32xf32>
    %c0_30 = arith.constant 0 : index
    %c0_31 = arith.constant 0 : index
    %c0_32 = arith.constant 0 : index
    %41 = vector.load %arg13[%c0_30, %c0_31, %c0_32] : memref<2x32x32xf32, #tpu.memory_space<vmem>>, vector<1x32x32xf32>
    %42 = vector.shape_cast %41 : vector<1x32x32xf32> to vector<32x32xf32>
    %cst_33 = arith.constant dense<0.000000e+00> : vector<32x32xf32>
    %43 = tpu.matmul %40, %42, %cst_33 {dimension_numbers = #tpu.dot_dimension_numbers<[1], [0], [0], [1], [0, 0, 1, 1], [], []>} : vector<32x32xf32>, vector<32x32xf32>, vector<32x32xf32> -> vector<32x32xf32>
    %c0_34 = arith.constant 0 : index
    %c0_35 = arith.constant 0 : index
    %c0_36 = arith.constant 0 : index
    %44 = vector.load %arg14[%c0_34, %c0_35, %c0_36] : memref<2x1x32xf32, #tpu.memory_space<vmem>>, vector<1x1x32xf32>
    %45 = vector.shape_cast %44 : vector<1x1x32xf32> to vector<1x32xf32>
    %46 = vector.broadcast %45 : vector<1x32xf32> to vector<32x32xf32>
    %47 = arith.addf %43, %46 : vector<32x32xf32>
    %48 = vector.extract_strided_slice %18 {offsets = [2, 0], sizes = [1, 32], strides = [1, 1]} : vector<6x32xf32> to vector<1x32xf32>
    %49 = vector.extract_strided_slice %18 {offsets = [3, 0], sizes = [1, 32], strides = [1, 1]} : vector<6x32xf32> to vector<1x32xf32>
    %cst_37 = arith.constant dense<0.000000e+00> : vector<6xf32>
    %50 = vector.multi_reduction <add>, %16, %cst_37 [1] : vector<6x32xf32> to vector<6xf32>
    %51 = vector.shape_cast %50 : vector<6xf32> to vector<6x1xf32>
    %cst_38 = arith.constant 3.200000e+01 : f32
    %52 = vector.broadcast %cst_38 : f32 to vector<6x1xf32>
    %53 = arith.divf %51, %52 : vector<6x1xf32>
    %54 = vector.broadcast %53 : vector<6x1xf32> to vector<6x32xf32>
    %55 = arith.subf %16, %54 : vector<6x32xf32>
    %56 = arith.mulf %55, %55 : vector<6x32xf32>
    %cst_39 = arith.constant dense<0.000000e+00> : vector<6xf32>
    %57 = vector.multi_reduction <add>, %56, %cst_39 [1] : vector<6x32xf32> to vector<6xf32>
    %58 = vector.shape_cast %57 : vector<6xf32> to vector<6x1xf32>
    %cst_40 = arith.constant 3.200000e+01 : f32
    %59 = vector.broadcast %cst_40 : f32 to vector<6x1xf32>
    %60 = arith.divf %58, %59 : vector<6x1xf32>
    %cst_41 = arith.constant 9.99999997E-7 : f32
    %61 = vector.broadcast %cst_41 : f32 to vector<6x1xf32>
    %62 = arith.addf %60, %61 : vector<6x1xf32>
    %63 = math.rsqrt %62 : vector<6x1xf32>
    %64 = vector.broadcast %63 : vector<6x1xf32> to vector<6x32xf32>
    %65 = arith.mulf %55, %64 : vector<6x32xf32>
    %66 = vector.broadcast %48 : vector<1x32xf32> to vector<6x32xf32>
    %67 = arith.mulf %65, %66 : vector<6x32xf32>
    %68 = vector.broadcast %49 : vector<1x32xf32> to vector<6x32xf32>
    %69 = arith.addf %67, %68 : vector<6x32xf32>
    %c0_42 = arith.constant 0 : index
    %c0_43 = arith.constant 0 : index
    %c0_44 = arith.constant 0 : index
    %70 = vector.load %arg15[%c0_42, %c0_43, %c0_44] : memref<2x32x64xf32, #tpu.memory_space<vmem>>, vector<1x32x64xf32>
    %71 = vector.shape_cast %70 : vector<1x32x64xf32> to vector<32x64xf32>
    %cst_45 = arith.constant dense<0.000000e+00> : vector<6x64xf32>
    %72 = tpu.matmul %69, %71, %cst_45 {dimension_numbers = #tpu.dot_dimension_numbers<[1], [0], [0], [1], [0, 0, 1, 1], [], []>} : vector<6x32xf32>, vector<32x64xf32>, vector<6x64xf32> -> vector<6x64xf32>
    %c0_46 = arith.constant 0 : index
    %c0_47 = arith.constant 0 : index
    %c0_48 = arith.constant 0 : index
    %73 = vector.load %arg16[%c0_46, %c0_47, %c0_48] : memref<2x1x64xf32, #tpu.memory_space<vmem>>, vector<1x1x64xf32>
    %74 = vector.shape_cast %73 : vector<1x1x64xf32> to vector<1x64xf32>
    %75 = vector.broadcast %74 : vector<1x64xf32> to vector<6x64xf32>
    %76 = arith.addf %72, %75 : vector<6x64xf32>
    %cst_49 = arith.constant dense<0.000000e+00> : vector<128x64xf32>
    %77 = tpu.matmul %0, %76, %cst_49 {dimension_numbers = #tpu.dot_dimension_numbers<[1], [0], [0], [1], [0, 0, 1, 1], [], []>} : vector<128x6xf32>, vector<6x64xf32>, vector<128x64xf32> -> vector<128x64xf32>
    %78 = arith.mulf %77, %1 : vector<128x64xf32>
    %79 = vector.extract_strided_slice %78 {offsets = [0, 0], sizes = [128, 32], strides = [1, 1]} : vector<128x64xf32> to vector<128x32xf32>
    %80 = vector.extract_strided_slice %78 {offsets = [0, 32], sizes = [128, 32], strides = [1, 1]} : vector<128x64xf32> to vector<128x32xf32>
    %cst_50 = arith.constant dense<0.000000e+00> : vector<32x128xf32>
    %81 = tpu.matmul %47, %79, %cst_50 {dimension_numbers = #tpu.dot_dimension_numbers<[1], [1], [0], [0], [0, 0, 1, 0], [], []>} : vector<32x32xf32>, vector<128x32xf32>, vector<32x128xf32> -> vector<32x128xf32>
    %cst_51 = arith.constant 0.353553385 : f32
    %82 = vector.broadcast %cst_51 : f32 to vector<32x128xf32>
    %83 = arith.mulf %81, %82 : vector<32x128xf32>
    %cst_52 = arith.constant dense<0xFF800000> : vector<32xf32>
    %84 = vector.multi_reduction <maximumf>, %83, %cst_52 [1] : vector<32x128xf32> to vector<32xf32>
    %85 = vector.shape_cast %84 : vector<32xf32> to vector<32x1xf32>
    %86 = vector.broadcast %85 : vector<32x1xf32> to vector<32x128xf32>
    %87 = arith.subf %83, %86 : vector<32x128xf32>
    %88 = math.exp %87 : vector<32x128xf32>
    %cst_53 = arith.constant dense<0.000000e+00> : vector<32x128xf32>
    %89 = tpu.matmul %88, %2, %cst_53 {dimension_numbers = #tpu.dot_dimension_numbers<[1], [0], [0], [1], [0, 0, 1, 1], [], []>} : vector<32x128xf32>, vector<128x128xf32>, vector<32x128xf32> -> vector<32x128xf32>
    %90 = tpu.reciprocal %89 {approx = true} : vector<32x128xf32> -> vector<32x128xf32>
    %91 = arith.mulf %88, %90 : vector<32x128xf32>
    %92 = arith.mulf %91, %3 : vector<32x128xf32>
    %c0_54 = arith.constant 0 : index
    %c0_55 = arith.constant 0 : index
    %c0_56 = arith.constant 0 : index
    %93 = vector.load %arg25[%c0_54, %c0_55, %c0_56] : memref<2x32x128xf32, #tpu.memory_space<vmem>>, vector<1x32x128xf32>
    %94 = vector.shape_cast %93 : vector<1x32x128xf32> to vector<32x128xf32>
    %95 = vector.shape_cast %92 : vector<32x128xf32> to vector<1x32x128xf32>
    tpu.vector_store %arg25[%c0_54, %c0_55, %c0_56], %95 {strides = array<i32>} : memref<2x32x128xf32, #tpu.memory_space<vmem>>, vector<1x32x128xf32>,
    %cst_57 = arith.constant dense<0.000000e+00> : vector<32x32xf32>
    %96 = tpu.matmul %92, %80, %cst_57 {dimension_numbers = #tpu.dot_dimension_numbers<[1], [0], [0], [1], [0, 0, 1, 1], [], []>} : vector<32x128xf32>, vector<128x32xf32>, vector<32x32xf32> -> vector<32x32xf32>
    %c0_58 = arith.constant 0 : index
    %c0_59 = arith.constant 0 : index
    %c0_60 = arith.constant 0 : index
    %97 = vector.load %arg17[%c0_58, %c0_59, %c0_60] : memref<2x32x32xf32, #tpu.memory_space<vmem>>, vector<1x32x32xf32>
    %98 = vector.shape_cast %97 : vector<1x32x32xf32> to vector<32x32xf32>
    %cst_61 = arith.constant dense<0.000000e+00> : vector<32x32xf32>
    %99 = tpu.matmul %96, %98, %cst_61 {dimension_numbers = #tpu.dot_dimension_numbers<[1], [0], [0], [1], [0, 0, 1, 1], [], []>} : vector<32x32xf32>, vector<32x32xf32>, vector<32x32xf32> -> vector<32x32xf32>
    %c0_62 = arith.constant 0 : index
    %c0_63 = arith.constant 0 : index
    %c0_64 = arith.constant 0 : index
    %100 = vector.load %arg18[%c0_62, %c0_63, %c0_64] : memref<2x1x32xf32, #tpu.memory_space<vmem>>, vector<1x1x32xf32>
    %101 = vector.shape_cast %100 : vector<1x1x32xf32> to vector<1x32xf32>
    %102 = vector.broadcast %101 : vector<1x32xf32> to vector<32x32xf32>
    %103 = arith.addf %99, %102 : vector<32x32xf32>
    %104 = arith.addf %103, %11 : vector<32x32xf32>
    %105 = vector.extract_strided_slice %18 {offsets = [4, 0], sizes = [1, 32], strides = [1, 1]} : vector<6x32xf32> to vector<1x32xf32>
    %106 = vector.extract_strided_slice %18 {offsets = [5, 0], sizes = [1, 32], strides = [1, 1]} : vector<6x32xf32> to vector<1x32xf32>
    %cst_65 = arith.constant dense<0.000000e+00> : vector<32xf32>
    %107 = vector.multi_reduction <add>, %104, %cst_65 [1] : vector<32x32xf32> to vector<32xf32>
    %108 = vector.shape_cast %107 : vector<32xf32> to vector<32x1xf32>
    %cst_66 = arith.constant 3.200000e+01 : f32
    %109 = vector.broadcast %cst_66 : f32 to vector<32x1xf32>
    %110 = arith.divf %108, %109 : vector<32x1xf32>
    %111 = vector.broadcast %110 : vector<32x1xf32> to vector<32x32xf32>
    %112 = arith.subf %104, %111 : vector<32x32xf32>
    %113 = arith.mulf %112, %112 : vector<32x32xf32>
    %cst_67 = arith.constant dense<0.000000e+00> : vector<32xf32>
    %114 = vector.multi_reduction <add>, %113, %cst_67 [1] : vector<32x32xf32> to vector<32xf32>
    %115 = vector.shape_cast %114 : vector<32xf32> to vector<32x1xf32>
    %cst_68 = arith.constant 3.200000e+01 : f32
    %116 = vector.broadcast %cst_68 : f32 to vector<32x1xf32>
    %117 = arith.divf %115, %116 : vector<32x1xf32>
    %cst_69 = arith.constant 9.99999997E-7 : f32
    %118 = vector.broadcast %cst_69 : f32 to vector<32x1xf32>
    %119 = arith.addf %117, %118 : vector<32x1xf32>
    %120 = math.rsqrt %119 : vector<32x1xf32>
    %121 = vector.broadcast %120 : vector<32x1xf32> to vector<32x32xf32>
    %122 = arith.mulf %112, %121 : vector<32x32xf32>
    %123 = vector.broadcast %105 : vector<1x32xf32> to vector<32x32xf32>
    %124 = arith.mulf %122, %123 : vector<32x32xf32>
    %125 = vector.broadcast %106 : vector<1x32xf32> to vector<32x32xf32>
    %126 = arith.addf %124, %125 : vector<32x32xf32>
    %c0_70 = arith.constant 0 : index
    %c0_71 = arith.constant 0 : index
    %c0_72 = arith.constant 0 : index
    %127 = vector.load %arg19[%c0_70, %c0_71, %c0_72] : memref<2x32x64xf32, #tpu.memory_space<vmem>>, vector<1x32x64xf32>
    %128 = vector.shape_cast %127 : vector<1x32x64xf32> to vector<32x64xf32>
    %cst_73 = arith.constant dense<0.000000e+00> : vector<32x64xf32>
    %129 = tpu.matmul %126, %128, %cst_73 {dimension_numbers = #tpu.dot_dimension_numbers<[1], [0], [0], [1], [0, 0, 1, 1], [], []>} : vector<32x32xf32>, vector<32x64xf32>, vector<32x64xf32> -> vector<32x64xf32>
    %c0_74 = arith.constant 0 : index
    %c0_75 = arith.constant 0 : index
    %c0_76 = arith.constant 0 : index
    %130 = vector.load %arg20[%c0_74, %c0_75, %c0_76] : memref<2x1x64xf32, #tpu.memory_space<vmem>>, vector<1x1x64xf32>
    %131 = vector.shape_cast %130 : vector<1x1x64xf32> to vector<1x64xf32>
    %132 = vector.broadcast %131 : vector<1x64xf32> to vector<32x64xf32>
    %133 = arith.addf %129, %132 : vector<32x64xf32>
    %cst_77 = arith.constant 5.000000e-01 : f32
    %134 = vector.broadcast %cst_77 : f32 to vector<32x64xf32>
    %135 = arith.mulf %134, %133 : vector<32x64xf32>
    %cst_78 = arith.constant 4.471500e-02 : f32
    %136 = vector.broadcast %cst_78 : f32 to vector<32x64xf32>
    %137 = arith.mulf %136, %133 : vector<32x64xf32>
    %138 = arith.mulf %137, %133 : vector<32x64xf32>
    %139 = arith.mulf %138, %133 : vector<32x64xf32>
    %140 = arith.addf %133, %139 : vector<32x64xf32>
    %cst_79 = arith.constant 0.797884583 : f32
    %141 = vector.broadcast %cst_79 : f32 to vector<32x64xf32>
    %142 = arith.mulf %141, %140 : vector<32x64xf32>
    %143 = math.tanh %142 : vector<32x64xf32>
    %cst_80 = arith.constant 1.000000e+00 : f32
    %144 = vector.broadcast %cst_80 : f32 to vector<32x64xf32>
    %145 = arith.addf %144, %143 : vector<32x64xf32>
    %146 = arith.mulf %135, %145 : vector<32x64xf32>
    %c0_81 = arith.constant 0 : index
    %c0_82 = arith.constant 0 : index
    %c0_83 = arith.constant 0 : index
    %147 = vector.load %arg21[%c0_81, %c0_82, %c0_83] : memref<2x64x32xf32, #tpu.memory_space<vmem>>, vector<1x64x32xf32>
    %148 = vector.shape_cast %147 : vector<1x64x32xf32> to vector<64x32xf32>
    %cst_84 = arith.constant dense<0.000000e+00> : vector<32x32xf32>
    %149 = tpu.matmul %146, %148, %cst_84 {dimension_numbers = #tpu.dot_dimension_numbers<[1], [0], [0], [1], [0, 0, 1, 1], [], []>} : vector<32x64xf32>, vector<64x32xf32>, vector<32x32xf32> -> vector<32x32xf32>
    %c0_85 = arith.constant 0 : index
    %c0_86 = arith.constant 0 : index
    %c0_87 = arith.constant 0 : index
    %150 = vector.load %arg22[%c0_85, %c0_86, %c0_87] : memref<2x1x32xf32, #tpu.memory_space<vmem>>, vector<1x1x32xf32>
    %151 = vector.shape_cast %150 : vector<1x1x32xf32> to vector<1x32xf32>
    %152 = vector.broadcast %151 : vector<1x32xf32> to vector<32x32xf32>
    %153 = arith.addf %149, %152 : vector<32x32xf32>
    %154 = arith.addf %153, %104 : vector<32x32xf32>
    %c1 = arith.constant 1 : index
    %c0_88 = arith.constant 0 : index
    %c0_89 = arith.constant 0 : index
    %155 = vector.load %arg12[%c1, %c0_88, %c0_89] : memref<2x6x32xf32, #tpu.memory_space<vmem>>, vector<1x6x32xf32>
    %156 = vector.shape_cast %155 : vector<1x6x32xf32> to vector<6x32xf32>
    %157 = vector.extract_strided_slice %156 {offsets = [0, 0], sizes = [1, 32], strides = [1, 1]} : vector<6x32xf32> to vector<1x32xf32>
    %158 = vector.extract_strided_slice %156 {offsets = [1, 0], sizes = [1, 32], strides = [1, 1]} : vector<6x32xf32> to vector<1x32xf32>
    %cst_90 = arith.constant dense<0.000000e+00> : vector<32xf32>
    %159 = vector.multi_reduction <add>, %154, %cst_90 [1] : vector<32x32xf32> to vector<32xf32>
    %160 = vector.shape_cast %159 : vector<32xf32> to vector<32x1xf32>
    %cst_91 = arith.constant 3.200000e+01 : f32
    %161 = vector.broadcast %cst_91 : f32 to vector<32x1xf32>
    %162 = arith.divf %160, %161 : vector<32x1xf32>
    %163 = vector.broadcast %162 : vector<32x1xf32> to vector<32x32xf32>
    %164 = arith.subf %154, %163 : vector<32x32xf32>
    %165 = arith.mulf %164, %164 : vector<32x32xf32>
    %cst_92 = arith.constant dense<0.000000e+00> : vector<32xf32>
    %166 = vector.multi_reduction <add>, %165, %cst_92 [1] : vector<32x32xf32> to vector<32xf32>
    %167 = vector.shape_cast %166 : vector<32xf32> to vector<32x1xf32>
    %cst_93 = arith.constant 3.200000e+01 : f32
    %168 = vector.broadcast %cst_93 : f32 to vector<32x1xf32>
    %169 = arith.divf %167, %168 : vector<32x1xf32>
    %cst_94 = arith.constant 9.99999997E-7 : f32
    %170 = vector.broadcast %cst_94 : f32 to vector<32x1xf32>
    %171 = arith.addf %169, %170 : vector<32x1xf32>
    %172 = math.rsqrt %171 : vector<32x1xf32>
    %173 = vector.broadcast %172 : vector<32x1xf32> to vector<32x32xf32>
    %174 = arith.mulf %164, %173 : vector<32x32xf32>
    %175 = vector.broadcast %157 : vector<1x32xf32> to vector<32x32xf32>
    %176 = arith.mulf %174, %175 : vector<32x32xf32>
    %177 = vector.broadcast %158 : vector<1x32xf32> to vector<32x32xf32>
    %178 = arith.addf %176, %177 : vector<32x32xf32>
    %c1_95 = arith.constant 1 : index
    %c0_96 = arith.constant 0 : index
    %c0_97 = arith.constant 0 : index
    %179 = vector.load %arg13[%c1_95, %c0_96, %c0_97] : memref<2x32x32xf32, #tpu.memory_space<vmem>>, vector<1x32x32xf32>
    %180 = vector.shape_cast %179 : vector<1x32x32xf32> to vector<32x32xf32>
    %cst_98 = arith.constant dense<0.000000e+00> : vector<32x32xf32>
    %181 = tpu.matmul %178, %180, %cst_98 {dimension_numbers = #tpu.dot_dimension_numbers<[1], [0], [0], [1], [0, 0, 1, 1], [], []>} : vector<32x32xf32>, vector<32x32xf32>, vector<32x32xf32> -> vector<32x32xf32>
    %c1_99 = arith.constant 1 : index
    %c0_100 = arith.constant 0 : index
    %c0_101 = arith.constant 0 : index
    %182 = vector.load %arg14[%c1_99, %c0_100, %c0_101] : memref<2x1x32xf32, #tpu.memory_space<vmem>>, vector<1x1x32xf32>
    %183 = vector.shape_cast %182 : vector<1x1x32xf32> to vector<1x32xf32>
    %184 = vector.broadcast %183 : vector<1x32xf32> to vector<32x32xf32>
    %185 = arith.addf %181, %184 : vector<32x32xf32>
    %186 = vector.extract_strided_slice %156 {offsets = [2, 0], sizes = [1, 32], strides = [1, 1]} : vector<6x32xf32> to vector<1x32xf32>
    %187 = vector.extract_strided_slice %156 {offsets = [3, 0], sizes = [1, 32], strides = [1, 1]} : vector<6x32xf32> to vector<1x32xf32>
    %cst_102 = arith.constant dense<0.000000e+00> : vector<6xf32>
    %188 = vector.multi_reduction <add>, %16, %cst_102 [1] : vector<6x32xf32> to vector<6xf32>
    %189 = vector.shape_cast %188 : vector<6xf32> to vector<6x1xf32>
    %cst_103 = arith.constant 3.200000e+01 : f32
    %190 = vector.broadcast %cst_103 : f32 to vector<6x1xf32>
    %191 = arith.divf %189, %190 : vector<6x1xf32>
    %192 = vector.broadcast %191 : vector<6x1xf32> to vector<6x32xf32>
    %193 = arith.subf %16, %192 : vector<6x32xf32>
    %194 = arith.mulf %193, %193 : vector<6x32xf32>
    %cst_104 = arith.constant dense<0.000000e+00> : vector<6xf32>
    %195 = vector.multi_reduction <add>, %194, %cst_104 [1] : vector<6x32xf32> to vector<6xf32>
    %196 = vector.shape_cast %195 : vector<6xf32> to vector<6x1xf32>
    %cst_105 = arith.constant 3.200000e+01 : f32
    %197 = vector.broadcast %cst_105 : f32 to vector<6x1xf32>
    %198 = arith.divf %196, %197 : vector<6x1xf32>
    %cst_106 = arith.constant 9.99999997E-7 : f32
    %199 = vector.broadcast %cst_106 : f32 to vector<6x1xf32>
    %200 = arith.addf %198, %199 : vector<6x1xf32>
    %201 = math.rsqrt %200 : vector<6x1xf32>
    %202 = vector.broadcast %201 : vector<6x1xf32> to vector<6x32xf32>
    %203 = arith.mulf %193, %202 : vector<6x32xf32>
    %204 = vector.broadcast %186 : vector<1x32xf32> to vector<6x32xf32>
    %205 = arith.mulf %203, %204 : vector<6x32xf32>
    %206 = vector.broadcast %187 : vector<1x32xf32> to vector<6x32xf32>
    %207 = arith.addf %205, %206 : vector<6x32xf32>
    %c1_107 = arith.constant 1 : index
    %c0_108 = arith.constant 0 : index
    %c0_109 = arith.constant 0 : index
    %208 = vector.load %arg15[%c1_107, %c0_108, %c0_109] : memref<2x32x64xf32, #tpu.memory_space<vmem>>, vector<1x32x64xf32>
    %209 = vector.shape_cast %208 : vector<1x32x64xf32> to vector<32x64xf32>
    %cst_110 = arith.constant dense<0.000000e+00> : vector<6x64xf32>
    %210 = tpu.matmul %207, %209, %cst_110 {dimension_numbers = #tpu.dot_dimension_numbers<[1], [0], [0], [1], [0, 0, 1, 1], [], []>} : vector<6x32xf32>, vector<32x64xf32>, vector<6x64xf32> -> vector<6x64xf32>
    %c1_111 = arith.constant 1 : index
    %c0_112 = arith.constant 0 : index
    %c0_113 = arith.constant 0 : index
    %211 = vector.load %arg16[%c1_111, %c0_112, %c0_113] : memref<2x1x64xf32, #tpu.memory_space<vmem>>, vector<1x1x64xf32>
    %212 = vector.shape_cast %211 : vector<1x1x64xf32> to vector<1x64xf32>
    %213 = vector.broadcast %212 : vector<1x64xf32> to vector<6x64xf32>
    %214 = arith.addf %210, %213 : vector<6x64xf32>
    %cst_114 = arith.constant dense<0.000000e+00> : vector<128x64xf32>
    %215 = tpu.matmul %0, %214, %cst_114 {dimension_numbers = #tpu.dot_dimension_numbers<[1], [0], [0], [1], [0, 0, 1, 1], [], []>} : vector<128x6xf32>, vector<6x64xf32>, vector<128x64xf32> -> vector<128x64xf32>
    %216 = arith.mulf %215, %1 : vector<128x64xf32>
    %217 = vector.extract_strided_slice %216 {offsets = [0, 0], sizes = [128, 32], strides = [1, 1]} : vector<128x64xf32> to vector<128x32xf32>
    %218 = vector.extract_strided_slice %216 {offsets = [0, 32], sizes = [128, 32], strides = [1, 1]} : vector<128x64xf32> to vector<128x32xf32>
    %cst_115 = arith.constant dense<0.000000e+00> : vector<32x128xf32>
    %219 = tpu.matmul %185, %217, %cst_115 {dimension_numbers = #tpu.dot_dimension_numbers<[1], [1], [0], [0], [0, 0, 1, 0], [], []>} : vector<32x32xf32>, vector<128x32xf32>, vector<32x128xf32> -> vector<32x128xf32>
    %cst_116 = arith.constant 0.353553385 : f32
    %220 = vector.broadcast %cst_116 : f32 to vector<32x128xf32>
    %221 = arith.mulf %219, %220 : vector<32x128xf32>
    %cst_117 = arith.constant dense<0xFF800000> : vector<32xf32>
    %222 = vector.multi_reduction <maximumf>, %221, %cst_117 [1] : vector<32x128xf32> to vector<32xf32>
    %223 = vector.shape_cast %222 : vector<32xf32> to vector<32x1xf32>
    %224 = vector.broadcast %223 : vector<32x1xf32> to vector<32x128xf32>
    %225 = arith.subf %221, %224 : vector<32x128xf32>
    %226 = math.exp %225 : vector<32x128xf32>
    %cst_118 = arith.constant dense<0.000000e+00> : vector<32x128xf32>
    %227 = tpu.matmul %226, %2, %cst_118 {dimension_numbers = #tpu.dot_dimension_numbers<[1], [0], [0], [1], [0, 0, 1, 1], [], []>} : vector<32x128xf32>, vector<128x128xf32>, vector<32x128xf32> -> vector<32x128xf32>
    %228 = tpu.reciprocal %227 {approx = true} : vector<32x128xf32> -> vector<32x128xf32>
    %229 = arith.mulf %226, %228 : vector<32x128xf32>
    %230 = arith.mulf %229, %3 : vector<32x128xf32>
    %c1_119 = arith.constant 1 : index
    %c0_120 = arith.constant 0 : index
    %c0_121 = arith.constant 0 : index
    %231 = vector.load %arg25[%c1_119, %c0_120, %c0_121] : memref<2x32x128xf32, #tpu.memory_space<vmem>>, vector<1x32x128xf32>
    %232 = vector.shape_cast %231 : vector<1x32x128xf32> to vector<32x128xf32>
    %233 = vector.shape_cast %230 : vector<32x128xf32> to vector<1x32x128xf32>
    tpu.vector_store %arg25[%c1_119, %c0_120, %c0_121], %233 {strides = array<i32>} : memref<2x32x128xf32, #tpu.memory_space<vmem>>, vector<1x32x128xf32>,
    %cst_122 = arith.constant dense<0.000000e+00> : vector<32x32xf32>
    %234 = tpu.matmul %230, %218, %cst_122 {dimension_numbers = #tpu.dot_dimension_numbers<[1], [0], [0], [1], [0, 0, 1, 1], [], []>} : vector<32x128xf32>, vector<128x32xf32>, vector<32x32xf32> -> vector<32x32xf32>
    %c1_123 = arith.constant 1 : index
    %c0_124 = arith.constant 0 : index
    %c0_125 = arith.constant 0 : index
    %235 = vector.load %arg17[%c1_123, %c0_124, %c0_125] : memref<2x32x32xf32, #tpu.memory_space<vmem>>, vector<1x32x32xf32>
    %236 = vector.shape_cast %235 : vector<1x32x32xf32> to vector<32x32xf32>
    %cst_126 = arith.constant dense<0.000000e+00> : vector<32x32xf32>
    %237 = tpu.matmul %234, %236, %cst_126 {dimension_numbers = #tpu.dot_dimension_numbers<[1], [0], [0], [1], [0, 0, 1, 1], [], []>} : vector<32x32xf32>, vector<32x32xf32>, vector<32x32xf32> -> vector<32x32xf32>
    %c1_127 = arith.constant 1 : index
    %c0_128 = arith.constant 0 : index
    %c0_129 = arith.constant 0 : index
    %238 = vector.load %arg18[%c1_127, %c0_128, %c0_129] : memref<2x1x32xf32, #tpu.memory_space<vmem>>, vector<1x1x32xf32>
    %239 = vector.shape_cast %238 : vector<1x1x32xf32> to vector<1x32xf32>
    %240 = vector.broadcast %239 : vector<1x32xf32> to vector<32x32xf32>
    %241 = arith.addf %237, %240 : vector<32x32xf32>
    %242 = arith.addf %241, %154 : vector<32x32xf32>
    %243 = vector.extract_strided_slice %156 {offsets = [4, 0], sizes = [1, 32], strides = [1, 1]} : vector<6x32xf32> to vector<1x32xf32>
    %244 = vector.extract_strided_slice %156 {offsets = [5, 0], sizes = [1, 32], strides = [1, 1]} : vector<6x32xf32> to vector<1x32xf32>
    %cst_130 = arith.constant dense<0.000000e+00> : vector<32xf32>
    %245 = vector.multi_reduction <add>, %242, %cst_130 [1] : vector<32x32xf32> to vector<32xf32>
    %246 = vector.shape_cast %245 : vector<32xf32> to vector<32x1xf32>
    %cst_131 = arith.constant 3.200000e+01 : f32
    %247 = vector.broadcast %cst_131 : f32 to vector<32x1xf32>
    %248 = arith.divf %246, %247 : vector<32x1xf32>
    %249 = vector.broadcast %248 : vector<32x1xf32> to vector<32x32xf32>
    %250 = arith.subf %242, %249 : vector<32x32xf32>
    %251 = arith.mulf %250, %250 : vector<32x32xf32>
    %cst_132 = arith.constant dense<0.000000e+00> : vector<32xf32>
    %252 = vector.multi_reduction <add>, %251, %cst_132 [1] : vector<32x32xf32> to vector<32xf32>
    %253 = vector.shape_cast %252 : vector<32xf32> to vector<32x1xf32>
    %cst_133 = arith.constant 3.200000e+01 : f32
    %254 = vector.broadcast %cst_133 : f32 to vector<32x1xf32>
    %255 = arith.divf %253, %254 : vector<32x1xf32>
    %cst_134 = arith.constant 9.99999997E-7 : f32
    %256 = vector.broadcast %cst_134 : f32 to vector<32x1xf32>
    %257 = arith.addf %255, %256 : vector<32x1xf32>
    %258 = math.rsqrt %257 : vector<32x1xf32>
    %259 = vector.broadcast %258 : vector<32x1xf32> to vector<32x32xf32>
    %260 = arith.mulf %250, %259 : vector<32x32xf32>
    %261 = vector.broadcast %243 : vector<1x32xf32> to vector<32x32xf32>
    %262 = arith.mulf %260, %261 : vector<32x32xf32>
    %263 = vector.broadcast %244 : vector<1x32xf32> to vector<32x32xf32>
    %264 = arith.addf %262, %263 : vector<32x32xf32>
    %c1_135 = arith.constant 1 : index
    %c0_136 = arith.constant 0 : index
    %c0_137 = arith.constant 0 : index
    %265 = vector.load %arg19[%c1_135, %c0_136, %c0_137] : memref<2x32x64xf32, #tpu.memory_space<vmem>>, vector<1x32x64xf32>
    %266 = vector.shape_cast %265 : vector<1x32x64xf32> to vector<32x64xf32>
    %cst_138 = arith.constant dense<0.000000e+00> : vector<32x64xf32>
    %267 = tpu.matmul %264, %266, %cst_138 {dimension_numbers = #tpu.dot_dimension_numbers<[1], [0], [0], [1], [0, 0, 1, 1], [], []>} : vector<32x32xf32>, vector<32x64xf32>, vector<32x64xf32> -> vector<32x64xf32>
    %c1_139 = arith.constant 1 : index
    %c0_140 = arith.constant 0 : index
    %c0_141 = arith.constant 0 : index
    %268 = vector.load %arg20[%c1_139, %c0_140, %c0_141] : memref<2x1x64xf32, #tpu.memory_space<vmem>>, vector<1x1x64xf32>
    %269 = vector.shape_cast %268 : vector<1x1x64xf32> to vector<1x64xf32>
    %270 = vector.broadcast %269 : vector<1x64xf32> to vector<32x64xf32>
    %271 = arith.addf %267, %270 : vector<32x64xf32>
    %cst_142 = arith.constant 5.000000e-01 : f32
    %272 = vector.broadcast %cst_142 : f32 to vector<32x64xf32>
    %273 = arith.mulf %272, %271 : vector<32x64xf32>
    %cst_143 = arith.constant 4.471500e-02 : f32
    %274 = vector.broadcast %cst_143 : f32 to vector<32x64xf32>
    %275 = arith.mulf %274, %271 : vector<32x64xf32>
    %276 = arith.mulf %275, %271 : vector<32x64xf32>
    %277 = arith.mulf %276, %271 : vector<32x64xf32>
    %278 = arith.addf %271, %277 : vector<32x64xf32>
    %cst_144 = arith.constant 0.797884583 : f32
    %279 = vector.broadcast %cst_144 : f32 to vector<32x64xf32>
    %280 = arith.mulf %279, %278 : vector<32x64xf32>
    %281 = math.tanh %280 : vector<32x64xf32>
    %cst_145 = arith.constant 1.000000e+00 : f32
    %282 = vector.broadcast %cst_145 : f32 to vector<32x64xf32>
    %283 = arith.addf %282, %281 : vector<32x64xf32>
    %284 = arith.mulf %273, %283 : vector<32x64xf32>
    %c1_146 = arith.constant 1 : index
    %c0_147 = arith.constant 0 : index
    %c0_148 = arith.constant 0 : index
    %285 = vector.load %arg21[%c1_146, %c0_147, %c0_148] : memref<2x64x32xf32, #tpu.memory_space<vmem>>, vector<1x64x32xf32>
    %286 = vector.shape_cast %285 : vector<1x64x32xf32> to vector<64x32xf32>
    %cst_149 = arith.constant dense<0.000000e+00> : vector<32x32xf32>
    %287 = tpu.matmul %284, %286, %cst_149 {dimension_numbers = #tpu.dot_dimension_numbers<[1], [0], [0], [1], [0, 0, 1, 1], [], []>} : vector<32x64xf32>, vector<64x32xf32>, vector<32x32xf32> -> vector<32x32xf32>
    %c1_150 = arith.constant 1 : index
    %c0_151 = arith.constant 0 : index
    %c0_152 = arith.constant 0 : index
    %288 = vector.load %arg22[%c1_150, %c0_151, %c0_152] : memref<2x1x32xf32, #tpu.memory_space<vmem>>, vector<1x1x32xf32>
    %289 = vector.shape_cast %288 : vector<1x1x32xf32> to vector<1x32xf32>
    %290 = vector.broadcast %289 : vector<1x32xf32> to vector<32x32xf32>
    %291 = arith.addf %287, %290 : vector<32x32xf32>
    %292 = arith.addf %291, %242 : vector<32x32xf32>
    %c0_153 = arith.constant 0 : index
    %c0_154 = arith.constant 0 : index
    %293 = vector.load %arg23[%c0_153, %c0_154] : memref<2x32xf32, #tpu.memory_space<vmem>>, vector<2x32xf32>
    %294 = vector.extract_strided_slice %293 {offsets = [0, 0], sizes = [1, 32], strides = [1, 1]} : vector<2x32xf32> to vector<1x32xf32>
    %295 = vector.extract_strided_slice %293 {offsets = [1, 0], sizes = [1, 32], strides = [1, 1]} : vector<2x32xf32> to vector<1x32xf32>
    %cst_155 = arith.constant dense<0.000000e+00> : vector<32xf32>
    %296 = vector.multi_reduction <add>, %292, %cst_155 [1] : vector<32x32xf32> to vector<32xf32>
    %297 = vector.shape_cast %296 : vector<32xf32> to vector<32x1xf32>
    %cst_156 = arith.constant 3.200000e+01 : f32
    %298 = vector.broadcast %cst_156 : f32 to vector<32x1xf32>
    %299 = arith.divf %297, %298 : vector<32x1xf32>
    %300 = vector.broadcast %299 : vector<32x1xf32> to vector<32x32xf32>
    %301 = arith.subf %292, %300 : vector<32x32xf32>
    %302 = arith.mulf %301, %301 : vector<32x32xf32>
    %cst_157 = arith.constant dense<0.000000e+00> : vector<32xf32>
    %303 = vector.multi_reduction <add>, %302, %cst_157 [1] : vector<32x32xf32> to vector<32xf32>
    %304 = vector.shape_cast %303 : vector<32xf32> to vector<32x1xf32>
    %cst_158 = arith.constant 3.200000e+01 : f32
    %305 = vector.broadcast %cst_158 : f32 to vector<32x1xf32>
    %306 = arith.divf %304, %305 : vector<32x1xf32>
    %cst_159 = arith.constant 9.99999997E-7 : f32
    %307 = vector.broadcast %cst_159 : f32 to vector<32x1xf32>
    %308 = arith.addf %306, %307 : vector<32x1xf32>
    %309 = math.rsqrt %308 : vector<32x1xf32>
    %310 = vector.broadcast %309 : vector<32x1xf32> to vector<32x32xf32>
    %311 = arith.mulf %301, %310 : vector<32x32xf32>
    %312 = vector.broadcast %294 : vector<1x32xf32> to vector<32x32xf32>
    %313 = arith.mulf %311, %312 : vector<32x32xf32>
    %314 = vector.broadcast %295 : vector<1x32xf32> to vector<32x32xf32>
    %315 = arith.addf %313, %314 : vector<32x32xf32>
    %c0_160 = arith.constant 0 : index
    %c0_161 = arith.constant 0 : index
    %316 = vector.load %arg11[%c0_160, %c0_161] : memref<32x128xf32, #tpu.memory_space<vmem>>, vector<32x128xf32>
    %cst_162 = arith.constant dense<0.000000e+00> : vector<32x128xf32>
    %317 = tpu.matmul %315, %316, %cst_162 {dimension_numbers = #tpu.dot_dimension_numbers<[1], [0], [0], [1], [0, 0, 1, 1], [], []>} : vector<32x32xf32>, vector<32x128xf32>, vector<32x128xf32> -> vector<32x128xf32>
    %c0_163 = arith.constant 0 : index
    %c0_164 = arith.constant 0 : index
    %318 = vector.load %arg24[%c0_163, %c0_164] : memref<32x128xf32, #tpu.memory_space<vmem>>, vector<32x128xf32>
    tpu.vector_store %arg24[%c0_163, %c0_164], %317 {strides = array<i32>} : memref<32x128xf32, #tpu.memory_space<vmem>>, vector<32x128xf32>,
    return
  }
}

</mosaic_0001>

<bundles_post_ra>
// kernel: tile.17
= control target key start
LH: loop header
LB: loop body
LE: loop exit
PB: predicated region body
PF: predicated region fallthrough
CT: control target
= control target key end

     0   :  { %vm11_vm0 = vcmask 261120   ;;  %s42_s0 = inlined_call_operand.vmem [shape: f32[2,3,32], index: 0, kind: input, shape index: {}]   ;;  %s43_s1 = inlined_call_operand.vmem [shape: f32[6,32], index: 1, kind: output, shape index: {}]  }
   0x1   :  { %v18_v0 = vld [vmem:[%s42_s0 + $0x4] sm:$0xf]  ;;  %v8_v1 = vld [vmem:[%s42_s0] sm:$0xf] }
   0x2   :  { %7 = vst [vmem:[#allocation0 + $0x8] sm:$0xf] %v18_v0 }
   0x3   :  { %9 = vst [vmem:[#allocation0] sm:$0xf] %v8_v1 }
   0x9   :  { %v14_v2 = vld [vmem:[#allocation0 + $0x8] sm:$0x7]  }
   0xa   :  { %v10_v3 = vld [vmem:[#allocation0] sm:$0x7]   ;;  %19 = vst.msk [vmem:[%s43_s1 + $0x3] sm:$0x7] %vm11_vm0, %v14_v2  }
   0xb   :  { %12 = vst.msk [vmem:[%s43_s1] sm:$0x7] %vm11_vm0, %v10_v3  }

// kernel: transformer_forward.1
= control target key start
LH: loop header
LB: loop body
LE: loop exit
PB: predicated region body
PF: predicated region fallthrough
CT: control target
= control target key end

     0   :  { %s3878_s0 = inlined_call_operand.vmem [shape: f32[32,64], index: 0, kind: input, shape index: {}]   ;;  %s3879_s1 = inlined_call_operand.vmem [shape: f32[64,32], index: 1, kind: input, shape index: {}]   ;;  %s3880_s2 = inlined_call_operand.vmem [shape: f32[1,32], index: 2, kind: input, shape index: {}]   ;;  %s3881_s3 = inlined_call_operand.vmem [shape: f32[32,32], index: 3, kind: input, shape index: {}]   ;;  %s3882_s4 = inlined_call_operand.vmem [shape: f32[6,36], index: 4, kind: input, shape index: {}]   ;;  %s3883_s5 = inlined_call_operand.vmem [shape: f32[36,32], index: 5, kind: input, shape index: {}]   ;;  %s3884_s6 = inlined_call_operand.vmem [shape: f32[6,32], index: 6, kind: input, shape index: {}]   ;;  %s3885_s7 = inlined_call_operand.vmem [shape: f32[128,6], index: 7, kind: input, shape index: {}]   ;;  %s3886_s8 = inlined_call_operand.vmem [shape: f32[128,64], index: 8, kind: input, shape index: {}]   ;;  %s3887_s9 = inlined_call_operand.vmem [shape: f32[128,128], index: 9, kind: input, shape index: {}]   ;;  %s3888_s10 = inlined_call_operand.vmem [shape: f32[32,128], index: 10, kind: input, shape index: {}]   ;;  %s3889_s11 = inlined_call_operand.vmem [shape: f32[32,128], index: 11, kind: input, shape index: {}]   ;;  %s3890_s12 = inlined_call_operand.vmem [shape: f32[2,6,32], index: 12, kind: input, shape index: {}]   ;;  %s3891_s13 = inlined_call_operand.vmem [shape: f32[2,32,32], index: 13, kind: input, shape index: {}]   ;;  %s3892_s14 = inlined_call_operand.vmem [shape: f32[2,1,32], index: 14, kind: input, shape index: {}]   ;;  %s3893_s15 = inlined_call_operand.vmem [shape: f32[2,32,64], index: 15, kind: input, shape index: {}]   ;;  %s3894_s16 = inlined_call_operand.vmem [shape: f32[2,1,64], index: 16, kind: input, shape index: {}]   ;;  %s3895_s17 = inlined_call_operand.vmem [shape: f32[2,32,32], index: 17, kind: input, shape index: {}]   ;;  %s3896_s18 = inlined_call_operand.vmem [shape: f32[2,1,32], index: 18, kind: input, shape index: {}]   ;;  %s3897_s19 = inlined_call_operand.vmem [shape: f32[2,32,64], index: 19, kind: input, shape index: {}]   ;;  %s3898_s20 = inlined_call_operand.vmem [shape: f32[2,1,64], index: 20, kind: input, shape index: {}]   ;;  %s3899_s21 = inlined_call_operand.vmem [shape: f32[2,64,32], index: 21, kind: input, shape index: {}]   ;;  %s3900_s22 = inlined_call_operand.vmem [shape: f32[2,1,32], index: 22, kind: input, shape index: {}]   ;;  %s3901_s23 = inlined_call_operand.vmem [shape: f32[2,32], index: 23, kind: input, shape index: {}]   ;;  %s3902_s24 = inlined_call_operand.hbm [shape: f32[32,128], index: 24, kind: output, shape index: {0}]   ;;  %s3903_s25 = inlined_call_operand.vmem [shape: f32[2,32,128], index: 25, kind: output, shape index: {1}]  }
   0x1   :  { %3911 = sst [smem:[#allocation5_spill]] %s3878_s0 }
   0x2   :  { %3912 = sst [smem:[#allocation6_spill]] %s3879_s1 }
   0x3   :  { %3913 = sst [smem:[#allocation7_spill]] %s3880_s2 }
   0x4   :  { %3914 = sst [smem:[#allocation8_spill]] %s3881_s3 }
   0x5   :  { %3915 = sst [smem:[#allocation9_spill]] %s3882_s4 }
   0x6   :  { %3916 = sst [smem:[#allocation10_spill]] %s3883_s5 }
   0x7   :  { %3917 = sst [smem:[#allocation11_spill]] %s3884_s6 }
   0x8   :  { %3918 = sst [smem:[#allocation12_spill]] %s3885_s7 }
   0x9   :  { %3919 = sst [smem:[#allocation13_spill]] %s3886_s8 }
   0xa   :  { %3920 = sst [smem:[#allocation14_spill]] %s3887_s9 }
   0xb   :  { %s3921_s6 = sld [smem:[#allocation10_spill]]  ;;  %vm209_vm0 = vcmask 1043456   ;;  %vm205_vm1 = vcmask 293888  }
   0xc   :  { %s3922_s27 = sld [smem:[#allocation6_spill]] }
   0xd   :  { %s3923_s26 = sld [smem:[#allocation9_spill]] }
  0x11   :  { %v203_v0 = vld [vmem:[%s3921_s6 + $0x20] sm:$0xf]  ;;  %v202_v1 = vld [vmem:[%s3921_s6 + $0x18] sm:$0xff]  ;;  %v201_v2 = vld [vmem:[%s3921_s6 + $0x10] sm:$0xff] }
  0x12   :  { %2090 = vmatpush.msk.msra.mxu1 %vm209_vm0, %v203_v0  ;;  %v143_v3 = vld [vmem:[%s3922_s27 + $0x38] sm:$0xff]  ;;  %v142_v4 = vld [vmem:[%s3922_s27 + $0x30] sm:$0xff]  ;;  %v200_v5 = vld [vmem:[%s3921_s6 + $0x8] sm:$0xff] }
  0x13   :  { %169 = vmatpush.msra.mxu0 %v143_v3  ;;  %v141_v6 = vld [vmem:[%s3922_s27 + $0x28] sm:$0xff]  ;;  %v199_v7 = vld [vmem:[%s3921_s6] sm:$0xff]  ;;  %v139_v10 = vld [vmem:[%s3922_s27 + $0x18] sm:$0xff] }
  0x14   :  { %225 = vmatpush.msra.mxu1 %v202_v1  ;;  %v198_v8 = vld [vmem:[%s3923_s26] sm:$0x3f] }
  0x15   :  { %170 = vmatpush.msra.mxu0 %v142_v4  ;;  %v140_v9 = vld [vmem:[%s3922_s27 + $0x20] sm:$0xff] }
  0x16   :  { %226 = vmatpush.msra.mxu1 %v201_v2 }
  0x17   :  { %171 = vmatpush.msra.mxu0 %v141_v6 }
  0x18   :  { %227 = vmatpush.msra.mxu1 %v200_v5 }
  0x19   :  { %172 = vmatpush.msra.mxu0 %v140_v9 }
  0x1a   :  { %228 = vmatpush.msra.mxu1 %v199_v7 }
  0x1b   :  { %31 = vsyncpa [#allocation3], 0  ;;  %2091 = vmatmul.msk.f32.vlgmr.msra.gmra.mxu1 %vm205_vm1, %v198_v8  ;;  %v138_v11 = vld [vmem:[%s3922_s27 + $0x10] sm:$0xff]  ;;  %173 = vmatpush.msra.mxu0 %v139_v10  ;;  %v137_v12 = vld [vmem:[%s3922_s27 + $0x8] sm:$0xff]  ;;  %s3924_s3 = sld [smem:[#allocation5_spill]]  ;;  %vm148_vm2 = vcmask 523264  }
  0x1c   :  { %v136_v13 = vld [vmem:[%s3922_s27] sm:$0xff]  ;;  %s3925_s5 = sld [smem:[#allocation11_spill]]  ;;  %vm389_vm3 = vcmask 259072   ;;  %vm234_vm4 = vcmask 261120   ;;  %v2509_v43 = vmov 32.0   ;;  %s2512_s0 = smov 128  }
  0x1d   :  { %174 = vmatpush.msra.mxu0 %v138_v11  ;;  %s3926_s2 = sld [smem:[#allocation7_spill]]  ;;  %2354 = vrcp.f32 %v2509_v43  ;;  %v419_v11 = vld [vmem:[%s3893_s15 + $0x18] sm:$0xff] }
  0x1e   :  { %439 = vmatpush.msra.mxu3 %v419_v11  ;;  %s3928_s7 = sld [smem:[#allocation12_spill]] }
  0x1f   :  { %175 = vmatpush.msra.mxu0 %v137_v12  ;;  %v418_v12 = vld [vmem:[%s3893_s15 + $0x10] sm:$0xff]  ;;  %s3929_s4 = sld [smem:[#allocation13_spill]] }
  0x20   :  { %440 = vmatpush.msra.mxu3 %v418_v12  ;;  %s3930_s30 = sld [smem:[#allocation14_spill]] }
  0x21   :  { %v132_v14 = vld [vmem:[%s3924_s3] sm:$0xff]  ;;  %176 = vmatpush.msra.mxu0 %v136_v13  ;;  %v133_v15 = vld [vmem:[%s3924_s3 + $0x8] sm:$0xff]  ;;  %v134_v16 = vld [vmem:[%s3924_s3 + $0x10] sm:$0xff] }
  0x22   :  { %2086 = vmatmul.msk.f32.vlgmr.msra.gmra.mxu0 %vm148_vm2, %v132_v14  ;;  %v135_v17 = vld [vmem:[%s3924_s3 + $0x18] sm:$0xff]  ;;  %v204_v18 = vld [vmem:[%s3925_s5] sm:$0x3f]  ;;  %s3927_s3 = sld [smem:[#allocation8_spill]]  ;;  %v417_v13 = vld [vmem:[%s3893_s15 + $0x8] sm:$0xff]  ;;  %s2510_s5 = smov 96  }
  0x23   :  { %v2343_v22 = vld [vmem:[%s3926_s2] ss:$0 sm:$0xff]  ;;  %v2355_v44 = vpop.eup %2354  ;;  %441 = vmatpush.msra.mxu3 %v417_v13 }
  0x24   :  { %v248_v45 = vmul.f32 32.0, %v2355_v44  ;;  %vm252_vm5 = vweird.f32 %v2355_v44  ;;  %v416_v14 = vld [vmem:[%s3893_s15] sm:$0xff] }
  0x25   :  { %442 = vmatpush.msra.mxu3 %v416_v14 }
  0x26   :  { %v249_v46 = vsub.f32 1.0, %v248_v45  ;;  %v340_v45 = vld [vmem:[%s3891_s13] sm:$0xff] }
  0x28   :  { %v190_v24 = vld [vmem:[%s3927_s3] sm:$0xff]  ;;  %v191_v29 = vld [vmem:[%s3927_s3 + $0x8] sm:$0xff]  ;;  %v192_v34 = vld [vmem:[%s3927_s3 + $0x10] sm:$0xff]  ;;  %v250_v47 = vmul.f32 %v2355_v44, %v249_v46 }
  0x29   :  { %v193_v39 = vld [vmem:[%s3927_s3 + $0x18] sm:$0xff] }
  0x2a   :  { %2087 = vmatmul.msk.f32.gmra.mxu0 %vm148_vm2, %v133_v15  ;;  %v251_v48 = vadd.f32 %v2355_v44, %v250_v47 }
  0x2c   :  { %v2737_v49 = vsel %vm252_vm5, %v2355_v44, %v251_v48  ;;  %v341_v44 = vld [vmem:[%s3891_s13 + $0x8] sm:$0xff] }
  0x32   :  { %2088 = vmatmul.msk.f32.gmra.mxu0 %vm148_vm2, %v134_v16 }
  0x3a   :  { %2089 = vmatmul.msk.f32.gmra.mxu0 %vm148_vm2, %v135_v17 }
  0x98   :  { %v230_v19 = vpop.f32.mrf.mxu1 }
  0x99   :  { %v231_v20 = vadd.f32 %v230_v19, %v204_v18 }
  0x9b   :  { %v390_v21 = vsel %vm389_vm3, %v231_v20, 0.0 }
  0x9c   :  { %391 = vadd.xlane.f32.xlu0 %v390_v21 }
  0x9f   :  { %v178_v23 = vpop.f32.mrf.mxu0 }
  0xa0   :  { %v179_v25 = vadd.f32 %v2343_v22, %v178_v23 }
  0xa2   :  { %v2712_v26 = vadd.f32 %v190_v24, %v179_v25  ;;  %v343_v25 = vld [vmem:[%s3891_s13 + $0x18] sm:$0xff] }
  0xa3   :  { %372 = vmatpush.msra.mxu2 %v343_v25 }
  0xa4   :  { %v235_v27 = vsel %vm234_vm4, %v2712_v26, 0.0 }
  0xa5   :  { %236 = vadd.xlane.f32.xlu1 %v235_v27  ;;  %v342_v27 = vld [vmem:[%s3891_s13 + $0x10] sm:$0xff] }
  0xa6   :  { %373 = vmatpush.msra.mxu2 %v342_v27 }
  0xa7   :  { %v181_v28 = vpop.f32.mrf.mxu0 }
  0xa8   :  { %v182_v30 = vadd.f32 %v2343_v22, %v181_v28  ;;  %374 = vmatpush.msra.mxu2 %v341_v44  ;;  %v85_v44 = vld [vmem:[%s3928_s7 + $0x28] sm:$0xff] }
  0xaa   :  { %v2719_v31 = vadd.f32 %v191_v29, %v182_v30  ;;  %v2796_v29 = vld [vmem:[%s3890_s12] sm:$0x3f]  ;;  %375 = vmatpush.msra.mxu2 %v340_v45  ;;  %v86_v45 = vld [vmem:[%s3928_s7 + $0x30] sm:$0xff] }
  0xac   :  { %v238_v32 = vsel %vm234_vm4, %v2719_v31, 0.0 }
  0xad   :  { %239 = vadd.xlane.f32.xlu1 %v238_v32 }
  0xaf   :  { %v184_v33 = vpop.f32.mrf.mxu0 }
  0xb0   :  { %v185_v35 = vadd.f32 %v2343_v22, %v184_v33 }
  0xb2   :  { %v2726_v36 = vadd.f32 %v192_v34, %v185_v35  ;;  %v412_v35 = vperm.slane %v2796_v29, 2 }
  0xb4   :  { %v241_v37 = vsel %vm234_vm4, %v2726_v36, 0.0 }
  0xb5   :  { %242 = vadd.xlane.f32.xlu2 %v241_v37 }
  0xb7   :  { %v187_v38 = vpop.f32.mrf.mxu0 }
  0xb8   :  { %v188_v40 = vadd.f32 %v2343_v22, %v187_v38 }
  0xba   :  { %v2733_v41 = vadd.f32 %v193_v39, %v188_v40 }
  0xbc   :  { %v244_v42 = vsel %vm234_vm4, %v2733_v41, 0.0 }
  0xbd   :  { %245 = vadd.xlane.f32.xlu2 %v244_v42  ;;  %v414_v42 = vperm.slane %v2796_v29, 3 }
 0x10f   :  { %v392_v50 = vpop.xlane.xlu0 %391 }
 0x110   :  { %v393_v51 = vmul.f32 %v392_v50, %v2737_v49 }
 0x112   :  { %v2740_v52 = vsub.f32 %v231_v20, %v393_v51 }
 0x114   :  { %v395_v53 = vmul.f32 %v2740_v52, %v2740_v52 }
 0x116   :  { %v396_v54 = vsel %vm389_vm3, %v395_v53, 0.0 }
 0x117   :  { %397 = vadd.xlane.f32.xlu0 %v396_v54 }
 0x118   :  { %v237_v55 = vpop.xlane.xlu1 %236 }
 0x119   :  { %v254_v56 = vmul.f32 %v2737_v49, %v237_v55 }
 0x11b   :  { %v2747_v57 = vsub.f32 %v2712_v26, %v254_v56 }
 0x11d   :  { %v262_v58 = vmul.f32 %v2747_v57, %v2747_v57 }
 0x11f   :  { %v266_v59 = vsel %vm234_vm4, %v262_v58, 0.0  ;;  %v330_v58 = vperm.slane %v2796_v29, 0 }
 0x120   :  { %267 = vadd.xlane.f32.xlu0 %v266_v59  ;;  %v240_v60 = vpop.xlane.xlu1 %239 }
 0x121   :  { %v255_v61 = vmul.f32 %v2737_v49, %v240_v60 }
 0x123   :  { %v2754_v62 = vsub.f32 %v2719_v31, %v255_v61 }
 0x125   :  { %v263_v63 = vmul.f32 %v2754_v62, %v2754_v62 }
 0x127   :  { %v269_v0 = vsel %vm234_vm4, %v263_v63, 0.0  ;;  %v335_v63 = vperm.slane %v2796_v29, 1 }
 0x128   :  { %v243_v1 = vpop.xlane.xlu2 %242  ;;  %270 = vadd.xlane.f32.xlu1 %v269_v0 }
 0x129   :  { %v256_v2 = vmul.f32 %v2737_v49, %v243_v1 }
 0x12b   :  { %v2761_v3 = vsub.f32 %v2726_v36, %v256_v2 }
 0x12d   :  { %v264_v4 = vmul.f32 %v2761_v3, %v2761_v3 }
 0x12f   :  { %v272_v5 = vsel %vm234_vm4, %v264_v4, 0.0 }
 0x130   :  { %273 = vadd.xlane.f32.xlu2 %v272_v5  ;;  %v246_v6 = vpop.xlane.xlu2 %245 }
 0x131   :  { %v257_v7 = vmul.f32 %v2737_v49, %v246_v6 }
 0x133   :  { %v2768_v8 = vsub.f32 %v2733_v41, %v257_v7 }
 0x135   :  { %v265_v9 = vmul.f32 %v2768_v8, %v2768_v8 }
 0x137   :  { %v275_v10 = vsel %vm234_vm4, %v265_v9, 0.0 }
 0x138   :  { %276 = vadd.xlane.f32.xlu0 %v275_v10 }
 0x18a   :  { %v398_v15 = vpop.xlane.xlu0 %397 }
 0x18b   :  { %v399_v16 = vmul.f32 %v398_v15, %v2737_v49 }
 0x18d   :  { %v400_v17 = vadd.f32 1e-06, %v399_v16 }
 0x18f   :  { %2356 = vrsqrt.f32 %v400_v17  ;;  %vm407_vm7 = vweird.f32 %v400_v17 }
 0x193   :  { %v268_v18 = vpop.xlane.xlu0 %267 }
 0x194   :  { %v278_v20 = vmul.f32 %v268_v18, %v2737_v49 }
 0x195   :  { %v2357_v19 = vpop.eup %2356 }
 0x196   :  { %v402_v21 = vmul.f32 %v2357_v19, %v400_v17  ;;  %v282_v22 = vadd.f32 1e-06, %v278_v20  ;;  %vm408_vm6 = vweird.f32 %v2357_v19 }
 0x197   :  { %vm409_vm8 = vmor %vm407_vm7, %vm408_vm6  ;;  %vm496_vm7 = vcmask 1045504  }
 0x198   :  { %v403_v23 = vmul.f32 %v2357_v19, %v402_v21  ;;  %2358 = vrsqrt.f32 %v282_v22  ;;  %vm292_vm9 = vweird.f32 %v282_v22 }
 0x19a   :  { %v404_v24 = vmul.f32 0.5, %v403_v23 }
 0x19b   :  { %v271_v30 = vpop.xlane.xlu1 %270 }
 0x19c   :  { %v405_v28 = vsub.f32 1.5, %v404_v24  ;;  %v279_v32 = vmul.f32 %v271_v30, %v2737_v49 }
 0x19e   :  { %v406_v33 = vmul.f32 %v2357_v19, %v405_v28  ;;  %v2359_v34 = vpop.eup %2358  ;;  %v283_v37 = vadd.f32 1e-06, %v279_v32 }
 0x19f   :  { %v287_v39 = vmul.f32 %v2359_v34, %v282_v22  ;;  %vm293_vm10 = vweird.f32 %v2359_v34 }
 0x1a0   :  { %v410_v38 = vsel %vm409_vm8, %v2357_v19, %v406_v33  ;;  %2360 = vrsqrt.f32 %v283_v37  ;;  %vm294_vm11 = vmor %vm292_vm9, %vm293_vm10  ;;  %vm302_vm12 = vweird.f32 %v283_v37  ;;  %vm447_vm8 = vcmask 48128  }
 0x1a1   :  { %v2801_v40 = vmul.f32 %v410_v38, %v2740_v52  ;;  %v288_v43 = vmul.f32 %v2359_v34, %v287_v39  ;;  %v80_v38 = vld [vmem:[%s3928_s7] sm:$0xff]  ;;  %v82_v39 = vld [vmem:[%s3928_s7 + $0x10] sm:$0xff] }
 0x1a3   :  { %v413_v46 = vmul.f32 %v412_v35, %v2801_v40  ;;  %v289_v47 = vmul.f32 0.5, %v288_v43  ;;  %v274_v48 = vpop.xlane.xlu2 %273  ;;  %v84_v43 = vld [vmem:[%s3928_s7 + $0x20] sm:$0xff] }
 0x1a4   :  { %v280_v51 = vmul.f32 %v274_v48, %v2737_v49  ;;  %v89_v48 = vld [vmem:[%s3928_s7 + $0x48] sm:$0xff] }
 0x1a5   :  { %v415_v50 = vadd.f32 %v414_v42, %v413_v46  ;;  %v290_v52 = vsub.f32 1.5, %v289_v47  ;;  %v83_v42 = vld [vmem:[%s3928_s7 + $0x18] sm:$0xff]  ;;  %v88_v47 = vld [vmem:[%s3928_s7 + $0x40] sm:$0xff] }
 0x1a6   :  { %v2361_v53 = vpop.eup %2360  ;;  %v284_v54 = vadd.f32 1e-06, %v280_v51  ;;  %v87_v46 = vld [vmem:[%s3928_s7 + $0x38] sm:$0xff] }
 0x1a7   :  { %2096 = vmatmul.msk.f32.vlgmr.msra.gmra.mxu3 %vm234_vm4, %v415_v50  ;;  %v291_v55 = vmul.f32 %v2359_v34, %v290_v52  ;;  %v297_v56 = vmul.f32 %v2361_v53, %v283_v37  ;;  %vm303_vm13 = vweird.f32 %v2361_v53  ;;  %v90_v50 = vld [vmem:[%s3928_s7 + $0x50] sm:$0xff]  ;;  %v91_v51 = vld [vmem:[%s3928_s7 + $0x58] sm:$0xff]  ;;  %v92_v52 = vld [vmem:[%s3928_s7 + $0x60] sm:$0xff] }
 0x1a8   :  { %2362 = vrsqrt.f32 %v284_v54  ;;  %vm304_vm14 = vmor %vm302_vm12, %vm303_vm13  ;;  %vm312_vm15 = vweird.f32 %v284_v54 }
 0x1a9   :  { %v295_v59 = vsel %vm294_vm11, %v2359_v34, %v291_v55  ;;  %v298_v60 = vmul.f32 %v2361_v53, %v297_v56  ;;  %v95_v55 = vld [vmem:[%s3928_s7 + $0x78] sm:$0xff] }
 0x1aa   :  { %v326_v61 = vmul.f32 %v295_v59, %v2747_v57 }
 0x1ab   :  { %v299_v0 = vmul.f32 0.5, %v298_v60  ;;  %v277_v1 = vpop.xlane.xlu0 %276 }
 0x1ac   :  { %v281_v2 = vmul.f32 %v277_v1, %v2737_v49  ;;  %v331_v4 = vmul.f32 %v330_v58, %v326_v61 }
 0x1ad   :  { %v300_v5 = vsub.f32 1.5, %v299_v0 }
 0x1ae   :  { %v2363_v6 = vpop.eup %2362  ;;  %v285_v7 = vadd.f32 1e-06, %v281_v2  ;;  %v336_v9 = vadd.f32 %v335_v63, %v331_v4 }
 0x1af   :  { %v301_v10 = vmul.f32 %v2361_v53, %v300_v5  ;;  %v307_v11 = vmul.f32 %v2363_v6, %v284_v54  ;;  %vm313_vm0 = vweird.f32 %v2363_v6  ;;  %v94_v54 = vld [vmem:[%s3928_s7 + $0x70] sm:$0xff] }
 0x1b0   :  { %2364 = vrsqrt.f32 %v285_v7  ;;  %2092 = vmatmul.msk.f32.vlgmr.msra.gmra.mxu2 %vm234_vm4, %v336_v9  ;;  %vm314_vm1 = vmor %vm312_vm15, %vm313_vm0  ;;  %vm322_vm3 = vweird.f32 %v285_v7 }
 0x1b1   :  { %v305_v57 = vsel %vm304_vm14, %v2361_v53, %v301_v10  ;;  %v308_v12 = vmul.f32 %v2363_v6, %v307_v11  ;;  %v93_v53 = vld [vmem:[%s3928_s7 + $0x68] sm:$0xff] }
 0x1b2   :  { %v327_v13 = vmul.f32 %v305_v57, %v2754_v62 }
 0x1b3   :  { %v309_v14 = vmul.f32 0.5, %v308_v12 }
 0x1b4   :  { %v332_v15 = vmul.f32 %v330_v58, %v327_v13  ;;  %v108_v13 = vld [vmem:[%s3929_s4 + $0x60] sm:$0xff] }
 0x1b5   :  { %v310_v16 = vsub.f32 1.5, %v309_v14  ;;  %v109_v14 = vld [vmem:[%s3929_s4 + $0x68] sm:$0xff] }
 0x1b6   :  { %v2365_v17 = vpop.eup %2364  ;;  %v337_v18 = vadd.f32 %v335_v63, %v332_v15 }
 0x1b7   :  { %v311_v19 = vmul.f32 %v2363_v6, %v310_v16  ;;  %v317_v20 = vmul.f32 %v2365_v17, %v285_v7  ;;  %vm323_vm5 = vweird.f32 %v2365_v17  ;;  %v107_v7 = vld [vmem:[%s3929_s4 + $0x58] sm:$0xff] }
 0x1b8   :  { %2093 = vmatmul.msk.f32.gmra.mxu2 %vm234_vm4, %v337_v18  ;;  %vm324_vm6 = vmor %vm322_vm3, %vm323_vm5 }
 0x1b9   :  { %v315_v21 = vsel %vm314_vm1, %v2363_v6, %v311_v19  ;;  %v318_v22 = vmul.f32 %v2365_v17, %v317_v20  ;;  %v106_v6 = vld [vmem:[%s3929_s4 + $0x50] sm:$0xff] }
 0x1ba   :  { %v328_v23 = vmul.f32 %v315_v21, %v2761_v3  ;;  %v2344_v3 = vld [vmem:[%s3894_s16] ss:$0 sm:$0xff]  ;;  %v110_v20 = vld [vmem:[%s3929_s4 + $0x70] sm:$0xff]  ;;  %v111_v21 = vld [vmem:[%s3929_s4 + $0x78] sm:$0xff] }
 0x1bb   :  { %v319_v24 = vmul.f32 0.5, %v318_v22 }
 0x1bc   :  { %v333_v62 = vmul.f32 %v330_v58, %v328_v23 }
 0x1bd   :  { %v320_v25 = vsub.f32 1.5, %v319_v24 }
 0x1be   :  { %v338_v27 = vadd.f32 %v335_v63, %v333_v62 }
 0x1bf   :  { %v321_v28 = vmul.f32 %v2365_v17, %v320_v25  ;;  %v105_v25 = vld [vmem:[%s3929_s4 + $0x48] sm:$0xff] }
 0x1c0   :  { %2094 = vmatmul.msk.f32.gmra.mxu2 %vm234_vm4, %v338_v27 }
 0x1c1   :  { %v325_v30 = vsel %vm324_vm6, %v2365_v17, %v321_v28  ;;  %v104_v28 = vld [vmem:[%s3929_s4 + $0x40] sm:$0xff] }
 0x1c2   :  { %v329_v32 = vmul.f32 %v325_v30, %v2768_v8  ;;  %v81_v8 = vld [vmem:[%s3928_s7 + $0x8] sm:$0xff] }
 0x1c4   :  { %v334_v33 = vmul.f32 %v330_v58, %v329_v32  ;;  %v103_v32 = vld [vmem:[%s3929_s4 + $0x38] sm:$0xff] }
 0x1c6   :  { %v339_v34 = vadd.f32 %v335_v63, %v334_v33 }
 0x1c8   :  { %2095 = vmatmul.msk.f32.gmra.mxu2 %vm234_vm4, %v339_v34  ;;  %v102_v34 = vld [vmem:[%s3929_s4 + $0x30] sm:$0xff] }
 0x22a   :  { %v444_v35 = vpop.f32.mrf.mxu3 }
 0x22b   :  { %v445_v37 = vadd.f32 %v2344_v3, %v444_v35  ;;  %v101_v35 = vld [vmem:[%s3929_s4 + $0x28] sm:$0xff] }
 0x22d   :  { %2097 = vmatpush.msk.msrb.mxu3 %vm496_vm7, %v445_v37 }
 0x22e   :  { %2098 = vmatmul.msk.f32.vlgmr.msrb.gmra.mxu3 %vm447_vm8, %v80_v38  ;;  %v100_v38 = vld [vmem:[%s3929_s4 + $0x20] sm:$0xff] }
 0x236   :  { %2099 = vmatmul.msk.f32.gmra.mxu3 %vm447_vm8, %v81_v8 }
 0x23e   :  { %2100 = vmatmul.msk.f32.gmra.mxu3 %vm447_vm8, %v82_v39  ;;  %v99_v39 = vld [vmem:[%s3929_s4 + $0x18] sm:$0xff] }
 0x246   :  { %2101 = vmatmul.msk.f32.gmra.mxu3 %vm447_vm8, %v83_v42 }
 0x24e   :  { %2102 = vmatmul.msk.f32.gmra.mxu3 %vm447_vm8, %v84_v43  ;;  %v98_v43 = vld [vmem:[%s3929_s4 + $0x10] sm:$0xff] }
 0x256   :  { %2103 = vmatmul.msk.f32.gmra.mxu3 %vm447_vm8, %v85_v44 }
 0x25e   :  { %2104 = vmatmul.msk.f32.gmra.mxu3 %vm447_vm8, %v86_v45  ;;  %v97_v45 = vld [vmem:[%s3929_s4 + $0x8] sm:$0xff] }
 0x266   :  { %2105 = vmatmul.msk.f32.gmra.mxu3 %vm447_vm8, %v87_v46  ;;  %v377_v46 = vpop.f32.mrf.mxu2 }
 0x26e   :  { %2106 = vmatmul.msk.f32.gmra.mxu3 %vm447_vm8, %v88_v47 }
 0x276   :  { %2107 = vmatmul.msk.f32.gmra.mxu3 %vm447_vm8, %v89_v48  ;;  %v96_v48 = vld [vmem:[%s3929_s4] sm:$0xff] }
 0x27e   :  { %2108 = vmatmul.msk.f32.gmra.mxu3 %vm447_vm8, %v90_v50  ;;  %v2345_v50 = vld [vmem:[%s3892_s14] ss:$0 sm:$0xff] }
 0x286   :  { %2109 = vmatmul.msk.f32.gmra.mxu3 %vm447_vm8, %v91_v51 }
 0x28e   :  { %2110 = vmatmul.msk.f32.gmra.mxu3 %vm447_vm8, %v92_v52  ;;  %v378_v52 = vadd.f32 %v2345_v50, %v377_v46 }
 0x296   :  { %2111 = vmatmul.msk.f32.gmra.mxu3 %vm447_vm8, %v93_v53  ;;  %v380_v53 = vpop.f32.mrf.mxu2 }
 0x29e   :  { %2112 = vmatmul.msk.f32.gmra.mxu3 %vm447_vm8, %v94_v54  ;;  %v381_v54 = vadd.f32 %v2345_v50, %v380_v53 }
 0x2a6   :  { %2113 = vmatmul.msk.f32.gmra.mxu3 %vm447_vm8, %v95_v55  ;;  %v383_v55 = vpop.f32.mrf.mxu2 }
 0x2b1   :  { %v2892_v56 = vpop.f32.mrf.mxu3 }
 0x2b2   :  { %v565_v51 = vmul.f32 %v2892_v56, %v96_v48 }
 0x2b9   :  { %v520_v58 = vpop.f32.mrf.mxu3 }
 0x2ba   :  { %v566_v47 = vmul.f32 %v520_v58, %v97_v45  ;;  %v384_v58 = vadd.f32 %v2345_v50, %v383_v55 }
 0x2c1   :  { %v523_v59 = vpop.f32.mrf.mxu3 }
 0x2c2   :  { %v2994_v44 = vmul.f32 %v523_v59, %v98_v43  ;;  %v386_v59 = vpop.f32.mrf.mxu2 }
 0x2c9   :  { %v526_v60 = vpop.f32.mrf.mxu3 }
 0x2ca   :  { %v2987_v42 = vmul.f32 %v526_v60, %v99_v39  ;;  %v387_v60 = vadd.f32 %v2345_v50, %v386_v59 }
 0x2d1   :  { %v529_v61 = vpop.f32.mrf.mxu3 }
 0x2d2   :  { %v2980_v8 = vmul.f32 %v529_v61, %v100_v38 }
 0x2d9   :  { %v532_v63 = vpop.f32.mrf.mxu3 }
 0x2da   :  { %v2973_v37 = vmul.f32 %v532_v63, %v101_v35 }
 0x2e1   :  { %v535_v0 = vpop.f32.mrf.mxu3 }
 0x2e2   :  { %v2966_v3 = vmul.f32 %v535_v0, %v102_v34 }
 0x2e9   :  { %v538_v1 = vpop.f32.mrf.mxu3 }
 0x2ea   :  { %v2959_v33 = vmul.f32 %v538_v1, %v103_v32 }
 0x2f1   :  { %v541_v2 = vpop.f32.mrf.mxu3 }
 0x2f2   :  { %v2952_v30 = vmul.f32 %v541_v2, %v104_v28 }
 0x2f9   :  { %v544_v4 = vpop.f32.mrf.mxu3 }
 0x2fa   :  { %v2945_v27 = vmul.f32 %v544_v4, %v105_v25  ;;  %v3138_v25 = vld [vmem:[%s3930_s30] sm:$0xff] }
 0x301   :  { %v547_v5 = vpop.f32.mrf.mxu3 }
 0x302   :  { %v2900_v10 = vmul.f32 %v547_v5, %v106_v6  ;;  %v3023_v6 = vld [vmem:[%s3930_s30 + $0x78] sm:$0xff] }
 0x303   :  { %694 = vmatpush.msrb.mxu1 %v3023_v6 }
 0x309   :  { %v550_v9 = vpop.f32.mrf.mxu3 }
 0x30a   :  { %v2902_v11 = vmul.f32 %v550_v9, %v107_v7  ;;  %v3028_v7 = vld [vmem:[%s3930_s30 + $0x70] sm:$0xff]  ;;  %v3034_v9 = vld [vmem:[%s3930_s30 + $0x68] sm:$0xff] }
 0x30b   :  { %695 = vmatpush.msrb.mxu1 %v3028_v7 }
 0x30c   :  { %v2273_v57 = vpack.i.bf16 %v2900_v10, %v2902_v11 }
 0x30d   :  { %696 = vmatpush.msrb.mxu1 %v3034_v9 }
 0x311   :  { %v553_v12 = vpop.f32.mrf.mxu3 }
 0x312   :  { %v2912_v16 = vmul.f32 %v553_v12, %v108_v13  ;;  %v3040_v12 = vld [vmem:[%s3930_s30 + $0x60] sm:$0xff]  ;;  %v3046_v13 = vld [vmem:[%s3930_s30 + $0x58] sm:$0xff] }
 0x313   :  { %697 = vmatpush.msrb.mxu1 %v3040_v12 }
 0x315   :  { %698 = vmatpush.msrb.mxu1 %v3046_v13 }
 0x319   :  { %v556_v15 = vpop.f32.mrf.mxu3 }
 0x31a   :  { %v2914_v17 = vmul.f32 %v556_v15, %v109_v14  ;;  %v3056_v14 = vld [vmem:[%s3930_s30 + $0x50] sm:$0xff]  ;;  %v3062_v15 = vld [vmem:[%s3930_s30 + $0x48] sm:$0xff] }
 0x31b   :  { %699 = vmatpush.msrb.mxu1 %v3056_v14 }
 0x31c   :  { %v2268_v18 = vpack.i.bf16 %v2912_v16, %v2914_v17 }
 0x31d   :  { %700 = vmatpush.msrb.mxu1 %v3062_v15 }
 0x321   :  { %v559_v19 = vpop.f32.mrf.mxu3 }
 0x322   :  { %v2924_v23 = vmul.f32 %v559_v19, %v110_v20  ;;  %v3072_v19 = vld [vmem:[%s3930_s30 + $0x40] sm:$0xff]  ;;  %v2278_v20 = vpack.i.bf16 %v2952_v30, %v2945_v27 }
 0x323   :  { %701 = vmatpush.msrb.mxu1 %v3072_v19 }
 0x329   :  { %v562_v22 = vpop.f32.mrf.mxu3 }
 0x32a   :  { %v2926_v24 = vmul.f32 %v562_v22, %v111_v21  ;;  %v3080_v21 = vld [vmem:[%s3930_s30 + $0x38] sm:$0xff]  ;;  %v2298_v22 = vpack.i.bf16 %v565_v51, %v566_v47 }
 0x32b   :  { %702 = vmatpush.msrb.mxu1 %v3080_v21 }
 0x32c   :  { %v2263_v62 = vpack.i.bf16 %v2924_v23, %v2926_v24  ;;  %2114 = vmatpush.xpose.msk.msrb.mxu2 %vm234_vm4, %v2926_v24  ;;  %v3108_v24 = vld [vmem:[%s3930_s30 + $0x28] sm:$0xff] }
 0x330   :  { %2115 = vmatpush.xpose.msk.msrb.mxu2 %vm234_vm4, %v2924_v23  ;;  %v2293_v23 = vpack.i.bf16 %v2994_v44, %v2987_v42 }
 0x334   :  { %2116 = vmatpush.xpose.msk.msrb.mxu2 %vm234_vm4, %v2914_v17  ;;  %v2283_v17 = vpack.i.bf16 %v2966_v3, %v2959_v33 }
 0x338   :  { %2117 = vmatpush.xpose.msk.msrb.mxu2 %vm234_vm4, %v2912_v16  ;;  %v3087_v16 = vld [vmem:[%s3930_s30 + $0x30] sm:$0xff] }
 0x339   :  { %703 = vmatpush.msrb.mxu1 %v3087_v16 }
 0x33b   :  { %704 = vmatpush.msrb.mxu1 %v3108_v24 }
 0x33c   :  { %2118 = vmatpush.xpose.msk.msrb.mxu2 %vm234_vm4, %v2902_v11  ;;  %v3120_v11 = vld [vmem:[%s3930_s30 + $0x18] sm:$0xff] }
 0x340   :  { %2119 = vmatpush.xpose.msk.msrb.mxu2 %vm234_vm4, %v2900_v10  ;;  %v3114_v10 = vld [vmem:[%s3930_s30 + $0x20] sm:$0xff] }
 0x341   :  { %705 = vmatpush.msrb.mxu1 %v3114_v10 }
 0x343   :  { %706 = vmatpush.msrb.mxu1 %v3120_v11 }
 0x344   :  { %2120 = vmatpush.xpose.msk.msrb.mxu2 %vm234_vm4, %v2945_v27 }
 0x348   :  { %2121 = vmatpush.xpose.msk.msrb.mxu2 %vm234_vm4, %v2952_v30 }
 0x34c   :  { %2122 = vmatpush.xpose.msk.msrb.mxu2 %vm234_vm4, %v2959_v33 }
 0x350   :  { %2123 = vmatpush.xpose.msk.msrb.mxu2 %vm234_vm4, %v2966_v3 }
 0x354   :  { %2124 = vmatpush.xpose.msk.msrb.mxu2 %vm234_vm4, %v2973_v37 }
 0x358   :  { %2125 = vmatpush.xpose.msk.msrb.mxu2 %vm234_vm4, %v2980_v8 }
 0x35c   :  { %2126 = vmatpush.xpose.msk.msrb.mxu2 %vm234_vm4, %v2987_v42 }
 0x360   :  { %2127 = vmatpush.xpose.msk.msrb.mxu2 %vm234_vm4, %v2994_v44 }
 0x364   :  { %2128 = vmatpush.xpose.msk.msrb.mxu2 %vm234_vm4, %v566_v47 }
 0x368   :  { %2129 = vmatpush.xpose.msk.msrb.mxu2 %vm234_vm4, %v565_v51 }
 0x36b   :  { %2130 = vmatmul.msk.f32.vlgmr.msrb.gmra.mxu2 %vm234_vm4, %v378_v52 }
 0x373   :  { %2131 = vmatmul.msk.f32.gmra.mxu2 %vm234_vm4, %v381_v54 }
 0x37b   :  { %2132 = vmatmul.msk.f32.gmra.mxu2 %vm234_vm4, %v384_v58 }
 0x383   :  { %2133 = vmatmul.msk.f32.gmra.mxu2 %vm234_vm4, %v387_v60 }
 0x3ee   :  { %v658_v61 = vpop.f32.mrf.mxu2 }
 0x3ef   :  { %v670_v63 = vmul.f32 0.35355338, %v658_v61 }
 0x3f1   :  { %674 = vmax.xlane.f32.xlu1 %v670_v63 }
 0x3f6   :  { %v661_v56 = vpop.f32.mrf.mxu2 }
 0x3f7   :  { %v671_v0 = vmul.f32 0.35355338, %v661_v56 }
 0x3f9   :  { %676 = vmax.xlane.f32.xlu2 %v671_v0 }
 0x3fe   :  { %v664_v1 = vpop.f32.mrf.mxu2 }
 0x3ff   :  { %v3014_v2 = vmul.f32 0.35355338, %v664_v1 }
 0x401   :  { %678 = vmax.xlane.f32.xlu0 %v3014_v2 }
 0x406   :  { %v667_v4 = vpop.f32.mrf.mxu2 }
 0x407   :  { %v3017_v5 = vmul.f32 0.35355338, %v667_v4 }
 0x409   :  { %680 = vmax.xlane.f32.xlu1 %v3017_v5 }
 0x411   :  { %2264 = vrot.lane.b32.xlu2 %v2263_v62, %s2510_s5  ;;  %v3132_v62 = vld [vmem:[%s3930_s30 + $0x8] sm:$0xff] }
 0x415   :  { %2269 = vrot.lane.b32.xlu0 %v2268_v18, %s2510_s5  ;;  %v2288_v18 = vpack.i.bf16 %v2980_v8, %v2973_v37 }
 0x419   :  { %2279 = vrot.lane.b32.xlu2 %v2278_v20, %s2510_s5 }
 0x41d   :  { %2284 = vrot.lane.b32.xlu0 %v2283_v17, %s2510_s5 }
 0x421   :  { %2289 = vrot.lane.b32.xlu2 %v2288_v18, %s2510_s5 }
 0x422   :  { %2274 = vrot.lane.b32.xlu1 %v2273_v57, %s2510_s5  ;;  %v3126_v57 = vld [vmem:[%s3930_s30 + $0x10] sm:$0xff]  ;;  %s2070_s30 = sshll.u32 %s3902_s24, 4  ;;  %s2071_s30 = int_to_ptr.hbm [resolvable:$true] %s2070_s30 }
 0x423   :  { %707 = vmatpush.msrb.mxu1 %v3126_v57 }
 0x425   :  { %2299 = vrot.lane.b32.xlu0 %v2298_v22, %s2510_s5  ;;  %708 = vmatpush.msrb.mxu1 %v3132_v62 }
 0x427   :  { %709 = vmatpush.msrb.mxu1 %v3138_v25 }
 0x42a   :  { %2294 = vrot.lane.b32.xlu1 %v2293_v23, %s2510_s5 }
 0x464   :  { %v675_v27 = vpop.xlane.xlu1 %674 }
 0x465   :  { %v682_v28 = vsub.f32 %v670_v63, %v675_v27  ;;  %v819_v27 = vld [vmem:[%s3895_s17 + $0x18] sm:$0xff] }
 0x467   :  { %v686_v30 = vmul.f32 1.442695, %v682_v28  ;;  %v818_v28 = vld [vmem:[%s3895_s17 + $0x10] sm:$0xff] }
 0x469   :  { %2366 = vpow2.f32 %v686_v30  ;;  %v817_v30 = vld [vmem:[%s3895_s17 + $0x8] sm:$0xff] }
 0x46c   :  { %v677_v32 = vpop.xlane.xlu2 %676 }
 0x46d   :  { %v683_v33 = vsub.f32 %v671_v0, %v677_v32 }
 0x46f   :  { %v3141_v34 = vpop.eup %2366  ;;  %v688_v3 = vmul.f32 1.442695, %v683_v33  ;;  %v128_v33 = vld [vmem:[%s3888_s10] sm:$0xff] }
 0x470   :  { %710 = vmatmul.f32.vlgmr.msrb.gmra.mxu1 %v3141_v34 }
 0x471   :  { %2368 = vpow2.f32 %v688_v3 }
 0x474   :  { %v2265_v35 = vpop.permute.xlu2 %2264  ;;  %v679_v37 = vpop.xlane.xlu0 %678 }
 0x475   :  { %v684_v38 = vsub.f32 %v3014_v2, %v679_v37  ;;  %v2266_v8 = vunpack.i.l.bf16 %v2265_v35  ;;  %v2267_v43 = vunpack.i.h.bf16 %v2265_v35 }
 0x477   :  { %v3145_v39 = vpop.eup %2368  ;;  %v690_v42 = vmul.f32 1.442695, %v684_v38  ;;  %787 = vmatpush.msrb.mxu0 %v2266_v8  ;;  %2238 = vmatpush.msra.mxu1 %v2266_v8  ;;  %v129_v8 = vld [vmem:[%s3888_s10 + $0x8] sm:$0xff] }
 0x478   :  { %713 = vmatmul.f32.gmra.mxu1 %v3145_v39 }
 0x479   :  { %2370 = vpow2.f32 %v690_v42  ;;  %788 = vmatpush.msrb.mxu0 %v2267_v43  ;;  %2239 = vmatpush.msra.mxu1 %v2267_v43 }
 0x47c   :  { %v681_v44 = vpop.xlane.xlu1 %680  ;;  %v2280_v53 = vpop.permute.xlu2 %2279 }
 0x47d   :  { %v685_v45 = vsub.f32 %v3017_v5, %v681_v44  ;;  %v2281_v59 = vunpack.i.l.bf16 %v2280_v53  ;;  %v2282_v61 = vunpack.i.h.bf16 %v2280_v53 }
 0x47f   :  { %v3149_v46 = vpop.eup %2370  ;;  %v692_v47 = vmul.f32 1.442695, %v685_v45  ;;  %v130_v45 = vld [vmem:[%s3888_s10 + $0x10] sm:$0xff] }
 0x480   :  { %716 = vmatmul.f32.gmra.mxu1 %v3149_v46 }
 0x481   :  { %2372 = vpow2.f32 %v692_v47 }
 0x484   :  { %v2290_v56 = vpop.permute.xlu2 %2289 }
 0x485   :  { %v2291_v1 = vunpack.i.l.bf16 %v2290_v56  ;;  %v2292_v4 = vunpack.i.h.bf16 %v2290_v56 }
 0x487   :  { %v3152_v48 = vpop.eup %2372  ;;  %v2270_v50 = vpop.permute.xlu0 %2269 }
 0x488   :  { %719 = vmatmul.f32.gmra.mxu1 %v3152_v48  ;;  %v2271_v51 = vunpack.i.l.bf16 %v2270_v50  ;;  %v2272_v52 = vunpack.i.h.bf16 %v2270_v50 }
 0x48a   :  { %789 = vmatpush.msrb.mxu0 %v2271_v51  ;;  %2240 = vmatpush.msra.mxu1 %v2271_v51 }
 0x48c   :  { %790 = vmatpush.msrb.mxu0 %v2272_v52  ;;  %2241 = vmatpush.msra.mxu1 %v2272_v52  ;;  %v131_v52 = vld [vmem:[%s3888_s10 + $0x18] sm:$0xff] }
 0x48f   :  { %v2285_v60 = vpop.permute.xlu0 %2284 }
 0x490   :  { %v2286_v63 = vunpack.i.l.bf16 %v2285_v60  ;;  %v2287_v0 = vunpack.i.h.bf16 %v2285_v60  ;;  %v2346_v60 = vld [vmem:[%s3896_s18] ss:$0 sm:$0xff] }
 0x494   :  { %v2275_v54 = vpop.permute.xlu1 %2274 }
 0x495   :  { %v2276_v55 = vunpack.i.l.bf16 %v2275_v54  ;;  %v2277_v58 = vunpack.i.h.bf16 %v2275_v54 }
 0x497   :  { %791 = vmatpush.msrb.mxu0 %v2276_v55  ;;  %2242 = vmatpush.msra.mxu1 %v2276_v55  ;;  %v2300_v20 = vpop.permute.xlu0 %2299 }
 0x498   :  { %v2301_v18 = vunpack.i.l.bf16 %v2300_v20  ;;  %v2302_v22 = vunpack.i.h.bf16 %v2300_v20 }
 0x499   :  { %792 = vmatpush.msrb.mxu0 %v2277_v58  ;;  %2243 = vmatpush.msra.mxu1 %v2277_v58 }
 0x49b   :  { %793 = vmatpush.msrb.mxu0 %v2281_v59  ;;  %2244 = vmatpush.msra.mxu1 %v2281_v59 }
 0x49c   :  { %v2295_v2 = vpop.permute.xlu1 %2294 }
 0x49d   :  { %794 = vmatpush.msrb.mxu0 %v2282_v61  ;;  %2245 = vmatpush.msra.mxu1 %v2282_v61  ;;  %v2296_v5 = vunpack.i.l.bf16 %v2295_v2  ;;  %v2297_v17 = vunpack.i.h.bf16 %v2295_v2 }
 0x49f   :  { %795 = vmatpush.msrb.mxu0 %v2286_v63  ;;  %2246 = vmatpush.msra.mxu1 %v2286_v63 }
 0x4a1   :  { %796 = vmatpush.msrb.mxu0 %v2287_v0  ;;  %2247 = vmatpush.msra.mxu1 %v2287_v0 }
 0x4a3   :  { %797 = vmatpush.msrb.mxu0 %v2291_v1  ;;  %2248 = vmatpush.msra.mxu1 %v2291_v1 }
 0x4a5   :  { %798 = vmatpush.msrb.mxu0 %v2292_v4  ;;  %2249 = vmatpush.msra.mxu1 %v2292_v4 }
 0x4a7   :  { %799 = vmatpush.msrb.mxu0 %v2296_v5  ;;  %2250 = vmatpush.msra.mxu1 %v2296_v5 }
 0x4a9   :  { %800 = vmatpush.msrb.mxu0 %v2297_v17  ;;  %2251 = vmatpush.msra.mxu1 %v2297_v17 }
 0x4ab   :  { %801 = vmatpush.msrb.mxu0 %v2301_v18  ;;  %2252 = vmatpush.msra.mxu1 %v2301_v18 }
 0x4ad   :  { %802 = vmatpush.msrb.mxu0 %v2302_v22  ;;  %2253 = vmatpush.msra.mxu1 %v2302_v22 }
 0x4af   :  { %848 = vmatpush.msrb.mxu1 %v819_v27 }
 0x4b1   :  { %849 = vmatpush.msrb.mxu1 %v818_v28 }
 0x4b3   :  { %850 = vmatpush.msrb.mxu1 %v817_v30 }
 0x4ed   :  { %v711_v23 = vpop.f32.mrf.mxu1 }
 0x4ee   :  { %2374 = vrcp.f32 %v711_v23 }
 0x4f4   :  { %v2375_v32 = vpop.eup %2374 }
 0x4f5   :  { %v714_v3 = vpop.f32.mrf.mxu1  ;;  %v727_v35 = vmul.f32 %v2375_v32, %v3141_v34 }
 0x4f6   :  { %2376 = vrcp.f32 %v714_v3 }
 0x4f7   :  { %v731_v37 = vmul.f32 %v727_v35, %v128_v33 }
 0x4f9   :  { %735 = vst [vmem:[%s3903_s25] sm:$0xff] %v731_v37  ;;  %803 = vmatmul.f32.vlgmr.msrb.gmra.mxu0 %v731_v37 }
 0x4fc   :  { %v2377_v38 = vpop.eup %2376 }
 0x4fd   :  { %v728_v42 = vmul.f32 %v2377_v38, %v3145_v39  ;;  %v717_v43 = vpop.f32.mrf.mxu1 }
 0x4fe   :  { %2378 = vrcp.f32 %v717_v43 }
 0x4ff   :  { %v732_v44 = vmul.f32 %v728_v42, %v129_v8 }
 0x501   :  { %736 = vst [vmem:[%s3903_s25 + $0x8] sm:$0xff] %v732_v44  ;;  %806 = vmatmul.f32.vlgmr.msra.gmra.mxu1 %v732_v44 }
 0x504   :  { %v2379_v34 = vpop.eup %2378 }
 0x505   :  { %v720_v47 = vpop.f32.mrf.mxu1  ;;  %v729_v50 = vmul.f32 %v2379_v34, %v3149_v46  ;;  %v816_v46 = vld [vmem:[%s3895_s17] sm:$0xff] }
 0x506   :  { %2380 = vrcp.f32 %v720_v47  ;;  %851 = vmatpush.msrb.mxu1 %v816_v46  ;;  %v967_v46 = vld [vmem:[%s3897_s19] sm:$0xff] }
 0x507   :  { %v733_v51 = vmul.f32 %v729_v50, %v130_v45 }
 0x509   :  { %737 = vst [vmem:[%s3903_s25 + $0x10] sm:$0xff] %v733_v51  ;;  %809 = vmatmul.f32.gmra.mxu1 %v733_v51 }
 0x50c   :  { %v2381_v39 = vpop.eup %2380 }
 0x50d   :  { %v730_v53 = vmul.f32 %v2381_v39, %v3152_v48 }
 0x50f   :  { %v734_v54 = vmul.f32 %v730_v53, %v131_v52  ;;  %v970_v52 = vld [vmem:[%s3897_s19 + $0x18] sm:$0xff]  ;;  %v969_v53 = vld [vmem:[%s3897_s19 + $0x10] sm:$0xff] }
 0x510   :  { %999 = vmatpush.msra.mxu0 %v970_v52 }
 0x511   :  { %738 = vst [vmem:[%s3903_s25 + $0x18] sm:$0xff] %v734_v54  ;;  %812 = vmatmul.f32.gmra.mxu1 %v734_v54  ;;  %v968_v54 = vld [vmem:[%s3897_s19 + $0x8] sm:$0xff] }
 0x512   :  { %1000 = vmatpush.msra.mxu0 %v969_v53  ;;  %v1059_v53 = vld [vmem:[%s3899_s21 + $0x38] sm:$0xff] }
 0x513   :  { %1084 = vmatpush.msra.mxu2 %v1059_v53 }
 0x514   :  { %1001 = vmatpush.msra.mxu0 %v968_v54 }
 0x516   :  { %1002 = vmatpush.msra.mxu0 %v967_v46 }
 0x576   :  { %v804_v55 = vpop.f32.mrf.mxu0 }
 0x577   :  { %2134 = vmatmul.msk.f32.vlgmr.msrb.gmra.mxu1 %vm234_vm4, %v804_v55 }
 0x57e   :  { %v807_v58 = vpop.f32.mrf.mxu1 }
 0x57f   :  { %2135 = vmatmul.msk.f32.gmra.mxu1 %vm234_vm4, %v807_v58 }
 0x586   :  { %v810_v59 = vpop.f32.mrf.mxu1 }
 0x587   :  { %2136 = vmatmul.msk.f32.gmra.mxu1 %vm234_vm4, %v810_v59 }
 0x58e   :  { %v813_v48 = vpop.f32.mrf.mxu1 }
 0x58f   :  { %2137 = vmatmul.msk.f32.gmra.mxu1 %vm234_vm4, %v813_v48 }
 0x5f4   :  { %v853_v61 = vpop.f32.mrf.mxu1 }
 0x5f5   :  { %v854_v63 = vadd.f32 %v2346_v60, %v853_v61 }
 0x5f7   :  { %v3203_v56 = vadd.f32 %v854_v63, %v2712_v26 }
 0x5f9   :  { %v869_v0 = vsel %vm234_vm4, %v3203_v56, 0.0 }
 0x5fa   :  { %870 = vadd.xlane.f32.xlu2 %v869_v0 }
 0x5fc   :  { %v856_v1 = vpop.f32.mrf.mxu1 }
 0x5fd   :  { %v857_v2 = vadd.f32 %v2346_v60, %v856_v1 }
 0x5ff   :  { %v3208_v4 = vadd.f32 %v857_v2, %v2719_v31 }
 0x601   :  { %v872_v5 = vsel %vm234_vm4, %v3208_v4, 0.0 }
 0x602   :  { %873 = vadd.xlane.f32.xlu1 %v872_v5 }
 0x604   :  { %v859_v20 = vpop.f32.mrf.mxu1 }
 0x605   :  { %v860_v17 = vadd.f32 %v2346_v60, %v859_v20 }
 0x607   :  { %v3213_v18 = vadd.f32 %v860_v17, %v2726_v36 }
 0x609   :  { %v875_v26 = vsel %vm234_vm4, %v3213_v18, 0.0 }
 0x60a   :  { %876 = vadd.xlane.f32.xlu0 %v875_v26 }
 0x60c   :  { %v862_v22 = vpop.f32.mrf.mxu1 }
 0x60d   :  { %v863_v23 = vadd.f32 %v2346_v60, %v862_v22 }
 0x60f   :  { %v3218_v27 = vadd.f32 %v863_v23, %v2733_v41 }
 0x611   :  { %v878_v31 = vsel %vm234_vm4, %v3218_v27, 0.0 }
 0x612   :  { %879 = vadd.xlane.f32.xlu2 %v878_v31 }
 0x66d   :  { %v871_v28 = vpop.xlane.xlu2 %870 }
 0x66e   :  { %v881_v30 = vmul.f32 %v871_v28, %v2737_v49  ;;  %v957_v28 = vperm.slane %v2796_v29, 4 }
 0x670   :  { %v885_v32 = vsub.f32 %v3203_v56, %v881_v30  ;;  %v2159_v30 = vld [vmem:[%s3893_s15 + $0x38] sm:$0xff] }
 0x671   :  { %1289 = vmatpush.msrb.mxu0 %v2159_v30  ;;  %v3288_v30 = vld [vmem:[%s3890_s12 + $0x8] sm:$0x3f] }
 0x672   :  { %v889_v36 = vmul.f32 %v885_v32, %v885_v32 }
 0x674   :  { %v893_v33 = vsel %vm234_vm4, %v889_v36, 0.0  ;;  %v2158_v36 = vld [vmem:[%s3893_s15 + $0x30] sm:$0xff] }
 0x675   :  { %v874_v3 = vpop.xlane.xlu1 %873  ;;  %894 = vadd.xlane.f32.xlu1 %v893_v33  ;;  %1290 = vmatpush.msrb.mxu0 %v2158_v36 }
 0x676   :  { %v882_v35 = vmul.f32 %v874_v3, %v2737_v49 }
 0x678   :  { %v3227_v37 = vsub.f32 %v3208_v4, %v882_v35 }
 0x67a   :  { %v890_v41 = vmul.f32 %v3227_v37, %v3227_v37 }
 0x67c   :  { %v896_v38 = vsel %vm234_vm4, %v890_v41, 0.0  ;;  %v962_v41 = vperm.slane %v2796_v29, 5 }
 0x67d   :  { %v877_v8 = vpop.xlane.xlu0 %876  ;;  %897 = vadd.xlane.f32.xlu0 %v896_v38  ;;  %v2157_v38 = vld [vmem:[%s3893_s15 + $0x28] sm:$0xff] }
 0x67e   :  { %v883_v42 = vmul.f32 %v877_v8, %v2737_v49  ;;  %1291 = vmatpush.msrb.mxu0 %v2157_v38 }
 0x680   :  { %v3234_v43 = vsub.f32 %v3213_v18, %v883_v42 }
 0x682   :  { %v891_v44 = vmul.f32 %v3234_v43, %v3234_v43 }
 0x684   :  { %v899_v34 = vsel %vm234_vm4, %v891_v44, 0.0 }
 0x685   :  { %900 = vadd.xlane.f32.xlu2 %v899_v34  ;;  %v880_v45 = vpop.xlane.xlu2 %879 }
 0x686   :  { %v884_v47 = vmul.f32 %v880_v45, %v2737_v49  ;;  %v2156_v45 = vld [vmem:[%s3893_s15 + $0x20] sm:$0xff] }
 0x687   :  { %1292 = vmatpush.msrb.mxu0 %v2156_v45 }
 0x688   :  { %v3241_v50 = vsub.f32 %v3218_v27, %v884_v47 }
 0x68a   :  { %v892_v51 = vmul.f32 %v3241_v50, %v3241_v50 }
 0x68c   :  { %v902_v39 = vsel %vm234_vm4, %v892_v51, 0.0 }
 0x68d   :  { %903 = vadd.xlane.f32.xlu1 %v902_v39 }
 0x6e8   :  { %v895_v55 = vpop.xlane.xlu1 %894 }
 0x6e9   :  { %v905_v58 = vmul.f32 %v895_v55, %v2737_v49 }
 0x6eb   :  { %v909_v59 = vadd.f32 1e-06, %v905_v58 }
 0x6ed   :  { %2382 = vrsqrt.f32 %v909_v59  ;;  %vm919_vm10 = vweird.f32 %v909_v59 }
 0x6f0   :  { %v898_v48 = vpop.xlane.xlu0 %897 }
 0x6f1   :  { %v906_v60 = vmul.f32 %v898_v48, %v2737_v49 }
 0x6f3   :  { %v2383_v61 = vpop.eup %2382  ;;  %v910_v63 = vadd.f32 1e-06, %v906_v60 }
 0x6f4   :  { %v914_v0 = vmul.f32 %v2383_v61, %v909_v59  ;;  %vm920_vm9 = vweird.f32 %v2383_v61 }
 0x6f5   :  { %2384 = vrsqrt.f32 %v910_v63  ;;  %vm921_vm11 = vmor %vm919_vm10, %vm920_vm9  ;;  %vm929_vm13 = vweird.f32 %v910_v63 }
 0x6f6   :  { %v915_v1 = vmul.f32 %v2383_v61, %v914_v0 }
 0x6f8   :  { %v916_v2 = vmul.f32 0.5, %v915_v1  ;;  %v901_v5 = vpop.xlane.xlu2 %900 }
 0x6f9   :  { %v907_v20 = vmul.f32 %v901_v5, %v2737_v49 }
 0x6fa   :  { %v917_v17 = vsub.f32 1.5, %v916_v2 }
 0x6fb   :  { %v2385_v26 = vpop.eup %2384  ;;  %v911_v22 = vadd.f32 1e-06, %v907_v20 }
 0x6fc   :  { %v918_v23 = vmul.f32 %v2383_v61, %v917_v17  ;;  %v924_v31 = vmul.f32 %v2385_v26, %v910_v63  ;;  %vm930_vm12 = vweird.f32 %v2385_v26 }
 0x6fd   :  { %2386 = vrsqrt.f32 %v911_v22  ;;  %vm931_vm14 = vmor %vm929_vm13, %vm930_vm12  ;;  %vm939_vm0 = vweird.f32 %v911_v22 }
 0x6fe   :  { %v922_v33 = vsel %vm921_vm11, %v2383_v61, %v918_v23  ;;  %v925_v3 = vmul.f32 %v2385_v26, %v924_v31 }
 0x6ff   :  { %v953_v35 = vmul.f32 %v922_v33, %v885_v32 }
 0x700   :  { %v926_v8 = vmul.f32 0.5, %v925_v3  ;;  %v904_v42 = vpop.xlane.xlu1 %903 }
 0x701   :  { %v958_v44 = vmul.f32 %v957_v28, %v953_v35  ;;  %v908_v34 = vmul.f32 %v904_v42, %v2737_v49  ;;  %v1262_v35 = vperm.slane %v3288_v30, 3  ;;  %v1053_v42 = vld [vmem:[%s3899_s21 + $0x8] sm:$0xff] }
 0x702   :  { %v927_v47 = vsub.f32 1.5, %v926_v8  ;;  %v1054_v8 = vld [vmem:[%s3899_s21 + $0x10] sm:$0xff] }
 0x703   :  { %v2387_v32 = vpop.eup %2386  ;;  %v912_v51 = vadd.f32 1e-06, %v908_v34  ;;  %v963_v29 = vadd.f32 %v962_v41, %v958_v44  ;;  %v1052_v44 = vld [vmem:[%s3899_s21] sm:$0xff] }
 0x704   :  { %v928_v39 = vmul.f32 %v2385_v26, %v927_v47  ;;  %v934_v52 = vmul.f32 %v2387_v32, %v911_v22  ;;  %vm940_vm15 = vweird.f32 %v2387_v32  ;;  %v2347_v34 = vld [vmem:[%s3898_s20] ss:$0 sm:$0xff] }
 0x705   :  { %2388 = vrsqrt.f32 %v912_v51  ;;  %2138 = vmatmul.msk.f32.vlgmr.msra.gmra.mxu0 %vm234_vm4, %v963_v29  ;;  %vm941_vm1 = vmor %vm939_vm0, %vm940_vm15  ;;  %vm949_vm5 = vweird.f32 %v912_v51 }
 0x706   :  { %v932_v54 = vsel %vm931_vm14, %v2385_v26, %v928_v39  ;;  %v935_v46 = vmul.f32 %v2387_v32, %v934_v52 }
 0x707   :  { %v954_v55 = vmul.f32 %v932_v54, %v3227_v37 }
 0x708   :  { %v936_v58 = vmul.f32 0.5, %v935_v46 }
 0x709   :  { %v959_v59 = vmul.f32 %v957_v28, %v954_v55 }
 0x70a   :  { %v937_v48 = vsub.f32 1.5, %v936_v58 }
 0x70b   :  { %v2389_v60 = vpop.eup %2388  ;;  %v964_v61 = vadd.f32 %v962_v41, %v959_v59 }
 0x70c   :  { %v938_v63 = vmul.f32 %v2387_v32, %v937_v48  ;;  %v944_v0 = vmul.f32 %v2389_v60, %v912_v51  ;;  %vm950_vm3 = vweird.f32 %v2389_v60 }
 0x70d   :  { %2139 = vmatmul.msk.f32.gmra.mxu0 %vm234_vm4, %v964_v61  ;;  %vm951_vm6 = vmor %vm949_vm5, %vm950_vm3 }
 0x70e   :  { %v942_v1 = vsel %vm941_vm1, %v2387_v32, %v938_v63  ;;  %v945_v2 = vmul.f32 %v2389_v60, %v944_v0 }
 0x70f   :  { %v955_v5 = vmul.f32 %v942_v1, %v3234_v43  ;;  %v1260_v43 = vperm.slane %v3288_v30, 2 }
 0x710   :  { %v946_v20 = vmul.f32 0.5, %v945_v2 }
 0x711   :  { %v960_v17 = vmul.f32 %v957_v28, %v955_v5  ;;  %v1261_v3 = vmul.f32 %v1260_v43, %v2801_v40  ;;  %v1055_v40 = vld [vmem:[%s3899_s21 + $0x18] sm:$0xff]  ;;  %v2447_v43 = vld [vmem:[%s3928_s7 + $0x8] sm:$0xff] }
 0x712   :  { %v947_v26 = vsub.f32 1.5, %v946_v20 }
 0x713   :  { %v965_v37 = vadd.f32 %v962_v41, %v960_v17  ;;  %v1263_v38 = vadd.f32 %v1262_v35, %v1261_v3 }
 0x714   :  { %v948_v23 = vmul.f32 %v2389_v60, %v947_v26 }
 0x715   :  { %2140 = vmatmul.msk.f32.gmra.mxu0 %vm234_vm4, %v965_v37  ;;  %v2446_v37 = vld [vmem:[%s3928_s7] sm:$0xff] }
 0x716   :  { %v952_v31 = vsel %vm951_vm6, %v2389_v60, %v948_v23 }
 0x717   :  { %v956_v22 = vmul.f32 %v952_v31, %v3241_v50  ;;  %v1058_v50 = vld [vmem:[%s3899_s21 + $0x30] sm:$0xff] }
 0x718   :  { %1085 = vmatpush.msra.mxu2 %v1058_v50  ;;  %v2449_v50 = vld [vmem:[%s3928_s7 + $0x18] sm:$0xff] }
 0x719   :  { %v961_v36 = vmul.f32 %v957_v28, %v956_v22  ;;  %v1057_v28 = vld [vmem:[%s3899_s21 + $0x28] sm:$0xff] }
 0x71a   :  { %1086 = vmatpush.msra.mxu2 %v1057_v28  ;;  %v2450_v28 = vld [vmem:[%s3928_s7 + $0x20] sm:$0xff] }
 0x71b   :  { %v966_v33 = vadd.f32 %v962_v41, %v961_v36  ;;  %v1056_v41 = vld [vmem:[%s3899_s21 + $0x20] sm:$0xff] }
 0x71c   :  { %1087 = vmatpush.msra.mxu2 %v1056_v41  ;;  %v2451_v41 = vld [vmem:[%s3928_s7 + $0x28] sm:$0xff] }
 0x71d   :  { %2141 = vmatmul.msk.f32.gmra.mxu0 %vm234_vm4, %v966_v33 }
 0x71e   :  { %1088 = vmatpush.msra.mxu2 %v1055_v40  ;;  %v2452_v40 = vld [vmem:[%s3928_s7 + $0x30] sm:$0xff] }
 0x720   :  { %1089 = vmatpush.msra.mxu2 %v1054_v8  ;;  %v2453_v8 = vld [vmem:[%s3928_s7 + $0x38] sm:$0xff] }
 0x722   :  { %1090 = vmatpush.msra.mxu2 %v1053_v42  ;;  %v2454_v42 = vld [vmem:[%s3928_s7 + $0x40] sm:$0xff] }
 0x724   :  { %1091 = vmatpush.msra.mxu2 %v1052_v44  ;;  %v2455_v44 = vld [vmem:[%s3928_s7 + $0x48] sm:$0xff] }
 0x725   :  { %2161 = vmatmul.msk.f32.vlgmr.msrb.gmra.mxu0 %vm234_vm4, %v1263_v38  ;;  %v2448_v38 = vld [vmem:[%s3928_s7 + $0x10] sm:$0xff] }
 0x726   :  { %1494 = vmatpush.msrb.mxu2 %v3023_v6 }
 0x728   :  { %1495 = vmatpush.msrb.mxu2 %v3028_v7 }
 0x72a   :  { %1496 = vmatpush.msrb.mxu2 %v3034_v9 }
 0x72c   :  { %1497 = vmatpush.msrb.mxu2 %v3040_v12 }
 0x72e   :  { %1498 = vmatpush.msrb.mxu2 %v3046_v13 }
 0x730   :  { %1499 = vmatpush.msrb.mxu2 %v3056_v14 }
 0x732   :  { %1500 = vmatpush.msrb.mxu2 %v3062_v15 }
 0x734   :  { %1501 = vmatpush.msrb.mxu2 %v3072_v19 }
 0x736   :  { %1502 = vmatpush.msrb.mxu2 %v3080_v21 }
 0x738   :  { %1503 = vmatpush.msrb.mxu2 %v3087_v16 }
 0x73a   :  { %1504 = vmatpush.msrb.mxu2 %v3108_v24 }
 0x73c   :  { %1505 = vmatpush.msrb.mxu2 %v3114_v10 }
 0x73e   :  { %1506 = vmatpush.msrb.mxu2 %v3120_v11 }
 0x740   :  { %1507 = vmatpush.msrb.mxu2 %v3126_v57 }
 0x742   :  { %1508 = vmatpush.msrb.mxu2 %v3132_v62  ;;  %v2348_v62 = vld [vmem:[%s3894_s16 + $0x1] ss:$0 sm:$0xff] }
 0x744   :  { %1509 = vmatpush.msrb.mxu2 %v3138_v25 }
 0x782   :  { %v1004_v45 = vpop.f32.mrf.mxu0 }
 0x783   :  { %v1005_v47 = vadd.f32 %v2347_v34, %v1004_v45  ;;  %v2457_v45 = vld [vmem:[%s3928_s7 + $0x58] sm:$0xff] }
 0x785   :  { %v1020_v32 = vmul.f32 0.044715, %v1005_v47  ;;  %v1016_v16 = vmul.f32 0.5, %v1005_v47 }
 0x787   :  { %v1024_v6 = vmul.f32 %v1020_v32, %v1005_v47  ;;  %v2459_v32 = vld [vmem:[%s3928_s7 + $0x68] sm:$0xff] }
 0x789   :  { %v1028_v7 = vmul.f32 %v1024_v6, %v1005_v47  ;;  %v2460_v6 = vld [vmem:[%s3928_s7 + $0x70] sm:$0xff] }
 0x78a   :  { %v1007_v9 = vpop.f32.mrf.mxu0 }
 0x78b   :  { %v1032_v51 = vadd.f32 %v1028_v7, %v1005_v47  ;;  %v1008_v29 = vadd.f32 %v2347_v34, %v1007_v9  ;;  %v2458_v47 = vld [vmem:[%s3928_s7 + $0x60] sm:$0xff] }
 0x78c   :  { %v2349_v7 = vld [vmem:[%s3900_s22] ss:$0 sm:$0xff] }
 0x78d   :  { %v1036_v12 = vmul.f32 0.7978846, %v1032_v51  ;;  %v1021_v39 = vmul.f32 0.044715, %v1008_v29  ;;  %v1017_v61 = vmul.f32 0.5, %v1008_v29 }
 0x78f   :  { %2390 = vtanh.f32 %v1036_v12  ;;  %v1025_v13 = vmul.f32 %v1021_v39, %v1008_v29 }
 0x791   :  { %v1029_v14 = vmul.f32 %v1025_v13, %v1008_v29 }
 0x792   :  { %v1010_v15 = vpop.f32.mrf.mxu0 }
 0x793   :  { %v1011_v19 = vadd.f32 %v2347_v34, %v1010_v15  ;;  %v1033_v52 = vadd.f32 %v1029_v14, %v1008_v29  ;;  %v2461_v29 = vld [vmem:[%s3928_s7 + $0x78] sm:$0xff] }
 0x795   :  { %v2391_v21 = vpop.eup %2390  ;;  %v1022_v53 = vmul.f32 0.044715, %v1011_v19  ;;  %v1037_v54 = vmul.f32 0.7978846, %v1033_v52  ;;  %v1018_v23 = vmul.f32 0.5, %v1011_v19 }
 0x796   :  { %v1044_v46 = vadd.f32 1.0, %v2391_v21 }
 0x797   :  { %2392 = vtanh.f32 %v1037_v54  ;;  %v1026_v24 = vmul.f32 %v1022_v53, %v1011_v19 }
 0x798   :  { %v1048_v55 = vmul.f32 %v1044_v46, %v1016_v16 }
 0x799   :  { %v1030_v10 = vmul.f32 %v1026_v24, %v1011_v19 }
 0x79a   :  { %v1013_v58 = vpop.f32.mrf.mxu0  ;;  %2142 = vmatmul.msk.f32.vlgmr.msra.gmra.mxu2 %vm148_vm2, %v1048_v55 }
 0x79b   :  { %v1014_v11 = vadd.f32 %v2347_v34, %v1013_v58  ;;  %v1034_v59 = vadd.f32 %v1030_v10, %v1011_v19  ;;  %v2456_v34 = vld [vmem:[%s3928_s7 + $0x50] sm:$0xff] }
 0x79d   :  { %v2393_v48 = vpop.eup %2392  ;;  %v1023_v57 = vmul.f32 0.044715, %v1014_v11  ;;  %v1038_v60 = vmul.f32 0.7978846, %v1034_v59  ;;  %v1019_v33 = vmul.f32 0.5, %v1014_v11 }
 0x79e   :  { %v1045_v63 = vadd.f32 1.0, %v2393_v48 }
 0x79f   :  { %2394 = vtanh.f32 %v1038_v60  ;;  %v1027_v0 = vmul.f32 %v1023_v57, %v1014_v11 }
 0x7a0   :  { %v1049_v1 = vmul.f32 %v1045_v63, %v1017_v61 }
 0x7a1   :  { %v1031_v2 = vmul.f32 %v1027_v0, %v1014_v11  ;;  %v2463_v0 = vld [vmem:[%s3929_s4 + $0x58] sm:$0xff] }
 0x7a2   :  { %2143 = vmatmul.msk.f32.gmra.mxu2 %vm148_vm2, %v1049_v1  ;;  %v1294_v25 = vpop.f32.mrf.mxu0 }
 0x7a3   :  { %v1295_v5 = vadd.f32 %v2348_v62, %v1294_v25  ;;  %v1035_v20 = vadd.f32 %v1031_v2, %v1014_v11 }
 0x7a5   :  { %v2395_v17 = vpop.eup %2394  ;;  %2162 = vmatpush.msk.msra.mxu0 %vm496_vm7, %v1295_v5  ;;  %v1039_v26 = vmul.f32 0.7978846, %v1035_v20  ;;  %v2464_v20 = vld [vmem:[%s3929_s4 + $0x60] sm:$0xff] }
 0x7a6   :  { %2163 = vmatmul.msk.f32.vlgmr.msra.gmra.mxu0 %vm447_vm8, %v2446_v37  ;;  %v1046_v31 = vadd.f32 1.0, %v2395_v17 }
 0x7a7   :  { %2396 = vtanh.f32 %v1039_v26  ;;  %v2465_v26 = vld [vmem:[%s3929_s4 + $0x68] sm:$0xff] }
 0x7a8   :  { %v1050_v22 = vmul.f32 %v1046_v31, %v1018_v23 }
 0x7aa   :  { %2144 = vmatmul.msk.f32.gmra.mxu2 %vm148_vm2, %v1050_v22 }
 0x7ad   :  { %v2397_v36 = vpop.eup %2396 }
 0x7ae   :  { %2164 = vmatmul.msk.f32.gmra.mxu0 %vm447_vm8, %v2447_v43  ;;  %v1047_v3 = vadd.f32 1.0, %v2397_v36 }
 0x7b0   :  { %v1051_v35 = vmul.f32 %v1047_v3, %v1019_v33 }
 0x7b2   :  { %2145 = vmatmul.msk.f32.gmra.mxu2 %vm148_vm2, %v1051_v35  ;;  %v2466_v35 = vld [vmem:[%s3929_s4 + $0x70] sm:$0xff] }
 0x7b6   :  { %2165 = vmatmul.msk.f32.gmra.mxu0 %vm447_vm8, %v2448_v38 }
 0x7be   :  { %2166 = vmatmul.msk.f32.gmra.mxu0 %vm447_vm8, %v2449_v50  ;;  %v2467_v50 = vld [vmem:[%s3929_s4 + $0x78] sm:$0xff] }
 0x7c6   :  { %2167 = vmatmul.msk.f32.gmra.mxu0 %vm447_vm8, %v2450_v28 }
 0x7ce   :  { %2168 = vmatmul.msk.f32.gmra.mxu0 %vm447_vm8, %v2451_v41 }
 0x7d6   :  { %2169 = vmatmul.msk.f32.gmra.mxu0 %vm447_vm8, %v2452_v40 }
 0x7de   :  { %2170 = vmatmul.msk.f32.gmra.mxu0 %vm447_vm8, %v2453_v8 }
 0x7e6   :  { %2171 = vmatmul.msk.f32.gmra.mxu0 %vm447_vm8, %v2454_v42 }
 0x7ee   :  { %2172 = vmatmul.msk.f32.gmra.mxu0 %vm447_vm8, %v2455_v44 }
 0x7f6   :  { %2173 = vmatmul.msk.f32.gmra.mxu0 %vm447_vm8, %v2456_v34 }
 0x7fe   :  { %2174 = vmatmul.msk.f32.gmra.mxu0 %vm447_vm8, %v2457_v45 }
 0x806   :  { %2175 = vmatmul.msk.f32.gmra.mxu0 %vm447_vm8, %v2458_v47 }
 0x80e   :  { %2176 = vmatmul.msk.f32.gmra.mxu0 %vm447_vm8, %v2459_v32 }
 0x816   :  { %2177 = vmatmul.msk.f32.gmra.mxu0 %vm447_vm8, %v2460_v6 }
 0x81d   :  { %v1093_v9 = vpop.f32.mrf.mxu2 }
 0x81e   :  { %v1094_v51 = vadd.f32 %v2349_v7, %v1093_v9  ;;  %2178 = vmatmul.msk.f32.gmra.mxu0 %vm447_vm8, %v2461_v29 }
 0x820   :  { %v3411_v12 = vadd.f32 %v1094_v51, %v3203_v56 }
 0x822   :  { %v1111_v39 = vsel %vm234_vm4, %v3411_v12, 0.0 }
 0x823   :  { %1112 = vadd.xlane.f32.xlu0 %v1111_v39  ;;  %v3415_v13 = vpop.f32.mrf.mxu0 }
 0x825   :  { %v1096_v14 = vpop.f32.mrf.mxu2 }
 0x826   :  { %v1097_v15 = vadd.f32 %v2349_v7, %v1096_v14  ;;  %v2468_v14 = vld [vmem:[%s3929_s4 + $0x48] sm:$0xff] }
 0x828   :  { %v3418_v19 = vadd.f32 %v1097_v15, %v3208_v4 }
 0x82a   :  { %v1114_v52 = vsel %vm234_vm4, %v3418_v19, 0.0 }
 0x82b   :  { %1115 = vadd.xlane.f32.xlu2 %v1114_v52  ;;  %v3422_v21 = vpop.f32.mrf.mxu0 }
 0x82d   :  { %v1099_v53 = vpop.f32.mrf.mxu2 }
 0x82e   :  { %v1100_v56 = vadd.f32 %v2349_v7, %v1099_v53 }
 0x830   :  { %v3425_v54 = vadd.f32 %v1100_v56, %v3213_v18  ;;  %v2469_v56 = vld [vmem:[%s3929_s4 + $0x40] sm:$0xff] }
 0x832   :  { %v1117_v16 = vsel %vm234_vm4, %v3425_v54, 0.0 }
 0x833   :  { %v3429_v46 = vpop.f32.mrf.mxu0  ;;  %1118 = vadd.xlane.f32.xlu1 %v1117_v16 }
 0x835   :  { %v1102_v24 = vpop.f32.mrf.mxu2 }
 0x836   :  { %v1103_v4 = vadd.f32 %v2349_v7, %v1102_v24  ;;  %v2470_v24 = vld [vmem:[%s3929_s4 + $0x38] sm:$0xff] }
 0x838   :  { %v3432_v55 = vadd.f32 %v1103_v4, %v3218_v27  ;;  %v2462_v27 = vld [vmem:[%s3929_s4 + $0x50] sm:$0xff] }
 0x83a   :  { %v1120_v10 = vsel %vm234_vm4, %v3432_v55, 0.0 }
 0x83b   :  { %v3436_v58 = vpop.f32.mrf.mxu0  ;;  %1121 = vadd.xlane.f32.xlu0 %v1120_v10  ;;  %v2471_v10 = vld [vmem:[%s3929_s4 + $0x30] sm:$0xff] }
 0x843   :  { %v3438_v11 = vpop.f32.mrf.mxu0 }
 0x84b   :  { %v3440_v18 = vpop.f32.mrf.mxu0 }
 0x853   :  { %v3442_v59 = vpop.f32.mrf.mxu0 }
 0x85b   :  { %v1338_v48 = vpop.f32.mrf.mxu0 }
 0x85c   :  { %v3535_v4 = vmul.f32 %v2470_v24, %v1338_v48 }
 0x863   :  { %v1341_v57 = vpop.f32.mrf.mxu0 }
 0x864   :  { %v3528_v16 = vmul.f32 %v2469_v56, %v1341_v57  ;;  %v3543_v57 = vmul.f32 %v2471_v10, %v3442_v59 }
 0x86b   :  { %v1344_v60 = vpop.f32.mrf.mxu0 }
 0x86c   :  { %v3518_v15 = vmul.f32 %v2468_v14, %v1344_v60  ;;  %v2472_v60 = vld [vmem:[%s3929_s4 + $0x28] sm:$0xff] }
 0x86d   :  { %v3551_v48 = vmul.f32 %v2472_v60, %v3440_v18 }
 0x873   :  { %v1347_v61 = vpop.f32.mrf.mxu0 }
 0x874   :  { %v3447_v62 = vmul.f32 %v2462_v27, %v1347_v61  ;;  %v2473_v61 = vld [vmem:[%s3929_s4 + $0x20] sm:$0xff]  ;;  %v2475_v27 = vld [vmem:[%s3929_s4 + $0x10] sm:$0xff] }
 0x875   :  { %v3559_v59 = vmul.f32 %v2473_v61, %v3438_v11  ;;  %v3575_v11 = vmul.f32 %v2475_v27, %v3429_v46 }
 0x87b   :  { %v1350_v63 = vpop.f32.mrf.mxu0 }
 0x87c   :  { %v3452_v1 = vmul.f32 %v2463_v0, %v1350_v63  ;;  %v2474_v63 = vld [vmem:[%s3929_s4 + $0x18] sm:$0xff]  ;;  %v2476_v0 = vld [vmem:[%s3929_s4 + $0x8] sm:$0xff] }
 0x87d   :  { %v3567_v18 = vmul.f32 %v2474_v63, %v3436_v58  ;;  %v3583_v58 = vmul.f32 %v2476_v0, %v3422_v21  ;;  %v2150_v21 = vld [vmem:[%s3891_s13 + $0x38] sm:$0xff] }
 0x87e   :  { %v2313_v2 = vpack.i.bf16 %v3447_v62, %v3452_v1  ;;  %1243 = vmatpush.msra.mxu1 %v2150_v21 }
 0x883   :  { %v1353_v25 = vpop.f32.mrf.mxu0 }
 0x884   :  { %v3459_v17 = vmul.f32 %v2464_v20, %v1353_v25  ;;  %v2477_v25 = vld [vmem:[%s3929_s4] sm:$0xff] }
 0x885   :  { %v3591_v46 = vmul.f32 %v2477_v25, %v3415_v13  ;;  %v2148_v13 = vld [vmem:[%s3891_s13 + $0x28] sm:$0xff]  ;;  %v2147_v20 = vld [vmem:[%s3891_s13 + $0x20] sm:$0xff] }
 0x88b   :  { %v1356_v5 = vpop.f32.mrf.mxu0 }
 0x88c   :  { %v3464_v37 = vmul.f32 %v2465_v26, %v1356_v5  ;;  %v2149_v5 = vld [vmem:[%s3891_s13 + $0x30] sm:$0xff]  ;;  %s2513_s13 = smov 8  }
 0x88d   :  { %1244 = vmatpush.msra.mxu1 %v2149_v5 }
 0x88e   :  { %v2308_v23 = vpack.i.bf16 %v3459_v17, %v3464_v37 }
 0x88f   :  { %1245 = vmatpush.msra.mxu1 %v2148_v13 }
 0x891   :  { %1246 = vmatpush.msra.mxu1 %v2147_v20 }
 0x893   :  { %v1359_v31 = vpop.f32.mrf.mxu0 }
 0x894   :  { %v3477_v38 = vmul.f32 %v2466_v35, %v1359_v31 }
 0x896   :  { %v1113_v22 = vpop.xlane.xlu0 %1112 }
 0x897   :  { %v1123_v36 = vmul.f32 %v1113_v22, %v2737_v49 }
 0x899   :  { %v3470_v43 = vsub.f32 %v3411_v12, %v1123_v36 }
 0x89b   :  { %v1362_v33 = vpop.f32.mrf.mxu0  ;;  %v1131_v3 = vmul.f32 %v3470_v43, %v3470_v43 }
 0x89c   :  { %v3482_v28 = vmul.f32 %v2467_v50, %v1362_v33 }
 0x89d   :  { %v1135_v41 = vsel %vm234_vm4, %v1131_v3, 0.0 }
 0x89e   :  { %v2303_v40 = vpack.i.bf16 %v3477_v38, %v3482_v28  ;;  %1136 = vadd.xlane.f32.xlu2 %v1135_v41  ;;  %2179 = vmatpush.xpose.msk.msra.mxu3 %vm234_vm4, %v3482_v28  ;;  %v1116_v8 = vpop.xlane.xlu2 %1115 }
 0x89f   :  { %v1124_v42 = vmul.f32 %v1116_v8, %v2737_v49 }
 0x8a1   :  { %v3491_v44 = vsub.f32 %v3418_v19, %v1124_v42 }
 0x8a2   :  { %2180 = vmatpush.xpose.msk.msra.mxu3 %vm234_vm4, %v3477_v38  ;;  %v2338_v38 = vpack.i.bf16 %v3591_v46, %v3583_v58 }
 0x8a3   :  { %v1132_v34 = vmul.f32 %v3491_v44, %v3491_v44 }
 0x8a5   :  { %v1138_v45 = vsel %vm234_vm4, %v1132_v34, 0.0 }
 0x8a6   :  { %2181 = vmatpush.xpose.msk.msra.mxu3 %vm234_vm4, %v3464_v37  ;;  %v1119_v47 = vpop.xlane.xlu1 %1118  ;;  %1139 = vadd.xlane.f32.xlu1 %v1138_v45 }
 0x8a7   :  { %v1125_v32 = vmul.f32 %v1119_v47, %v2737_v49 }
 0x8a9   :  { %v3502_v6 = vsub.f32 %v3425_v54, %v1125_v32 }
 0x8aa   :  { %2182 = vmatpush.xpose.msk.msra.mxu3 %vm234_vm4, %v3459_v17  ;;  %v2333_v17 = vpack.i.bf16 %v3575_v11, %v3567_v18 }
 0x8ab   :  { %v1133_v7 = vmul.f32 %v3502_v6, %v3502_v6 }
 0x8ad   :  { %v1141_v9 = vsel %vm234_vm4, %v1133_v7, 0.0 }
 0x8ae   :  { %2183 = vmatpush.xpose.msk.msra.mxu3 %vm234_vm4, %v3452_v1  ;;  %v1122_v51 = vpop.xlane.xlu0 %1121  ;;  %1142 = vadd.xlane.f32.xlu0 %v1141_v9 }
 0x8af   :  { %v1126_v29 = vmul.f32 %v1122_v51, %v2737_v49  ;;  %v1199_v51 = vperm.slane %v3288_v30, 0 }
 0x8b1   :  { %v3513_v39 = vsub.f32 %v3432_v55, %v1126_v29 }
 0x8b2   :  { %2184 = vmatpush.xpose.msk.msra.mxu3 %vm234_vm4, %v3447_v62 }
 0x8b3   :  { %v1134_v52 = vmul.f32 %v3513_v39, %v3513_v39 }
 0x8b5   :  { %v1144_v53 = vsel %vm234_vm4, %v1134_v52, 0.0 }
 0x8b6   :  { %2185 = vmatpush.xpose.msk.msra.mxu3 %vm234_vm4, %v3518_v15  ;;  %1145 = vadd.xlane.f32.xlu2 %v1144_v53  ;;  %v1204_v53 = vperm.slane %v3288_v30, 1 }
 0x8ba   :  { %2186 = vmatpush.xpose.msk.msra.mxu3 %vm234_vm4, %v3528_v16 }
 0x8be   :  { %2187 = vmatpush.xpose.msk.msra.mxu3 %vm234_vm4, %v3535_v4 }
 0x8c2   :  { %2188 = vmatpush.xpose.msk.msra.mxu3 %vm234_vm4, %v3543_v57 }
 0x8c6   :  { %2189 = vmatpush.xpose.msk.msra.mxu3 %vm234_vm4, %v3551_v48 }
 0x8ca   :  { %2190 = vmatpush.xpose.msk.msra.mxu3 %vm234_vm4, %v3559_v59 }
 0x8ce   :  { %2191 = vmatpush.xpose.msk.msra.mxu3 %vm234_vm4, %v3567_v18 }
 0x8d2   :  { %2192 = vmatpush.xpose.msk.msra.mxu3 %vm234_vm4, %v3575_v11 }
 0x8d6   :  { %2193 = vmatpush.xpose.msk.msra.mxu3 %vm234_vm4, %v3583_v58 }
 0x8da   :  { %2194 = vmatpush.xpose.msk.msra.mxu3 %vm234_vm4, %v3591_v46 }
 0x911   :  { %v1137_v26 = vpop.xlane.xlu2 %1136 }
 0x912   :  { %v1147_v31 = vmul.f32 %v1137_v26, %v2737_v49 }
 0x914   :  { %v1151_v22 = vadd.f32 1e-06, %v1147_v31 }
 0x916   :  { %2398 = vrsqrt.f32 %v1151_v22  ;;  %vm1161_vm8 = vweird.f32 %v1151_v22 }
 0x919   :  { %v1140_v36 = vpop.xlane.xlu1 %1139 }
 0x91a   :  { %v1148_v33 = vmul.f32 %v1140_v36, %v2737_v49 }
 0x91c   :  { %v2399_v3 = vpop.eup %2398  ;;  %v1152_v35 = vadd.f32 1e-06, %v1148_v33 }
 0x91d   :  { %v1156_v50 = vmul.f32 %v2399_v3, %v1151_v22  ;;  %vm1162_vm7 = vweird.f32 %v2399_v3 }
 0x91e   :  { %2400 = vrsqrt.f32 %v1152_v35  ;;  %vm1163_vm9 = vmor %vm1161_vm8, %vm1162_vm7  ;;  %vm1171_vm11 = vweird.f32 %v1152_v35 }
 0x91f   :  { %v1157_v41 = vmul.f32 %v2399_v3, %v1156_v50 }
 0x921   :  { %v1158_v8 = vmul.f32 0.5, %v1157_v41  ;;  %v1143_v42 = vpop.xlane.xlu0 %1142 }
 0x922   :  { %v1149_v34 = vmul.f32 %v1143_v42, %v2737_v49 }
 0x923   :  { %v1159_v45 = vsub.f32 1.5, %v1158_v8 }
 0x924   :  { %v2401_v47 = vpop.eup %2400  ;;  %v1153_v32 = vadd.f32 1e-06, %v1149_v34 }
 0x925   :  { %v1160_v7 = vmul.f32 %v2399_v3, %v1159_v45  ;;  %v1166_v9 = vmul.f32 %v2401_v47, %v1152_v35  ;;  %vm1172_vm10 = vweird.f32 %v2401_v47 }
 0x926   :  { %2402 = vrsqrt.f32 %v1153_v32  ;;  %vm1173_vm12 = vmor %vm1171_vm11, %vm1172_vm10  ;;  %vm1181_vm14 = vweird.f32 %v1153_v32 }
 0x927   :  { %v1164_v29 = vsel %vm1163_vm9, %v2399_v3, %v1160_v7  ;;  %v1167_v14 = vmul.f32 %v2401_v47, %v1166_v9 }
 0x928   :  { %v1195_v52 = vmul.f32 %v1164_v29, %v3470_v43 }
 0x929   :  { %v1168_v56 = vmul.f32 0.5, %v1167_v14  ;;  %v1146_v24 = vpop.xlane.xlu2 %1145 }
 0x92a   :  { %v1200_v10 = vmul.f32 %v1199_v51, %v1195_v52  ;;  %v1150_v60 = vmul.f32 %v1146_v24, %v2737_v49 }
 0x92b   :  { %v1169_v61 = vsub.f32 1.5, %v1168_v56 }
 0x92c   :  { %v2403_v63 = vpop.eup %2402  ;;  %v1154_v27 = vadd.f32 1e-06, %v1150_v60  ;;  %v1205_v0 = vadd.f32 %v1204_v53, %v1200_v10 }
 0x92d   :  { %v1170_v25 = vmul.f32 %v2401_v47, %v1169_v61  ;;  %v1176_v21 = vmul.f32 %v2403_v63, %v1153_v32  ;;  %vm1182_vm13 = vweird.f32 %v2403_v63 }
 0x92e   :  { %2404 = vrsqrt.f32 %v1154_v27  ;;  %2152 = vmatmul.msk.f32.vlgmr.msra.gmra.mxu1 %vm234_vm4, %v1205_v0  ;;  %vm1183_vm15 = vmor %vm1181_vm14, %vm1182_vm13  ;;  %vm1191_vm1 = vweird.f32 %v1154_v27 }
 0x92f   :  { %v1174_v43 = vsel %vm1173_vm12, %v2401_v47, %v1170_v25  ;;  %v1177_v5 = vmul.f32 %v2403_v63, %v1176_v21 }
 0x930   :  { %v1196_v13 = vmul.f32 %v1174_v43, %v3491_v44  ;;  %v2318_v43 = vpack.i.bf16 %v3528_v16, %v3518_v15 }
 0x931   :  { %v1178_v20 = vmul.f32 0.5, %v1177_v5  ;;  %v2328_v5 = vpack.i.bf16 %v3559_v59, %v3551_v48 }
 0x932   :  { %v1201_v26 = vmul.f32 %v1199_v51, %v1196_v13  ;;  %v2323_v13 = vpack.i.bf16 %v3543_v57, %v3535_v4 }
 0x933   :  { %v1179_v31 = vsub.f32 1.5, %v1178_v20 }
 0x934   :  { %v2405_v22 = vpop.eup %2404  ;;  %v1206_v36 = vadd.f32 %v1204_v53, %v1201_v26 }
 0x935   :  { %v1180_v33 = vmul.f32 %v2403_v63, %v1179_v31  ;;  %v1186_v3 = vmul.f32 %v2405_v22, %v1154_v27  ;;  %vm1192_vm0 = vweird.f32 %v2405_v22 }
 0x936   :  { %2153 = vmatmul.msk.f32.gmra.mxu1 %vm234_vm4, %v1206_v36  ;;  %vm1193_vm3 = vmor %vm1191_vm1, %vm1192_vm0 }
 0x937   :  { %v1184_v35 = vsel %vm1183_vm15, %v2403_v63, %v1180_v33  ;;  %v1187_v50 = vmul.f32 %v2405_v22, %v1186_v3 }
 0x938   :  { %v1197_v41 = vmul.f32 %v1184_v35, %v3502_v6  ;;  %v2350_v6 = vld [vmem:[%s3892_s14 + $0x1] ss:$0 sm:$0xff] }
 0x939   :  { %v1188_v8 = vmul.f32 0.5, %v1187_v50 }
 0x93a   :  { %v1202_v42 = vmul.f32 %v1199_v51, %v1197_v41 }
 0x93b   :  { %v1189_v34 = vsub.f32 1.5, %v1188_v8 }
 0x93c   :  { %v1207_v44 = vadd.f32 %v1204_v53, %v1202_v42 }
 0x93d   :  { %v1190_v45 = vmul.f32 %v2405_v22, %v1189_v34 }
 0x93e   :  { %2154 = vmatmul.msk.f32.gmra.mxu1 %vm234_vm4, %v1207_v44 }
 0x93f   :  { %v1194_v47 = vsel %vm1193_vm3, %v2405_v22, %v1190_v45 }
 0x940   :  { %v1198_v32 = vmul.f32 %v1194_v47, %v3513_v39 }
 0x942   :  { %v1203_v7 = vmul.f32 %v1199_v51, %v1198_v32 }
 0x944   :  { %v1208_v9 = vadd.f32 %v1204_v53, %v1203_v7 }
 0x946   :  { %2155 = vmatmul.msk.f32.gmra.mxu1 %vm234_vm4, %v1208_v9 }
 0x9ab   :  { %v1248_v29 = vpop.f32.mrf.mxu1 }
 0x9ac   :  { %v1249_v14 = vadd.f32 %v2350_v6, %v1248_v29 }
 0x9ae   :  { %2195 = vmatmul.msk.f32.vlgmr.msra.gmra.mxu3 %vm234_vm4, %v1249_v14 }
 0x9b3   :  { %v1251_v52 = vpop.f32.mrf.mxu1 }
 0x9b4   :  { %v1252_v56 = vadd.f32 %v2350_v6, %v1251_v52 }
 0x9b6   :  { %2196 = vmatmul.msk.f32.gmra.mxu3 %vm234_vm4, %v1252_v56 }
 0x9bb   :  { %v1254_v24 = vpop.f32.mrf.mxu1 }
 0x9bc   :  { %v1255_v10 = vadd.f32 %v2350_v6, %v1254_v24  ;;  %v2206_v24 = vld [vmem:[%s3895_s17 + $0x38] sm:$0xff] }
 0x9bd   :  { %1651 = vmatpush.msra.mxu2 %v2206_v24 }
 0x9be   :  { %2197 = vmatmul.msk.f32.gmra.mxu3 %vm234_vm4, %v1255_v10  ;;  %v2205_v10 = vld [vmem:[%s3895_s17 + $0x30] sm:$0xff] }
 0x9bf   :  { %1652 = vmatpush.msra.mxu2 %v2205_v10 }
 0x9c3   :  { %v1257_v39 = vpop.f32.mrf.mxu1 }
 0x9c4   :  { %v1258_v51 = vadd.f32 %v2350_v6, %v1257_v39  ;;  %v2204_v39 = vld [vmem:[%s3895_s17 + $0x28] sm:$0xff] }
 0x9c5   :  { %1653 = vmatpush.msra.mxu2 %v2204_v39  ;;  %v2215_v39 = vld [vmem:[%s3897_s19 + $0x38] sm:$0xff] }
 0x9c6   :  { %2198 = vmatmul.msk.f32.gmra.mxu3 %vm234_vm4, %v1258_v51 }
 0xa31   :  { %v1458_v53 = vpop.f32.mrf.mxu3 }
 0xa32   :  { %v1470_v60 = vmul.f32 0.35355338, %v1458_v53 }
 0xa34   :  { %1474 = vmax.xlane.f32.xlu1 %v1470_v60 }
 0xa39   :  { %v1461_v61 = vpop.f32.mrf.mxu3 }
 0xa3a   :  { %v1471_v63 = vmul.f32 0.35355338, %v1461_v61  ;;  %v2478_v61 = vld [vmem:[%s3888_s10] sm:$0xff] }
 0xa3c   :  { %1476 = vmax.xlane.f32.xlu0 %v1471_v63 }
 0xa41   :  { %v1464_v27 = vpop.f32.mrf.mxu3 }
 0xa42   :  { %v1472_v0 = vmul.f32 0.35355338, %v1464_v27 }
 0xa44   :  { %1478 = vmax.xlane.f32.xlu2 %v1472_v0 }
 0xa49   :  { %v1467_v25 = vpop.f32.mrf.mxu3 }
 0xa4a   :  { %v1473_v21 = vmul.f32 0.35355338, %v1467_v25 }
 0xa4c   :  { %1480 = vmax.xlane.f32.xlu1 %v1473_v21 }
 0xa50   :  { %2304 = vrot.lane.b32.xlu0 %v2303_v40, %s2510_s5 }
 0xa58   :  { %2319 = vrot.lane.b32.xlu0 %v2318_v43, %s2510_s5 }
 0xa5c   :  { %2309 = vrot.lane.b32.xlu2 %v2308_v23, %s2510_s5 }
 0xa60   :  { %2329 = vrot.lane.b32.xlu0 %v2328_v5, %s2510_s5 }
 0xa64   :  { %2324 = vrot.lane.b32.xlu2 %v2323_v13, %s2510_s5 }
 0xa65   :  { %2314 = vrot.lane.b32.xlu1 %v2313_v2, %s2510_s5 }
 0xa6c   :  { %2339 = vrot.lane.b32.xlu2 %v2338_v38, %s2510_s5 }
 0xa6d   :  { %2334 = vrot.lane.b32.xlu1 %v2333_v17, %s2510_s5  ;;  %v2480_v17 = vld [vmem:[%s3888_s10 + $0x10] sm:$0xff] }
 0xaa7   :  { %v1475_v37 = vpop.xlane.xlu1 %1474 }
 0xaa8   :  { %v1482_v23 = vsub.f32 %v1470_v60, %v1475_v37 }
 0xaaa   :  { %v1486_v28 = vmul.f32 1.442695, %v1482_v23 }
 0xaac   :  { %2406 = vpow2.f32 %v1486_v28 }
 0xaaf   :  { %v1477_v40 = vpop.xlane.xlu0 %1476 }
 0xab0   :  { %v1483_v15 = vsub.f32 %v1471_v63, %v1477_v40  ;;  %v2481_v40 = vld [vmem:[%s3888_s10 + $0x18] sm:$0xff] }
 0xab2   :  { %v3657_v16 = vpop.eup %2406  ;;  %v1488_v62 = vmul.f32 1.442695, %v1483_v15 }
 0xab3   :  { %1510 = vmatmul.f32.vlgmr.msrb.gmra.mxu2 %v3657_v16 }
 0xab4   :  { %2408 = vpow2.f32 %v1488_v62 }
 0xab7   :  { %v1479_v1 = vpop.xlane.xlu2 %1478 }
 0xab8   :  { %v1484_v2 = vsub.f32 %v1472_v0, %v1479_v1 }
 0xaba   :  { %v3660_v4 = vpop.eup %2408  ;;  %v1490_v57 = vmul.f32 1.442695, %v1484_v2 }
 0xabb   :  { %1513 = vmatmul.f32.gmra.mxu2 %v3660_v4 }
 0xabc   :  { %2410 = vpow2.f32 %v1490_v57  ;;  %v2351_v57 = vld [vmem:[%s3896_s18 + $0x1] ss:$0 sm:$0xff] }
 0xabf   :  { %v1481_v48 = vpop.xlane.xlu1 %1480  ;;  %v2310_v20 = vpop.permute.xlu2 %2309 }
 0xac0   :  { %v1485_v59 = vsub.f32 %v1473_v21, %v1481_v48  ;;  %v2311_v31 = vunpack.i.l.bf16 %v2310_v20  ;;  %v2312_v22 = vunpack.i.h.bf16 %v2310_v20  ;;  %v2479_v21 = vld [vmem:[%s3888_s10 + $0x8] sm:$0xff] }
 0xac2   :  { %v3663_v18 = vpop.eup %2410  ;;  %v1492_v11 = vmul.f32 1.442695, %v1485_v59  ;;  %v2305_v58 = vpop.permute.xlu0 %2304 }
 0xac3   :  { %v2306_v46 = vunpack.i.l.bf16 %v2305_v58  ;;  %1516 = vmatmul.f32.gmra.mxu2 %v3663_v18  ;;  %v2307_v26 = vunpack.i.h.bf16 %v2305_v58 }
 0xac4   :  { %2412 = vpow2.f32 %v1492_v11 }
 0xac5   :  { %1588 = vmatpush.msrb.mxu1 %v2306_v46 }
 0xac7   :  { %1589 = vmatpush.msrb.mxu1 %v2307_v26  ;;  %v2325_v8 = vpop.permute.xlu2 %2324 }
 0xac8   :  { %v2326_v34 = vunpack.i.l.bf16 %v2325_v8  ;;  %v2327_v45 = vunpack.i.h.bf16 %v2325_v8 }
 0xac9   :  { %1590 = vmatpush.msrb.mxu1 %v2311_v31 }
 0xaca   :  { %v3666_v36 = vpop.eup %2412  ;;  %v2320_v33 = vpop.permute.xlu0 %2319 }
 0xacb   :  { %1519 = vmatmul.f32.gmra.mxu2 %v3666_v36  ;;  %1591 = vmatpush.msrb.mxu1 %v2312_v22  ;;  %v2321_v41 = vunpack.i.l.bf16 %v2320_v33  ;;  %v2322_v42 = vunpack.i.h.bf16 %v2320_v33 }
 0xacf   :  { %v2340_v6 = vpop.permute.xlu2 %2339 }
 0xad0   :  { %v2341_v14 = vunpack.i.l.bf16 %v2340_v6  ;;  %v2342_v52 = vunpack.i.h.bf16 %v2340_v6 }
 0xad2   :  { %v2330_v44 = vpop.permute.xlu0 %2329 }
 0xad3   :  { %v2331_v47 = vunpack.i.l.bf16 %v2330_v44  ;;  %v2332_v7 = vunpack.i.h.bf16 %v2330_v44 }
 0xad7   :  { %v2315_v3 = vpop.permute.xlu1 %2314 }
 0xad8   :  { %v2316_v35 = vunpack.i.l.bf16 %v2315_v3  ;;  %v2317_v50 = vunpack.i.h.bf16 %v2315_v3 }
 0xada   :  { %1592 = vmatpush.msrb.mxu1 %v2316_v35 }
 0xadc   :  { %1593 = vmatpush.msrb.mxu1 %v2317_v50 }
 0xade   :  { %1594 = vmatpush.msrb.mxu1 %v2321_v41 }
 0xadf   :  { %v2335_v32 = vpop.permute.xlu1 %2334 }
 0xae0   :  { %1595 = vmatpush.msrb.mxu1 %v2322_v42  ;;  %v2336_v9 = vunpack.i.l.bf16 %v2335_v32  ;;  %v2337_v29 = vunpack.i.h.bf16 %v2335_v32 }
 0xae2   :  { %1596 = vmatpush.msrb.mxu1 %v2326_v34 }
 0xae4   :  { %1597 = vmatpush.msrb.mxu1 %v2327_v45 }
 0xae6   :  { %1598 = vmatpush.msrb.mxu1 %v2331_v47 }
 0xae8   :  { %1599 = vmatpush.msrb.mxu1 %v2332_v7 }
 0xaea   :  { %1600 = vmatpush.msrb.mxu1 %v2336_v9 }
 0xaec   :  { %1601 = vmatpush.msrb.mxu1 %v2337_v29 }
 0xaee   :  { %1602 = vmatpush.msrb.mxu1 %v2341_v14 }
 0xaf0   :  { %1603 = vmatpush.msrb.mxu1 %v2342_v52 }
 0xaf2   :  { %1804 = vmatpush.msra.mxu1 %v2215_v39 }
 0xb36   :  { %v1511_v56 = vpop.f32.mrf.mxu2 }
 0xb37   :  { %2414 = vrcp.f32 %v1511_v56 }
 0xb3d   :  { %v2415_v51 = vpop.eup %2414 }
 0xb3e   :  { %v1527_v53 = vmul.f32 %v2415_v51, %v3657_v16  ;;  %v1514_v60 = vpop.f32.mrf.mxu2  ;;  %v2203_v16 = vld [vmem:[%s3895_s17 + $0x20] sm:$0xff]  ;;  %v2214_v51 = vld [vmem:[%s3897_s19 + $0x30] sm:$0xff] }
 0xb3f   :  { %2416 = vrcp.f32 %v1514_v60  ;;  %1654 = vmatpush.msra.mxu2 %v2203_v16  ;;  %1805 = vmatpush.msra.mxu1 %v2214_v51  ;;  %v2212_v60 = vld [vmem:[%s3897_s19 + $0x20] sm:$0xff] }
 0xb40   :  { %v1531_v63 = vmul.f32 %v2478_v61, %v1527_v53  ;;  %v2213_v53 = vld [vmem:[%s3897_s19 + $0x28] sm:$0xff] }
 0xb41   :  { %1806 = vmatpush.msra.mxu1 %v2213_v53 }
 0xb42   :  { %2199 = vst [vmem:[%s3903_s25 + $0x20] sm:$0xff] %v1531_v63  ;;  %1604 = vmatmul.f32.vlgmr.msrb.gmra.mxu1 %v1531_v63 }
 0xb43   :  { %1807 = vmatpush.msra.mxu1 %v2212_v60  ;;  %v2226_v60 = vld [vmem:[%s3899_s21 + $0x68] sm:$0xff] }
 0xb45   :  { %v2417_v27 = vpop.eup %2416 }
 0xb46   :  { %v1517_v0 = vpop.f32.mrf.mxu2  ;;  %v1528_v25 = vmul.f32 %v2417_v27, %v3660_v4 }
 0xb47   :  { %2418 = vrcp.f32 %v1517_v0 }
 0xb48   :  { %v1532_v43 = vmul.f32 %v2479_v21, %v1528_v25 }
 0xb4a   :  { %2200 = vst [vmem:[%s3903_s25 + $0x28] sm:$0xff] %v1532_v43  ;;  %1607 = vmatmul.f32.gmra.mxu1 %v1532_v43 }
 0xb4d   :  { %v2419_v5 = vpop.eup %2418 }
 0xb4e   :  { %v1520_v13 = vpop.f32.mrf.mxu2  ;;  %v1529_v38 = vmul.f32 %v2419_v5, %v3663_v18 }
 0xb4f   :  { %2420 = vrcp.f32 %v1520_v13 }
 0xb50   :  { %v1533_v37 = vmul.f32 %v2480_v17, %v1529_v38 }
 0xb52   :  { %2201 = vst [vmem:[%s3903_s25 + $0x30] sm:$0xff] %v1533_v37  ;;  %1610 = vmatmul.f32.gmra.mxu1 %v1533_v37 }
 0xb55   :  { %v2421_v23 = vpop.eup %2420 }
 0xb56   :  { %v1530_v28 = vmul.f32 %v2421_v23, %v3666_v36 }
 0xb58   :  { %v1534_v15 = vmul.f32 %v2481_v40, %v1530_v28 }
 0xb5a   :  { %2202 = vst [vmem:[%s3903_s25 + $0x38] sm:$0xff] %v1534_v15  ;;  %1613 = vmatmul.f32.gmra.mxu1 %v1534_v15 }
 0xbbf   :  { %v1605_v62 = vpop.f32.mrf.mxu1 }
 0xbc0   :  { %2208 = vmatmul.msk.f32.vlgmr.msra.gmra.mxu2 %vm234_vm4, %v1605_v62  ;;  %v1760_v62 = vperm.slane %v3288_v30, 4 }
 0xbc7   :  { %v1608_v1 = vpop.f32.mrf.mxu1 }
 0xbc8   :  { %2209 = vmatmul.msk.f32.gmra.mxu2 %vm234_vm4, %v1608_v1  ;;  %v2228_v1 = vld [vmem:[%s3899_s21 + $0x78] sm:$0xff] }
 0xbc9   :  { %1891 = vmatpush.msrb.mxu3 %v2228_v1 }
 0xbcf   :  { %v1611_v2 = vpop.f32.mrf.mxu1 }
 0xbd0   :  { %2210 = vmatmul.msk.f32.gmra.mxu2 %vm234_vm4, %v1611_v2 }
 0xbd7   :  { %v1614_v4 = vpop.f32.mrf.mxu1 }
 0xbd8   :  { %2211 = vmatmul.msk.f32.gmra.mxu2 %vm234_vm4, %v1614_v4 }
 0xc43   :  { %v1656_v48 = vpop.f32.mrf.mxu2 }
 0xc44   :  { %v1657_v59 = vadd.f32 %v2351_v57, %v1656_v48  ;;  %v2482_v48 = vld [vmem:[%s3890_s12 + $0x8] sm:$0x3f] }
 0xc46   :  { %v3717_v18 = vadd.f32 %v1657_v59, %v3411_v12  ;;  %v1765_v59 = vperm.slane %v2482_v48, 5 }
 0xc48   :  { %v1672_v11 = vsel %vm234_vm4, %v3717_v18, 0.0 }
 0xc49   :  { %1673 = vadd.xlane.f32.xlu0 %v1672_v11 }
 0xc4b   :  { %v1659_v58 = vpop.f32.mrf.mxu2 }
 0xc4c   :  { %v1660_v46 = vadd.f32 %v2351_v57, %v1659_v58 }
 0xc4e   :  { %v3722_v20 = vadd.f32 %v1660_v46, %v3418_v19 }
 0xc50   :  { %v1675_v26 = vsel %vm234_vm4, %v3722_v20, 0.0 }
 0xc51   :  { %1676 = vadd.xlane.f32.xlu1 %v1675_v26 }
 0xc53   :  { %v1662_v31 = vpop.f32.mrf.mxu2 }
 0xc54   :  { %v1663_v22 = vadd.f32 %v2351_v57, %v1662_v31 }
 0xc56   :  { %v3727_v36 = vadd.f32 %v1663_v22, %v3425_v54 }
 0xc58   :  { %v1678_v12 = vsel %vm234_vm4, %v3727_v36, 0.0 }
 0xc59   :  { %1679 = vadd.xlane.f32.xlu2 %v1678_v12 }
 0xc5b   :  { %v1665_v33 = vpop.f32.mrf.mxu2 }
 0xc5c   :  { %v1666_v3 = vadd.f32 %v2351_v57, %v1665_v33 }
 0xc5e   :  { %v3732_v35 = vadd.f32 %v1666_v3, %v3432_v55 }
 0xc60   :  { %v1681_v19 = vsel %vm234_vm4, %v3732_v35, 0.0 }
 0xc61   :  { %1682 = vadd.xlane.f32.xlu0 %v1681_v19 }
 0xcbc   :  { %v1674_v50 = vpop.xlane.xlu0 %1673 }
 0xcbd   :  { %v1684_v41 = vmul.f32 %v1674_v50, %v2737_v49 }
 0xcbf   :  { %v1688_v8 = vsub.f32 %v3717_v18, %v1684_v41 }
 0xcc1   :  { %v1692_v54 = vmul.f32 %v1688_v8, %v1688_v8 }
 0xcc3   :  { %v1696_v42 = vsel %vm234_vm4, %v1692_v54, 0.0 }
 0xcc4   :  { %1697 = vadd.xlane.f32.xlu1 %v1696_v42  ;;  %v1677_v34 = vpop.xlane.xlu1 %1676 }
 0xcc5   :  { %v1685_v44 = vmul.f32 %v1677_v34, %v2737_v49 }
 0xcc7   :  { %v3741_v45 = vsub.f32 %v3722_v20, %v1685_v44 }
 0xcc9   :  { %v1693_v55 = vmul.f32 %v3741_v45, %v3741_v45 }
 0xccb   :  { %v1699_v47 = vsel %vm234_vm4, %v1693_v55, 0.0 }
 0xccc   :  { %1700 = vadd.xlane.f32.xlu2 %v1699_v47  ;;  %v1680_v32 = vpop.xlane.xlu2 %1679 }
 0xccd   :  { %v1686_v7 = vmul.f32 %v1680_v32, %v2737_v49 }
 0xccf   :  { %v3748_v9 = vsub.f32 %v3727_v36, %v1686_v7 }
 0xcd1   :  { %v1694_v6 = vmul.f32 %v3748_v9, %v3748_v9 }
 0xcd3   :  { %v1702_v29 = vsel %vm234_vm4, %v1694_v6, 0.0 }
 0xcd4   :  { %1703 = vadd.xlane.f32.xlu0 %v1702_v29  ;;  %v1683_v14 = vpop.xlane.xlu0 %1682 }
 0xcd5   :  { %v1687_v52 = vmul.f32 %v1683_v14, %v2737_v49 }
 0xcd7   :  { %v3755_v56 = vsub.f32 %v3732_v35, %v1687_v52 }
 0xcd9   :  { %v1695_v24 = vmul.f32 %v3755_v56, %v3755_v56 }
 0xcdb   :  { %v1705_v10 = vsel %vm234_vm4, %v1695_v24, 0.0 }
 0xcdc   :  { %1706 = vadd.xlane.f32.xlu1 %v1705_v10 }
 0xd37   :  { %v1698_v61 = vpop.xlane.xlu1 %1697 }
 0xd38   :  { %v1708_v63 = vmul.f32 %v1698_v61, %v2737_v49  ;;  %v2225_v61 = vld [vmem:[%s3899_s21 + $0x60] sm:$0xff] }
 0xd3a   :  { %v1712_v27 = vadd.f32 1e-06, %v1708_v63  ;;  %v2223_v63 = vld [vmem:[%s3899_s21 + $0x50] sm:$0xff] }
 0xd3c   :  { %2422 = vrsqrt.f32 %v1712_v27  ;;  %vm1722_vm6 = vweird.f32 %v1712_v27 }
 0xd3f   :  { %v1701_v0 = vpop.xlane.xlu2 %1700 }
 0xd40   :  { %v1709_v25 = vmul.f32 %v1701_v0, %v2737_v49  ;;  %v2221_v0 = vld [vmem:[%s3899_s21 + $0x40] sm:$0xff] }
 0xd42   :  { %v2423_v21 = vpop.eup %2422  ;;  %v1713_v43 = vadd.f32 1e-06, %v1709_v25  ;;  %v2352_v25 = vld [vmem:[%s3898_s20 + $0x1] ss:$0 sm:$0xff] }
 0xd43   :  { %v1717_v5 = vmul.f32 %v2423_v21, %v1712_v27  ;;  %vm1723_vm5 = vweird.f32 %v2423_v21  ;;  %v2222_v27 = vld [vmem:[%s3899_s21 + $0x48] sm:$0xff] }
 0xd44   :  { %2424 = vrsqrt.f32 %v1713_v43  ;;  %vm1724_vm7 = vmor %vm1722_vm6, %vm1723_vm5  ;;  %vm1732_vm9 = vweird.f32 %v1713_v43 }
 0xd45   :  { %v1718_v13 = vmul.f32 %v2423_v21, %v1717_v5 }
 0xd47   :  { %v1719_v38 = vmul.f32 0.5, %v1718_v13  ;;  %v1704_v17 = vpop.xlane.xlu0 %1703 }
 0xd48   :  { %v1710_v37 = vmul.f32 %v1704_v17, %v2737_v49 }
 0xd49   :  { %v1720_v23 = vsub.f32 1.5, %v1719_v38 }
 0xd4a   :  { %v2425_v28 = vpop.eup %2424  ;;  %v1714_v40 = vadd.f32 1e-06, %v1710_v37 }
 0xd4b   :  { %v1721_v15 = vmul.f32 %v2423_v21, %v1720_v23  ;;  %v1727_v16 = vmul.f32 %v2425_v28, %v1713_v43  ;;  %vm1733_vm8 = vweird.f32 %v2425_v28 }
 0xd4c   :  { %2426 = vrsqrt.f32 %v1714_v40  ;;  %vm1734_vm10 = vmor %vm1732_vm9, %vm1733_vm8  ;;  %vm1742_vm12 = vweird.f32 %v1714_v40 }
 0xd4d   :  { %v1725_v2 = vsel %vm1724_vm7, %v2423_v21, %v1721_v15  ;;  %v1728_v4 = vmul.f32 %v2425_v28, %v1727_v16 }
 0xd4e   :  { %v1756_v57 = vmul.f32 %v1725_v2, %v1688_v8 }
 0xd4f   :  { %v1729_v11 = vmul.f32 0.5, %v1728_v4  ;;  %v1707_v58 = vpop.xlane.xlu1 %1706 }
 0xd50   :  { %v1761_v46 = vmul.f32 %v1760_v62, %v1756_v57  ;;  %v1711_v30 = vmul.f32 %v1707_v58, %v2737_v49 }
 0xd51   :  { %v1730_v26 = vsub.f32 1.5, %v1729_v11 }
 0xd52   :  { %v2427_v31 = vpop.eup %2426  ;;  %v1715_v22 = vadd.f32 1e-06, %v1711_v30  ;;  %v1766_v12 = vadd.f32 %v1765_v59, %v1761_v46 }
 0xd53   :  { %v1731_v33 = vmul.f32 %v2425_v28, %v1730_v26  ;;  %v1737_v3 = vmul.f32 %v2427_v31, %v1714_v40  ;;  %vm1743_vm11 = vweird.f32 %v2427_v31 }
 0xd54   :  { %2428 = vrsqrt.f32 %v1715_v22  ;;  %2217 = vmatmul.msk.f32.vlgmr.msra.gmra.mxu1 %vm234_vm4, %v1766_v12  ;;  %vm1744_vm13 = vmor %vm1742_vm12, %vm1743_vm11  ;;  %vm1752_vm15 = vweird.f32 %v1715_v22 }
 0xd55   :  { %v1735_v19 = vsel %vm1734_vm10, %v2425_v28, %v1731_v33  ;;  %v1738_v50 = vmul.f32 %v2427_v31, %v1737_v3 }
 0xd56   :  { %v1757_v41 = vmul.f32 %v1735_v19, %v3741_v45 }
 0xd57   :  { %v1739_v8 = vmul.f32 0.5, %v1738_v50 }
 0xd58   :  { %v1762_v54 = vmul.f32 %v1760_v62, %v1757_v41 }
 0xd59   :  { %v1740_v42 = vsub.f32 1.5, %v1739_v8 }
 0xd5a   :  { %v2429_v34 = vpop.eup %2428  ;;  %v1767_v44 = vadd.f32 %v1765_v59, %v1762_v54 }
 0xd5b   :  { %v1741_v55 = vmul.f32 %v2427_v31, %v1740_v42  ;;  %v1747_v47 = vmul.f32 %v2429_v34, %v1715_v22  ;;  %vm1753_vm14 = vweird.f32 %v2429_v34 }
 0xd5c   :  { %2218 = vmatmul.msk.f32.gmra.mxu1 %vm234_vm4, %v1767_v44  ;;  %vm1754_vm0 = vmor %vm1752_vm15, %vm1753_vm14 }
 0xd5d   :  { %v1745_v32 = vsel %vm1744_vm13, %v2427_v31, %v1741_v55  ;;  %v1748_v7 = vmul.f32 %v2429_v34, %v1747_v47 }
 0xd5e   :  { %v1758_v6 = vmul.f32 %v1745_v32, %v3748_v9  ;;  %v2227_v9 = vld [vmem:[%s3899_s21 + $0x70] sm:$0xff] }
 0xd5f   :  { %v1749_v29 = vmul.f32 0.5, %v1748_v7  ;;  %1892 = vmatpush.msrb.mxu3 %v2227_v9 }
 0xd60   :  { %v1763_v14 = vmul.f32 %v1760_v62, %v1758_v6 }
 0xd61   :  { %v1750_v52 = vsub.f32 1.5, %v1749_v29  ;;  %1893 = vmatpush.msrb.mxu3 %v2226_v60 }
 0xd62   :  { %v1768_v45 = vadd.f32 %v1765_v59, %v1763_v14 }
 0xd63   :  { %v1751_v24 = vmul.f32 %v2429_v34, %v1750_v52  ;;  %1894 = vmatpush.msrb.mxu3 %v2225_v61  ;;  %v2353_v52 = vld [vmem:[%s3900_s22 + $0x1] ss:$0 sm:$0xff] }
 0xd64   :  { %2219 = vmatmul.msk.f32.gmra.mxu1 %vm234_vm4, %v1768_v45 }
 0xd65   :  { %v1755_v10 = vsel %vm1754_vm0, %v2429_v34, %v1751_v24 }
 0xd66   :  { %v1759_v39 = vmul.f32 %v1755_v10, %v3755_v56  ;;  %v2224_v56 = vld [vmem:[%s3899_s21 + $0x58] sm:$0xff] }
 0xd67   :  { %1895 = vmatpush.msrb.mxu3 %v2224_v56 }
 0xd68   :  { %v1764_v51 = vmul.f32 %v1760_v62, %v1759_v39 }
 0xd69   :  { %1896 = vmatpush.msrb.mxu3 %v2223_v63 }
 0xd6a   :  { %v1769_v53 = vadd.f32 %v1765_v59, %v1764_v51 }
 0xd6b   :  { %1897 = vmatpush.msrb.mxu3 %v2222_v27 }
 0xd6c   :  { %2220 = vmatmul.msk.f32.gmra.mxu1 %vm234_vm4, %v1769_v53 }
 0xd6d   :  { %1898 = vmatpush.msrb.mxu3 %v2221_v0 }
 0xdd1   :  { %v1809_v21 = vpop.f32.mrf.mxu1 }
 0xdd2   :  { %v1810_v43 = vadd.f32 %v2352_v25, %v1809_v21 }
 0xdd4   :  { %v1825_v5 = vmul.f32 0.044715, %v1810_v43  ;;  %v1821_v59 = vmul.f32 0.5, %v1810_v43 }
 0xdd6   :  { %v1829_v13 = vmul.f32 %v1825_v5, %v1810_v43 }
 0xdd8   :  { %v1833_v38 = vmul.f32 %v1829_v13, %v1810_v43 }
 0xdd9   :  { %v1812_v17 = vpop.f32.mrf.mxu1 }
 0xdda   :  { %v1837_v37 = vadd.f32 %v1833_v38, %v1810_v43  ;;  %v1813_v23 = vadd.f32 %v2352_v25, %v1812_v17 }
 0xddc   :  { %v1841_v28 = vmul.f32 0.7978846, %v1837_v37  ;;  %v1826_v40 = vmul.f32 0.044715, %v1813_v23  ;;  %v1822_v19 = vmul.f32 0.5, %v1813_v23 }
 0xdde   :  { %2430 = vtanh.f32 %v1841_v28  ;;  %v1830_v15 = vmul.f32 %v1826_v40, %v1813_v23 }
 0xde0   :  { %v1834_v16 = vmul.f32 %v1830_v15, %v1813_v23 }
 0xde1   :  { %v1815_v62 = vpop.f32.mrf.mxu1 }
 0xde2   :  { %v1816_v1 = vadd.f32 %v2352_v25, %v1815_v62  ;;  %v1838_v2 = vadd.f32 %v1834_v16, %v1813_v23 }
 0xde4   :  { %v2431_v4 = vpop.eup %2430  ;;  %v1827_v57 = vmul.f32 0.044715, %v1816_v1  ;;  %v1842_v48 = vmul.f32 0.7978846, %v1838_v2  ;;  %v1823_v55 = vmul.f32 0.5, %v1816_v1 }
 0xde5   :  { %v1849_v11 = vadd.f32 1.0, %v2431_v4 }
 0xde6   :  { %2432 = vtanh.f32 %v1842_v48  ;;  %v1831_v58 = vmul.f32 %v1827_v57, %v1816_v1 }
 0xde7   :  { %v1853_v46 = vmul.f32 %v1849_v11, %v1821_v59  ;;  %v2018_v59 = vld [vmem:[%s3889_s11 + $0x18] sm:$0xff]  ;;  %v2017_v11 = vld [vmem:[%s3889_s11 + $0x10] sm:$0xff] }
 0xde8   :  { %v1835_v30 = vmul.f32 %v1831_v58, %v1816_v1  ;;  %2043 = vmatpush.msrb.mxu2 %v2018_v59  ;;  %2254 = vmatpush.msra.mxu3 %v2018_v59  ;;  %v2016_v58 = vld [vmem:[%s3889_s11 + $0x8] sm:$0xff] }
 0xde9   :  { %v1818_v26 = vpop.f32.mrf.mxu1  ;;  %2230 = vmatmul.msk.f32.vlgmr.msrb.gmra.mxu3 %vm148_vm2, %v1853_v46  ;;  %v2015_v46 = vld [vmem:[%s3889_s11] sm:$0xff] }
 0xdea   :  { %v1819_v31 = vadd.f32 %v2352_v25, %v1818_v26  ;;  %v1839_v22 = vadd.f32 %v1835_v30, %v1816_v1  ;;  %2044 = vmatpush.msrb.mxu2 %v2017_v11  ;;  %2255 = vmatpush.msra.mxu3 %v2017_v11 }
 0xdec   :  { %v2433_v12 = vpop.eup %2432  ;;  %v1828_v33 = vmul.f32 0.044715, %v1819_v31  ;;  %v1843_v3 = vmul.f32 0.7978846, %v1839_v22  ;;  %v1824_v6 = vmul.f32 0.5, %v1819_v31  ;;  %2045 = vmatpush.msrb.mxu2 %v2016_v58  ;;  %2256 = vmatpush.msra.mxu3 %v2016_v58 }
 0xded   :  { %v1850_v50 = vadd.f32 1.0, %v2433_v12 }
 0xdee   :  { %v1832_v41 = vmul.f32 %v1828_v33, %v1819_v31  ;;  %2434 = vtanh.f32 %v1843_v3  ;;  %2046 = vmatpush.msrb.mxu2 %v2015_v46  ;;  %2257 = vmatpush.msra.mxu3 %v2015_v46 }
 0xdef   :  { %v1854_v8 = vmul.f32 %v1850_v50, %v1822_v19 }
 0xdf0   :  { %v1836_v54 = vmul.f32 %v1832_v41, %v1819_v31 }
 0xdf1   :  { %2231 = vmatmul.msk.f32.gmra.mxu3 %vm148_vm2, %v1854_v8 }
 0xdf2   :  { %v1840_v42 = vadd.f32 %v1836_v54, %v1819_v31 }
 0xdf4   :  { %v2435_v34 = vpop.eup %2434  ;;  %v1844_v44 = vmul.f32 0.7978846, %v1840_v42  ;;  %v1916_v42 = vld [vmem:[%s3901_s23] sm:$0x3]  ;;  %s2511_s23 = smov [#allocation2]  }
 0xdf5   :  { %v1851_v47 = vadd.f32 1.0, %v2435_v34  ;;  %s2068_s4 = sshll.u32 %s2511_s23, 4  ;;  %s2069_s4 = int_to_ptr.vmem [resolvable:$true] %s2068_s4 }
 0xdf6   :  { %2436 = vtanh.f32 %v1844_v44 }
 0xdf7   :  { %v1855_v32 = vmul.f32 %v1851_v47, %v1823_v55 }
 0xdf9   :  { %2232 = vmatmul.msk.f32.gmra.mxu3 %vm148_vm2, %v1855_v32 }
 0xdfc   :  { %v2437_v7 = vpop.eup %2436 }
 0xdfd   :  { %v1852_v29 = vadd.f32 1.0, %v2437_v7  ;;  %v2005_v7 = vperm.slane %v1916_v42, 0 }
 0xdff   :  { %v1856_v14 = vmul.f32 %v1852_v29, %v1824_v6 }
 0xe01   :  { %2233 = vmatmul.msk.f32.gmra.mxu3 %vm148_vm2, %v1856_v14 }
 0xe6c   :  { %v1900_v45 = vpop.f32.mrf.mxu3 }
 0xe6d   :  { %v1901_v24 = vadd.f32 %v2353_v52, %v1900_v45 }
 0xe6f   :  { %v1912_v10 = vadd.f32 %v1901_v24, %v3717_v18 }
 0xe71   :  { %v1917_v39 = vsel %vm234_vm4, %v1912_v10, 0.0 }
 0xe72   :  { %1918 = vadd.xlane.f32.xlu2 %v1917_v39 }
 0xe74   :  { %v1903_v51 = vpop.f32.mrf.mxu3 }
 0xe75   :  { %v1904_v53 = vadd.f32 %v2353_v52, %v1903_v51 }
 0xe77   :  { %v1913_v9 = vadd.f32 %v1904_v53, %v3722_v20 }
 0xe79   :  { %v1920_v60 = vsel %vm234_vm4, %v1913_v9, 0.0 }
 0xe7a   :  { %1921 = vadd.xlane.f32.xlu0 %v1920_v60 }
 0xe7c   :  { %v1906_v61 = vpop.f32.mrf.mxu3 }
 0xe7d   :  { %v1907_v56 = vadd.f32 %v2353_v52, %v1906_v61 }
 0xe7f   :  { %v1914_v63 = vadd.f32 %v1907_v56, %v3727_v36 }
 0xe81   :  { %v1923_v27 = vsel %vm234_vm4, %v1914_v63, 0.0 }
 0xe82   :  { %1924 = vadd.xlane.f32.xlu1 %v1923_v27 }
 0xe84   :  { %v1909_v0 = vpop.f32.mrf.mxu3 }
 0xe85   :  { %v1910_v25 = vadd.f32 %v2353_v52, %v1909_v0  ;;  %v2010_v52 = vperm.slane %v1916_v42, 1 }
 0xe87   :  { %v1915_v18 = vadd.f32 %v1910_v25, %v3732_v35 }
 0xe89   :  { %v1926_v21 = vsel %vm234_vm4, %v1915_v18, 0.0 }
 0xe8a   :  { %1927 = vadd.xlane.f32.xlu2 %v1926_v21 }
 0xee5   :  { %v1919_v43 = vpop.xlane.xlu2 %1918 }
 0xee6   :  { %v1929_v20 = vmul.f32 %v1919_v43, %v2737_v49 }
 0xee8   :  { %v1933_v5 = vsub.f32 %v1912_v10, %v1929_v20 }
 0xeea   :  { %v1937_v13 = vmul.f32 %v1933_v5, %v1933_v5 }
 0xeec   :  { %v1941_v38 = vsel %vm234_vm4, %v1937_v13, 0.0 }
 0xeed   :  { %1942 = vadd.xlane.f32.xlu0 %v1941_v38  ;;  %v1922_v17 = vpop.xlane.xlu0 %1921 }
 0xeee   :  { %v1930_v36 = vmul.f32 %v1922_v17, %v2737_v49 }
 0xef0   :  { %v3832_v37 = vsub.f32 %v1913_v9, %v1930_v36 }
 0xef2   :  { %v1938_v23 = vmul.f32 %v3832_v37, %v3832_v37 }
 0xef4   :  { %v1944_v35 = vsel %vm234_vm4, %v1938_v23, 0.0 }
 0xef5   :  { %v1925_v28 = vpop.xlane.xlu1 %1924  ;;  %1945 = vadd.xlane.f32.xlu1 %v1944_v35 }
 0xef6   :  { %v1931_v40 = vmul.f32 %v1925_v28, %v2737_v49 }
 0xef8   :  { %v3838_v15 = vsub.f32 %v1914_v63, %v1931_v40 }
 0xefa   :  { %v1939_v16 = vmul.f32 %v3838_v15, %v3838_v15 }
 0xefc   :  { %v1947_v62 = vsel %vm234_vm4, %v1939_v16, 0.0 }
 0xefd   :  { %v1928_v1 = vpop.xlane.xlu2 %1927  ;;  %1948 = vadd.xlane.f32.xlu2 %v1947_v62 }
 0xefe   :  { %v1932_v2 = vmul.f32 %v1928_v1, %v2737_v49 }
 0xf00   :  { %v3844_v4 = vsub.f32 %v1915_v18, %v1932_v2 }
 0xf02   :  { %v1940_v57 = vmul.f32 %v3844_v4, %v3844_v4 }
 0xf04   :  { %v1950_v48 = vsel %vm234_vm4, %v1940_v57, 0.0 }
 0xf05   :  { %1951 = vadd.xlane.f32.xlu0 %v1950_v48 }
 0xf60   :  { %v1943_v30 = vpop.xlane.xlu0 %1942 }
 0xf61   :  { %v1953_v26 = vmul.f32 %v1943_v30, %v2737_v49 }
 0xf63   :  { %v1957_v31 = vadd.f32 1e-06, %v1953_v26 }
 0xf65   :  { %2438 = vrsqrt.f32 %v1957_v31  ;;  %vm1967_vm1 = vweird.f32 %v1957_v31 }
 0xf68   :  { %v1946_v22 = vpop.xlane.xlu1 %1945 }
 0xf69   :  { %v1954_v12 = vmul.f32 %v1946_v22, %v2737_v49 }
 0xf6b   :  { %v2439_v33 = vpop.eup %2438  ;;  %v1958_v3 = vadd.f32 1e-06, %v1954_v12 }
 0xf6c   :  { %v1962_v19 = vmul.f32 %v2439_v33, %v1957_v31  ;;  %vm1968_vm2 = vweird.f32 %v2439_v33 }
 0xf6d   :  { %2440 = vrsqrt.f32 %v1958_v3  ;;  %vm1969_vm3 = vmor %vm1967_vm1, %vm1968_vm2  ;;  %vm1977_vm6 = vweird.f32 %v1958_v3 }
 0xf6e   :  { %v1963_v50 = vmul.f32 %v2439_v33, %v1962_v19 }
 0xf70   :  { %v1964_v41 = vmul.f32 0.5, %v1963_v50  ;;  %v1949_v8 = vpop.xlane.xlu2 %1948 }
 0xf71   :  { %v1955_v54 = vmul.f32 %v1949_v8, %v2737_v49 }
 0xf72   :  { %v1965_v34 = vsub.f32 1.5, %v1964_v41 }
 0xf73   :  { %v2441_v44 = vpop.eup %2440  ;;  %v1959_v55 = vadd.f32 1e-06, %v1955_v54 }
 0xf74   :  { %v1966_v47 = vmul.f32 %v2439_v33, %v1965_v34  ;;  %v1972_v32 = vmul.f32 %v2441_v44, %v1958_v3  ;;  %vm1978_vm5 = vweird.f32 %v2441_v44 }
 0xf75   :  { %2442 = vrsqrt.f32 %v1959_v55  ;;  %vm1979_vm7 = vmor %vm1977_vm6, %vm1978_vm5  ;;  %vm1987_vm9 = vweird.f32 %v1959_v55 }
 0xf76   :  { %v1970_v6 = vsel %vm1969_vm3, %v2439_v33, %v1966_v47  ;;  %v1973_v29 = vmul.f32 %v2441_v44, %v1972_v32 }
 0xf77   :  { %v2001_v14 = vmul.f32 %v1970_v6, %v1933_v5 }
 0xf78   :  { %v1974_v45 = vmul.f32 0.5, %v1973_v29  ;;  %v1952_v24 = vpop.xlane.xlu0 %1951 }
 0xf79   :  { %v2006_v10 = vmul.f32 %v2005_v7, %v2001_v14  ;;  %v1956_v39 = vmul.f32 %v1952_v24, %v2737_v49 }
 0xf7a   :  { %v1975_v51 = vsub.f32 1.5, %v1974_v45 }
 0xf7b   :  { %v2443_v53 = vpop.eup %2442  ;;  %v1960_v9 = vadd.f32 1e-06, %v1956_v39  ;;  %v2011_v60 = vadd.f32 %v2010_v52, %v2006_v10 }
 0xf7c   :  { %v1976_v61 = vmul.f32 %v2441_v44, %v1975_v51  ;;  %v1982_v56 = vmul.f32 %v2443_v53, %v1959_v55  ;;  %vm1988_vm8 = vweird.f32 %v2443_v53 }
 0xf7d   :  { %2444 = vrsqrt.f32 %v1960_v9  ;;  %2234 = vmatmul.msk.f32.vlgmr.msrb.gmra.mxu2 %vm234_vm4, %v2011_v60  ;;  %vm1989_vm10 = vmor %vm1987_vm9, %vm1988_vm8  ;;  %vm1997_vm12 = vweird.f32 %v1960_v9 }
 0xf7e   :  { %v1980_v63 = vsel %vm1979_vm7, %v2441_v44, %v1976_v61  ;;  %v1983_v27 = vmul.f32 %v2443_v53, %v1982_v56 }
 0xf7f   :  { %v2002_v0 = vmul.f32 %v1980_v63, %v3832_v37 }
 0xf80   :  { %v1984_v25 = vmul.f32 0.5, %v1983_v27 }
 0xf81   :  { %v2007_v18 = vmul.f32 %v2005_v7, %v2002_v0 }
 0xf82   :  { %v1985_v21 = vsub.f32 1.5, %v1984_v25 }
 0xf83   :  { %v2445_v49 = vpop.eup %2444  ;;  %v2012_v43 = vadd.f32 %v2010_v52, %v2007_v18 }
 0xf84   :  { %v1986_v20 = vmul.f32 %v2443_v53, %v1985_v21  ;;  %v1992_v5 = vmul.f32 %v2445_v49, %v1960_v9  ;;  %vm1998_vm11 = vweird.f32 %v2445_v49 }
 0xf85   :  { %2235 = vmatmul.msk.f32.gmra.mxu2 %vm234_vm4, %v2012_v43  ;;  %vm1999_vm13 = vmor %vm1997_vm12, %vm1998_vm11 }
 0xf86   :  { %v1990_v13 = vsel %vm1989_vm10, %v2443_v53, %v1986_v20  ;;  %v1993_v38 = vmul.f32 %v2445_v49, %v1992_v5 }
 0xf87   :  { %v2003_v17 = vmul.f32 %v1990_v13, %v3838_v15 }
 0xf88   :  { %v1994_v36 = vmul.f32 0.5, %v1993_v38 }
 0xf89   :  { %v2008_v23 = vmul.f32 %v2005_v7, %v2003_v17 }
 0xf8a   :  { %v1995_v35 = vsub.f32 1.5, %v1994_v36 }
 0xf8b   :  { %v2013_v37 = vadd.f32 %v2010_v52, %v2008_v23 }
 0xf8c   :  { %v1996_v28 = vmul.f32 %v2445_v49, %v1995_v35 }
 0xf8d   :  { %2236 = vmatmul.msk.f32.gmra.mxu2 %vm234_vm4, %v2013_v37 }
 0xf8e   :  { %v2000_v40 = vsel %vm1999_vm13, %v2445_v49, %v1996_v28 }
 0xf8f   :  { %v2004_v16 = vmul.f32 %v2000_v40, %v3844_v4 }
 0xf91   :  { %v2009_v62 = vmul.f32 %v2005_v7, %v2004_v16 }
 0xf93   :  { %v2014_v1 = vadd.f32 %v2010_v52, %v2009_v62 }
 0xf95   :  { %2237 = vmatmul.msk.f32.vlgmr.msra.gmra.mxu3 %vm234_vm4, %v2014_v1 }
0x1000   :  { %v2048_v2 = vpop.f32.mrf.mxu2 }
0x1001   :  { %2060 = vst [vmem:[#allocation2] sm:$0xff] %v2048_v2 }
0x1008   :  { %v2051_v15 = vpop.f32.mrf.mxu2 }
0x1009   :  { %2061 = vst [vmem:[#allocation2 + $0x8] sm:$0xff] %v2051_v15 }
0x1010   :  { %v2054_v57 = vpop.f32.mrf.mxu2 }
0x1011   :  { %2062 = vst [vmem:[#allocation2 + $0x10] sm:$0xff] %v2054_v57 }
0x1018   :  { %v2057_v48 = vpop.f32.mrf.mxu3 }
0x1019   :  { %2063 = vst [vmem:[#allocation2 + $0x18] sm:$0xff] %v2057_v48 }
0x101a   :  { %2076 = dma.vmem_to_hbm [thread:$0]  %s2069_s4, 512, %s2071_s30, [#allocation3], %s2512_s0, %s2512_s0, %s2513_s13  }
0x101b   :  { %2507 = dma.done.wait [#allocation3], 512  }
0x101c   :  { %2508 = vsyncadd [#allocation3], 4294966784 }
0x101d   :  { %2085 = vsyncpa [#allocation3], 1 }

</bundles_post_ra>
